<compile_context>
chip_gen: v7x
topology: tpu7x:2x2x1
jax: 0.10.0
libtpu: 0.0.40
codegen_flags: <defaults>
</compile_context>

<pallas_src>
import functools

import jax
import jax.numpy as jnp
from jax.experimental import pallas as pl
from jax.experimental.pallas import tpu as pltpu

F32 = jnp.float32
BF16 = jnp.bfloat16


def _round_up(x, m):
    return (x + m - 1) // m * m


def _layernorm_padded(x, g, b, true_dim, eps=1e-5):
    """LayerNorm over the first `true_dim` lanes of a zero-lane-padded tensor.

    Padded lanes of x are exactly zero and g/b are zero-padded, so
    mean = sum(x)/true_dim, E[x^2] = sum(x^2)/true_dim are exact and the padded
    lanes of the result stay zero.
    """
    inv_d = 1.0 / float(true_dim)
    mean = jnp.sum(x, axis=-1, keepdims=True) * inv_d
    var = jnp.sum(x * x, axis=-1, keepdims=True) * inv_d - mean * mean
    return (x - mean) * jax.lax.rsqrt(var + eps) * g + b


# ----------------------------- fused Pallas kernel ------------------------------

def _vit_fused_kernel(
    tokens_ref, pe_w_ref, pe_b_ref, pos_ref,
    ln1_g_ref, ln1_b_ref, qkv_w_ref, qkv_b_ref, out_w_ref, out_b_ref,
    ln2_g_ref, ln2_b_ref, ff1_w_ref, ff1_b_ref, ff2_w_ref, ff2_b_ref,
    lnf_g_ref, lnf_b_ref, cls_w_ref,
    o_ref,
    *, b_blk, n, dim, heads, dim_head, depth):
    """One grid step = B_BLK images. All activations stay in VMEM/vregs."""
    dim_pad = pe_w_ref.shape[1]
    M = b_blk * n
    scale = float(dim_head) ** -0.5

    # --- patch embedding (bf16 in, f32 acc) + positional embedding ---
    x = jnp.dot(tokens_ref[...], pe_w_ref[...], preferred_element_type=F32)
    x = x + pe_b_ref[...]
    x = (x.reshape(b_blk, n, dim_pad) + pos_ref[...][None]).reshape(M, dim_pad)

    # PatchDropout: identity in eval mode.

    for l in range(depth):
        # ---- attention block ----
        h = _layernorm_padded(x, ln1_g_ref[l], ln1_b_ref[l], dim).astype(BF16)
        q = jnp.dot(h, qkv_w_ref[l, 0], preferred_element_type=F32) + qkv_b_ref[l, 0]
        k = jnp.dot(h, qkv_w_ref[l, 1], preferred_element_type=F32) + qkv_b_ref[l, 1]
        v = jnp.dot(h, qkv_w_ref[l, 2], preferred_element_type=F32) + qkv_b_ref[l, 2]
        q = q * scale                                   # fold 1/sqrt(dh) into q once

        q3 = q.reshape(b_blk, n, heads * dim_head).astype(BF16)
        k3 = k.reshape(b_blk, n, heads * dim_head).astype(BF16)
        v3 = v.reshape(b_blk, n, heads * dim_head).astype(BF16)

        attn = jnp.zeros((M, dim_pad), F32)
        for hi in range(heads):
            cs = slice(hi * dim_head, (hi + 1) * dim_head)
            qh, kh, vh = q3[:, :, cs], k3[:, :, cs], v3[:, :, cs]   # (b_blk, n, dh)
            s = jnp.einsum('bqd,bkd->bqk', qh, kh,
                           preferred_element_type=F32)              # (b_blk, n, n)
            s = s - jnp.max(s, axis=-1, keepdims=True)
            p = jnp.exp(s)
            p = p * pl.reciprocal(jnp.sum(p, axis=-1, keepdims=True), approx=True)
            oh = jnp.einsum('bqk,bkd->bqd', p.astype(BF16), vh,
                            preferred_element_type=F32)             # (b_blk, n, dh)
            # project this head straight into the residual width (no concatenate)
            attn = attn + jnp.dot(oh.reshape(M, dim_head).astype(BF16),
                                  out_w_ref[l, hi], preferred_element_type=F32)
        x = x + attn + out_b_ref[l]                                  # fused residual

        # ---- feed-forward block ----
        h = _layernorm_padded(x, ln2_g_ref[l], ln2_b_ref[l], dim).astype(BF16)
        f = jnp.dot(h, ff1_w_ref[l], preferred_element_type=F32) + ff1_b_ref[l]
        f = jax.nn.gelu(f, approximate=True)  # TODO(synk): torch nn.GELU default is exact erf
        f = jnp.dot(f.astype(BF16), ff2_w_ref[l],
                    preferred_element_type=F32) + ff2_b_ref[l]
        x = x + f                                                    # fused residual

    xo = _layernorm_padded(x, lnf_g_ref[...], lnf_b_ref[...], dim)   # (M, dim_pad)
    out3 = xo.reshape(b_blk, n, dim_pad)

    # to_cls_tokens: Reduce('b n d -> b d', 'mean') -> Linear(dim, dim, bias=False)
    pooled = jnp.mean(out3, axis=1)                                  # (b_blk, dim_pad)
    cls = jnp.dot(pooled.astype(BF16), cls_w_ref[...], preferred_element_type=F32)

    # torch.cat((cls_tokens, out), dim=1): write disjoint slices, no concat copy.
    o_ref[:, 0:1, :] = cls.reshape(b_blk, 1, dim_pad).astype(o_ref.dtype)
    o_ref[:, 1:, :] = out3.astype(o_ref.dtype)


# ------------------------------ Parameters ---------------------------------

def init_params(key, *, dim, patch_dim, num_patches, depth, heads, dim_head, ff_mult):
    inner = heads * dim_head
    ff_dim = dim * ff_mult
    ks = jax.random.split(key, 7)

    def w(k, shape, scale=0.02):
        return jax.random.normal(k, shape, F32) * scale

    return {
        "pe_w": w(ks[0], (patch_dim, dim)),
        "pe_b": jnp.zeros((dim,), F32),
        "pos_emb": w(ks[1], (num_patches, dim)),
        "ln1_g": jnp.ones((depth, dim), F32),
        "ln1_b": jnp.zeros((depth, dim), F32),
        "qkv_w": w(ks[2], (depth, 3, dim, inner)),
        "qkv_b": jnp.zeros((depth, 3, inner), F32),
        "out_w": w(ks[3], (depth, inner, dim)),
        "out_b": jnp.zeros((depth, dim), F32),
        "ln2_g": jnp.ones((depth, dim), F32),
        "ln2_b": jnp.zeros((depth, dim), F32),
        "ff1_w": w(ks[4], (depth, dim, ff_dim)),
        "ff1_b": jnp.zeros((depth, ff_dim), F32),
        "ff2_w": w(ks[5], (depth, ff_dim, dim)),
        "ff2_b": jnp.zeros((depth, dim), F32),
        "lnf_g": jnp.ones((dim,), F32),
        "lnf_b": jnp.zeros((dim,), F32),
        "cls_w": w(ks[6], (dim, dim)),
    }


# ------------------------------ Forward pass --------------------------------

def vision_transformer_forward(params, x, *, patch_size, heads, dim_head):
    """x: (b, c, H, W) NCHW. Returns (b, n+1, dim)."""
    b, c, H, W = x.shape
    p = patch_size
    h_, w_ = H // p, W // p
    n = h_ * w_
    patch_dim = c * p * p
    dim = params["pe_w"].shape[1]
    depth = params["qkv_w"].shape[0]
    inner = heads * dim_head
    ff_dim = params["ff1_w"].shape[-1]

    dim_pad = _round_up(dim, 128)
    pd_pad = _round_up(patch_dim, 128)
    ff_pad = _round_up(ff_dim, 128)

    # Rearrange 'b c (h p1) (w p2) -> b (h w) (p1 p2 c)', zero-pad lanes, bf16 stream.
    xt = x.reshape(b, c, h_, p, w_, p)
    xt = jnp.transpose(xt, (0, 2, 4, 3, 5, 1))            # b h w p1 p2 c
    tokens = xt.reshape(b * n, patch_dim)
    tokens = jnp.pad(tokens, ((0, 0), (0, pd_pad - patch_dim))).astype(BF16)

    def pad(a, *tail):
        """Zero-pad the trailing len(tail) dims of `a` to the given sizes."""
        target = a.shape[:a.ndim - len(tail)] + tuple(tail)
        return jnp.pad(a, [(0, t - s) for s, t in zip(a.shape, target)])

    weights = (
        pad(params["pe_w"], pd_pad, dim_pad).astype(BF16),
        pad(params["pe_b"].reshape(1, dim), 1, dim_pad),
        pad(params["pos_emb"][:n], n, dim_pad),
        pad(params["ln1_g"].reshape(depth, 1, dim), 1, dim_pad),   # gamma zero-padded!
        pad(params["ln1_b"].reshape(depth, 1, dim), 1, dim_pad),
        pad(params["qkv_w"], dim_pad, inner).astype(BF16),         # (depth,3,dim_pad,inner)
        params["qkv_b"].reshape(depth, 3, 1, inner),
        pad(params["out_w"].reshape(depth, heads, dim_head, dim), dim_pad).astype(BF16),
        pad(params["out_b"].reshape(depth, 1, dim), 1, dim_pad),
        pad(params["ln2_g"].reshape(depth, 1, dim), 1, dim_pad),
        pad(params["ln2_b"].reshape(depth, 1, dim), 1, dim_pad),
        pad(params["ff1_w"], dim_pad, ff_pad).astype(BF16),
        pad(params["ff1_b"].reshape(depth, 1, ff_dim), 1, ff_pad),
        pad(params["ff2_w"], ff_pad, dim_pad).astype(BF16),
        pad(params["ff2_b"].reshape(depth, 1, dim), 1, dim_pad),
        pad(params["lnf_g"].reshape(1, dim), 1, dim_pad),
        pad(params["lnf_b"].reshape(1, dim), 1, dim_pad),
        pad(params["cls_w"], dim_pad, dim_pad).astype(BF16),
    )

    # Batch several images per grid step (largest divisor of b that is <= 8).
    b_blk = 1
    for cand in range(min(b, 8), 0, -1):
        if b % cand == 0:
            b_blk = cand
            break

    kernel = functools.partial(_vit_fused_kernel, b_blk=b_blk, n=n, dim=dim,
                               heads=heads, dim_head=dim_head, depth=depth)

    def _resident(a):
        nd = a.ndim
        return pl.BlockSpec(a.shape, lambda i, _nd=nd: (0,) * _nd)   # weights stay in VMEM

    in_specs = [pl.BlockSpec((b_blk * n, pd_pad), lambda i: (i, 0))]  # B_BLK images / step
    in_specs += [_resident(a) for a in weights]

    out_pad = pl.pallas_call(
        kernel,
        out_shape=jax.ShapeDtypeStruct((b, n + 1, dim_pad), F32),
        grid=(b // b_blk,),
        in_specs=in_specs,
        out_specs=pl.BlockSpec((b_blk, n + 1, dim_pad), lambda i: (i, 0, 0)),
        compiler_params=pltpu.CompilerParams(
            dimension_semantics=("parallel",)),
    )(tokens, *weights)

    return out_pad[:, :, :dim].astype(x.dtype)


# --------------------------------- Main -------------------------------------

if __name__ == "__main__":
    # Small config consistent with the module:
    #   image_size=16, patch_size=4, channels=4 -> num_patches=16, patch_dim=64
    #   dim=32, depth=2, heads=2, dim_head=16, ff_mult=4
    image_size, patch_size, channels = 16, 4, 4
    dim, depth, heads, dim_head, ff_mult = 32, 2, 2, 16, 4
    num_patches = (image_size // patch_size) ** 2
    patch_dim = channels * patch_size ** 2

    root = jax.random.PRNGKey(0)
    k_params, k_x = jax.random.split(root)

    params = init_params(k_params, dim=dim, patch_dim=patch_dim, num_patches=num_patches,
                         depth=depth, heads=heads, dim_head=dim_head, ff_mult=ff_mult)

    x = jax.random.normal(k_x, (2, channels, image_size, image_size), F32)

    fwd = jax.jit(functools.partial(vision_transformer_forward,
                                    patch_size=patch_size, heads=heads, dim_head=dim_head))
    out = jax.block_until_ready(fwd(params, x))

    assert out.shape == (2, num_patches + 1, dim), out.shape
    assert bool(jnp.all(jnp.isfinite(out)))
    print("KERNEL_OK")
</pallas_src>

<mosaic_0001>
module attributes {stable_mosaic.version = 11 : i64} {
  func.func @_vit_fused_kernel(%arg0: i32, %arg1: memref<32x128xbf16, #tpu.memory_space<vmem>>, %arg2: memref<128x128xbf16, #tpu.memory_space<vmem>>, %arg3: memref<1x128xf32, #tpu.memory_space<vmem>>, %arg4: memref<16x128xf32, #tpu.memory_space<vmem>>, %arg5: memref<2x1x128xf32, #tpu.memory_space<vmem>>, %arg6: memref<2x1x128xf32, #tpu.memory_space<vmem>>, %arg7: memref<2x3x128x32xbf16, #tpu.memory_space<vmem>>, %arg8: memref<2x3x1x32xf32, #tpu.memory_space<vmem>>, %arg9: memref<2x2x16x128xbf16, #tpu.memory_space<vmem>>, %arg10: memref<2x1x128xf32, #tpu.memory_space<vmem>>, %arg11: memref<2x1x128xf32, #tpu.memory_space<vmem>>, %arg12: memref<2x1x128xf32, #tpu.memory_space<vmem>>, %arg13: memref<2x128x128xbf16, #tpu.memory_space<vmem>>, %arg14: memref<2x1x128xf32, #tpu.memory_space<vmem>>, %arg15: memref<2x128x128xbf16, #tpu.memory_space<vmem>>, %arg16: memref<2x1x128xf32, #tpu.memory_space<vmem>>, %arg17: memref<1x128xf32, #tpu.memory_space<vmem>>, %arg18: memref<1x128xf32, #tpu.memory_space<vmem>>, %arg19: memref<128x128xbf16, #tpu.memory_space<vmem>>, %arg20: memref<2x17x128xf32, #tpu.memory_space<vmem>>) attributes {dimension_semantics = [#tpu.dimension_semantics<parallel>], iteration_bounds = array<i64: 1>, scalar_prefetch = 0 : i64, scratch_operands = 0 : i64, tpu.core_type = #tpu.core_type<tc>, window_params = [{transform_indices = @transform_0, window_bounds = array<i64: 32, 128>}, {pipeline_mode = #tpu.pipeline_mode<synchronous>, transform_indices = @transform_1, window_bounds = array<i64: 128, 128>}, {pipeline_mode = #tpu.pipeline_mode<synchronous>, transform_indices = @transform_2, window_bounds = array<i64: 1, 128>}, {pipeline_mode = #tpu.pipeline_mode<synchronous>, transform_indices = @transform_3, window_bounds = array<i64: 16, 128>}, {pipeline_mode = #tpu.pipeline_mode<synchronous>, transform_indices = @transform_4, window_bounds = array<i64: 2, 1, 128>}, {pipeline_mode = #tpu.pipeline_mode<synchronous>, transform_indices = @transform_5, window_bounds = array<i64: 2, 1, 128>}, {pipeline_mode = #tpu.pipeline_mode<synchronous>, transform_indices = @transform_6, window_bounds = array<i64: 2, 3, 128, 32>}, {pipeline_mode = #tpu.pipeline_mode<synchronous>, transform_indices = @transform_7, window_bounds = array<i64: 2, 3, 1, 32>}, {pipeline_mode = #tpu.pipeline_mode<synchronous>, transform_indices = @transform_8, window_bounds = array<i64: 2, 2, 16, 128>}, {pipeline_mode = #tpu.pipeline_mode<synchronous>, transform_indices = @transform_9, window_bounds = array<i64: 2, 1, 128>}, {pipeline_mode = #tpu.pipeline_mode<synchronous>, transform_indices = @transform_10, window_bounds = array<i64: 2, 1, 128>}, {pipeline_mode = #tpu.pipeline_mode<synchronous>, transform_indices = @transform_11, window_bounds = array<i64: 2, 1, 128>}, {pipeline_mode = #tpu.pipeline_mode<synchronous>, transform_indices = @transform_12, window_bounds = array<i64: 2, 128, 128>}, {pipeline_mode = #tpu.pipeline_mode<synchronous>, transform_indices = @transform_13, window_bounds = array<i64: 2, 1, 128>}, {pipeline_mode = #tpu.pipeline_mode<synchronous>, transform_indices = @transform_14, window_bounds = array<i64: 2, 128, 128>}, {pipeline_mode = #tpu.pipeline_mode<synchronous>, transform_indices = @transform_15, window_bounds = array<i64: 2, 1, 128>}, {pipeline_mode = #tpu.pipeline_mode<synchronous>, transform_indices = @transform_16, window_bounds = array<i64: 1, 128>}, {pipeline_mode = #tpu.pipeline_mode<synchronous>, transform_indices = @transform_17, window_bounds = array<i64: 1, 128>}, {pipeline_mode = #tpu.pipeline_mode<synchronous>, transform_indices = @transform_18, window_bounds = array<i64: 128, 128>}, {transform_indices = @transform_19, window_bounds = array<i64: 2, 17, 128>}]} {
    %c0 = arith.constant 0 : index
    %c0_0 = arith.constant 0 : index
    %0 = vector.load %arg1[%c0, %c0_0] : memref<32x128xbf16, #tpu.memory_space<vmem>>, vector<32x128xbf16>
    %c0_1 = arith.constant 0 : index
    %c0_2 = arith.constant 0 : index
    %1 = vector.load %arg2[%c0_1, %c0_2] : memref<128x128xbf16, #tpu.memory_space<vmem>>, vector<128x128xbf16>
    %cst = arith.constant dense<0.000000e+00> : vector<32x128xf32>
    %2 = tpu.matmul %0, %1, %cst {dimension_numbers = #tpu.dot_dimension_numbers<[1], [0], [0], [1], [0, 0, 1, 1], [], []>} : vector<32x128xbf16>, vector<128x128xbf16>, vector<32x128xf32> -> vector<32x128xf32>
    %c0_3 = arith.constant 0 : index
    %c0_4 = arith.constant 0 : index
    %3 = vector.load %arg3[%c0_3, %c0_4] : memref<1x128xf32, #tpu.memory_space<vmem>>, vector<1x128xf32>
    %4 = vector.broadcast %3 : vector<1x128xf32> to vector<32x128xf32>
    %5 = arith.addf %2, %4 : vector<32x128xf32>
    %6 = vector.shape_cast %5 : vector<32x128xf32> to vector<2x16x128xf32>
    %c0_5 = arith.constant 0 : index
    %c0_6 = arith.constant 0 : index
    %7 = vector.load %arg4[%c0_5, %c0_6] : memref<16x128xf32, #tpu.memory_space<vmem>>, vector<16x128xf32>
    %8 = vector.shape_cast %7 : vector<16x128xf32> to vector<1x16x128xf32>
    %9 = vector.broadcast %8 : vector<1x16x128xf32> to vector<2x16x128xf32>
    %10 = arith.addf %6, %9 : vector<2x16x128xf32>
    %11 = vector.shape_cast %10 : vector<2x16x128xf32> to vector<32x128xf32>
    %c0_7 = arith.constant 0 : index
    %c0_8 = arith.constant 0 : index
    %c0_9 = arith.constant 0 : index
    %12 = vector.load %arg5[%c0_7, %c0_8, %c0_9] : memref<2x1x128xf32, #tpu.memory_space<vmem>>, vector<1x1x128xf32>
    %13 = vector.shape_cast %12 : vector<1x1x128xf32> to vector<1x128xf32>
    %c0_10 = arith.constant 0 : index
    %c0_11 = arith.constant 0 : index
    %c0_12 = arith.constant 0 : index
    %14 = vector.load %arg6[%c0_10, %c0_11, %c0_12] : memref<2x1x128xf32, #tpu.memory_space<vmem>>, vector<1x1x128xf32>
    %15 = vector.shape_cast %14 : vector<1x1x128xf32> to vector<1x128xf32>
    %cst_13 = arith.constant dense<0.000000e+00> : vector<32xf32>
    %16 = vector.multi_reduction <add>, %11, %cst_13 [1] : vector<32x128xf32> to vector<32xf32>
    %17 = vector.shape_cast %16 : vector<32xf32> to vector<32x1xf32>
    %cst_14 = arith.constant 3.125000e-02 : f32
    %18 = vector.broadcast %cst_14 : f32 to vector<32x1xf32>
    %19 = arith.mulf %17, %18 : vector<32x1xf32>
    %20 = arith.mulf %11, %11 : vector<32x128xf32>
    %cst_15 = arith.constant dense<0.000000e+00> : vector<32xf32>
    %21 = vector.multi_reduction <add>, %20, %cst_15 [1] : vector<32x128xf32> to vector<32xf32>
    %22 = vector.shape_cast %21 : vector<32xf32> to vector<32x1xf32>
    %cst_16 = arith.constant 3.125000e-02 : f32
    %23 = vector.broadcast %cst_16 : f32 to vector<32x1xf32>
    %24 = arith.mulf %22, %23 : vector<32x1xf32>
    %25 = arith.mulf %19, %19 : vector<32x1xf32>
    %26 = arith.subf %24, %25 : vector<32x1xf32>
    %27 = vector.broadcast %19 : vector<32x1xf32> to vector<32x128xf32>
    %28 = arith.subf %11, %27 : vector<32x128xf32>
    %cst_17 = arith.constant 9.99999974E-6 : f32
    %29 = vector.broadcast %cst_17 : f32 to vector<32x1xf32>
    %30 = arith.addf %26, %29 : vector<32x1xf32>
    %31 = math.rsqrt %30 : vector<32x1xf32>
    %32 = vector.broadcast %31 : vector<32x1xf32> to vector<32x128xf32>
    %33 = arith.mulf %28, %32 : vector<32x128xf32>
    %34 = vector.broadcast %13 : vector<1x128xf32> to vector<32x128xf32>
    %35 = arith.mulf %33, %34 : vector<32x128xf32>
    %36 = vector.broadcast %15 : vector<1x128xf32> to vector<32x128xf32>
    %37 = arith.addf %35, %36 : vector<32x128xf32>
    %38 = arith.truncf %37 : vector<32x128xf32> to vector<32x128xbf16>
    %c0_18 = arith.constant 0 : index
    %c0_19 = arith.constant 0 : index
    %c0_20 = arith.constant 0 : index
    %c0_21 = arith.constant 0 : index
    %39 = vector.load %arg7[%c0_18, %c0_19, %c0_20, %c0_21] : memref<2x3x128x32xbf16, #tpu.memory_space<vmem>>, vector<1x1x128x32xbf16>
    %40 = vector.shape_cast %39 : vector<1x1x128x32xbf16> to vector<128x32xbf16>
    %cst_22 = arith.constant dense<0.000000e+00> : vector<32x32xf32>
    %41 = tpu.matmul %38, %40, %cst_22 {dimension_numbers = #tpu.dot_dimension_numbers<[1], [0], [0], [1], [0, 0, 1, 1], [], []>} : vector<32x128xbf16>, vector<128x32xbf16>, vector<32x32xf32> -> vector<32x32xf32>
    %c0_23 = arith.constant 0 : index
    %c0_24 = arith.constant 0 : index
    %c0_25 = arith.constant 0 : index
    %c0_26 = arith.constant 0 : index
    %42 = vector.load %arg8[%c0_23, %c0_24, %c0_25, %c0_26] : memref<2x3x1x32xf32, #tpu.memory_space<vmem>>, vector<1x1x1x32xf32>
    %43 = vector.shape_cast %42 : vector<1x1x1x32xf32> to vector<1x32xf32>
    %44 = vector.broadcast %43 : vector<1x32xf32> to vector<32x32xf32>
    %45 = arith.addf %41, %44 : vector<32x32xf32>
    %c0_27 = arith.constant 0 : index
    %c1 = arith.constant 1 : index
    %c0_28 = arith.constant 0 : index
    %c0_29 = arith.constant 0 : index
    %46 = vector.load %arg7[%c0_27, %c1, %c0_28, %c0_29] : memref<2x3x128x32xbf16, #tpu.memory_space<vmem>>, vector<1x1x128x32xbf16>
    %47 = vector.shape_cast %46 : vector<1x1x128x32xbf16> to vector<128x32xbf16>
    %cst_30 = arith.constant dense<0.000000e+00> : vector<32x32xf32>
    %48 = tpu.matmul %38, %47, %cst_30 {dimension_numbers = #tpu.dot_dimension_numbers<[1], [0], [0], [1], [0, 0, 1, 1], [], []>} : vector<32x128xbf16>, vector<128x32xbf16>, vector<32x32xf32> -> vector<32x32xf32>
    %c0_31 = arith.constant 0 : index
    %c1_32 = arith.constant 1 : index
    %c0_33 = arith.constant 0 : index
    %c0_34 = arith.constant 0 : index
    %49 = vector.load %arg8[%c0_31, %c1_32, %c0_33, %c0_34] : memref<2x3x1x32xf32, #tpu.memory_space<vmem>>, vector<1x1x1x32xf32>
    %50 = vector.shape_cast %49 : vector<1x1x1x32xf32> to vector<1x32xf32>
    %51 = vector.broadcast %50 : vector<1x32xf32> to vector<32x32xf32>
    %52 = arith.addf %48, %51 : vector<32x32xf32>
    %c0_35 = arith.constant 0 : index
    %c2 = arith.constant 2 : index
    %c0_36 = arith.constant 0 : index
    %c0_37 = arith.constant 0 : index
    %53 = vector.load %arg7[%c0_35, %c2, %c0_36, %c0_37] : memref<2x3x128x32xbf16, #tpu.memory_space<vmem>>, vector<1x1x128x32xbf16>
    %54 = vector.shape_cast %53 : vector<1x1x128x32xbf16> to vector<128x32xbf16>
    %cst_38 = arith.constant dense<0.000000e+00> : vector<32x32xf32>
    %55 = tpu.matmul %38, %54, %cst_38 {dimension_numbers = #tpu.dot_dimension_numbers<[1], [0], [0], [1], [0, 0, 1, 1], [], []>} : vector<32x128xbf16>, vector<128x32xbf16>, vector<32x32xf32> -> vector<32x32xf32>
    %c0_39 = arith.constant 0 : index
    %c2_40 = arith.constant 2 : index
    %c0_41 = arith.constant 0 : index
    %c0_42 = arith.constant 0 : index
    %56 = vector.load %arg8[%c0_39, %c2_40, %c0_41, %c0_42] : memref<2x3x1x32xf32, #tpu.memory_space<vmem>>, vector<1x1x1x32xf32>
    %57 = vector.shape_cast %56 : vector<1x1x1x32xf32> to vector<1x32xf32>
    %58 = vector.broadcast %57 : vector<1x32xf32> to vector<32x32xf32>
    %59 = arith.addf %55, %58 : vector<32x32xf32>
    %cst_43 = arith.constant 2.500000e-01 : f32
    %60 = vector.broadcast %cst_43 : f32 to vector<32x32xf32>
    %61 = arith.mulf %45, %60 : vector<32x32xf32>
    %62 = vector.shape_cast %61 : vector<32x32xf32> to vector<2x16x32xf32>
    %63 = arith.truncf %62 : vector<2x16x32xf32> to vector<2x16x32xbf16>
    %64 = vector.shape_cast %52 : vector<32x32xf32> to vector<2x16x32xf32>
    %65 = arith.truncf %64 : vector<2x16x32xf32> to vector<2x16x32xbf16>
    %66 = vector.shape_cast %59 : vector<32x32xf32> to vector<2x16x32xf32>
    %67 = arith.truncf %66 : vector<2x16x32xf32> to vector<2x16x32xbf16>
    %cst_44 = arith.constant 0.000000e+00 : f32
    %68 = vector.broadcast %cst_44 : f32 to vector<32x128xf32>
    %69 = vector.extract_strided_slice %63 {offsets = [0, 0, 0], sizes = [2, 16, 16], strides = [1, 1, 1]} : vector<2x16x32xbf16> to vector<2x16x16xbf16>
    %70 = vector.extract_strided_slice %65 {offsets = [0, 0, 0], sizes = [2, 16, 16], strides = [1, 1, 1]} : vector<2x16x32xbf16> to vector<2x16x16xbf16>
    %71 = vector.extract_strided_slice %67 {offsets = [0, 0, 0], sizes = [2, 16, 16], strides = [1, 1, 1]} : vector<2x16x32xbf16> to vector<2x16x16xbf16>
    "tpu.trace_start"() <{level = 10 : i32, message = "bqd,bkd->bqk"}> : () -> ()
    %cst_45 = arith.constant dense<0.000000e+00> : vector<2x16x16xf32>
    %72 = tpu.matmul %69, %70, %cst_45 {dimension_numbers = #tpu.dot_dimension_numbers<[2], [2], [1], [1], [0, 0, 0, 1, 1, 1], [0], [0]>} : vector<2x16x16xbf16>, vector<2x16x16xbf16>, vector<2x16x16xf32> -> vector<2x16x16xf32>
    "tpu.trace_stop"() : () -> ()
    %cst_46 = arith.constant dense<0xFF800000> : vector<2x16xf32>
    %73 = vector.multi_reduction <maximumf>, %72, %cst_46 [2] : vector<2x16x16xf32> to vector<2x16xf32>
    %74 = vector.shape_cast %73 : vector<2x16xf32> to vector<2x16x1xf32>
    %75 = vector.broadcast %74 : vector<2x16x1xf32> to vector<2x16x16xf32>
    %76 = arith.subf %72, %75 : vector<2x16x16xf32>
    %77 = math.exp %76 : vector<2x16x16xf32>
    %cst_47 = arith.constant dense<0.000000e+00> : vector<2x16xf32>
    %78 = vector.multi_reduction <add>, %77, %cst_47 [2] : vector<2x16x16xf32> to vector<2x16xf32>
    %79 = vector.shape_cast %78 : vector<2x16xf32> to vector<2x16x1xf32>
    %80 = tpu.reciprocal %79 {approx = true} : vector<2x16x1xf32> -> vector<2x16x1xf32>
    %81 = vector.broadcast %80 : vector<2x16x1xf32> to vector<2x16x16xf32>
    %82 = arith.mulf %77, %81 : vector<2x16x16xf32>
    %83 = arith.truncf %82 : vector<2x16x16xf32> to vector<2x16x16xbf16>
    "tpu.trace_start"() <{level = 10 : i32, message = "bqk,bkd->bqd"}> : () -> ()
    %cst_48 = arith.constant dense<0.000000e+00> : vector<2x16x16xf32>
    %84 = tpu.matmul %83, %71, %cst_48 {dimension_numbers = #tpu.dot_dimension_numbers<[2], [1], [1], [2], [0, 0, 0, 1, 1, 2], [0], [0]>} : vector<2x16x16xbf16>, vector<2x16x16xbf16>, vector<2x16x16xf32> -> vector<2x16x16xf32>
    "tpu.trace_stop"() : () -> ()
    %85 = vector.shape_cast %84 : vector<2x16x16xf32> to vector<32x16xf32>
    %86 = arith.truncf %85 : vector<32x16xf32> to vector<32x16xbf16>
    %c0_49 = arith.constant 0 : index
    %c0_50 = arith.constant 0 : index
    %c0_51 = arith.constant 0 : index
    %c0_52 = arith.constant 0 : index
    %87 = vector.load %arg9[%c0_49, %c0_50, %c0_51, %c0_52] : memref<2x2x16x128xbf16, #tpu.memory_space<vmem>>, vector<1x1x16x128xbf16>
    %88 = vector.shape_cast %87 : vector<1x1x16x128xbf16> to vector<16x128xbf16>
    %cst_53 = arith.constant dense<0.000000e+00> : vector<32x128xf32>
    %89 = tpu.matmul %86, %88, %cst_53 {dimension_numbers = #tpu.dot_dimension_numbers<[1], [0], [0], [1], [0, 0, 1, 1], [], []>} : vector<32x16xbf16>, vector<16x128xbf16>, vector<32x128xf32> -> vector<32x128xf32>
    %90 = arith.addf %68, %89 : vector<32x128xf32>
    %91 = vector.extract_strided_slice %63 {offsets = [0, 0, 16], sizes = [2, 16, 16], strides = [1, 1, 1]} : vector<2x16x32xbf16> to vector<2x16x16xbf16>
    %92 = vector.extract_strided_slice %65 {offsets = [0, 0, 16], sizes = [2, 16, 16], strides = [1, 1, 1]} : vector<2x16x32xbf16> to vector<2x16x16xbf16>
    %93 = vector.extract_strided_slice %67 {offsets = [0, 0, 16], sizes = [2, 16, 16], strides = [1, 1, 1]} : vector<2x16x32xbf16> to vector<2x16x16xbf16>
    "tpu.trace_start"() <{level = 10 : i32, message = "bqd,bkd->bqk"}> : () -> ()
    %cst_54 = arith.constant dense<0.000000e+00> : vector<2x16x16xf32>
    %94 = tpu.matmul %91, %92, %cst_54 {dimension_numbers = #tpu.dot_dimension_numbers<[2], [2], [1], [1], [0, 0, 0, 1, 1, 1], [0], [0]>} : vector<2x16x16xbf16>, vector<2x16x16xbf16>, vector<2x16x16xf32> -> vector<2x16x16xf32>
    "tpu.trace_stop"() : () -> ()
    %cst_55 = arith.constant dense<0xFF800000> : vector<2x16xf32>
    %95 = vector.multi_reduction <maximumf>, %94, %cst_55 [2] : vector<2x16x16xf32> to vector<2x16xf32>
    %96 = vector.shape_cast %95 : vector<2x16xf32> to vector<2x16x1xf32>
    %97 = vector.broadcast %96 : vector<2x16x1xf32> to vector<2x16x16xf32>
    %98 = arith.subf %94, %97 : vector<2x16x16xf32>
    %99 = math.exp %98 : vector<2x16x16xf32>
    %cst_56 = arith.constant dense<0.000000e+00> : vector<2x16xf32>
    %100 = vector.multi_reduction <add>, %99, %cst_56 [2] : vector<2x16x16xf32> to vector<2x16xf32>
    %101 = vector.shape_cast %100 : vector<2x16xf32> to vector<2x16x1xf32>
    %102 = tpu.reciprocal %101 {approx = true} : vector<2x16x1xf32> -> vector<2x16x1xf32>
    %103 = vector.broadcast %102 : vector<2x16x1xf32> to vector<2x16x16xf32>
    %104 = arith.mulf %99, %103 : vector<2x16x16xf32>
    %105 = arith.truncf %104 : vector<2x16x16xf32> to vector<2x16x16xbf16>
    "tpu.trace_start"() <{level = 10 : i32, message = "bqk,bkd->bqd"}> : () -> ()
    %cst_57 = arith.constant dense<0.000000e+00> : vector<2x16x16xf32>
    %106 = tpu.matmul %105, %93, %cst_57 {dimension_numbers = #tpu.dot_dimension_numbers<[2], [1], [1], [2], [0, 0, 0, 1, 1, 2], [0], [0]>} : vector<2x16x16xbf16>, vector<2x16x16xbf16>, vector<2x16x16xf32> -> vector<2x16x16xf32>
    "tpu.trace_stop"() : () -> ()
    %107 = vector.shape_cast %106 : vector<2x16x16xf32> to vector<32x16xf32>
    %108 = arith.truncf %107 : vector<32x16xf32> to vector<32x16xbf16>
    %c0_58 = arith.constant 0 : index
    %c1_59 = arith.constant 1 : index
    %c0_60 = arith.constant 0 : index
    %c0_61 = arith.constant 0 : index
    %109 = vector.load %arg9[%c0_58, %c1_59, %c0_60, %c0_61] : memref<2x2x16x128xbf16, #tpu.memory_space<vmem>>, vector<1x1x16x128xbf16>
    %110 = vector.shape_cast %109 : vector<1x1x16x128xbf16> to vector<16x128xbf16>
    %cst_62 = arith.constant dense<0.000000e+00> : vector<32x128xf32>
    %111 = tpu.matmul %108, %110, %cst_62 {dimension_numbers = #tpu.dot_dimension_numbers<[1], [0], [0], [1], [0, 0, 1, 1], [], []>} : vector<32x16xbf16>, vector<16x128xbf16>, vector<32x128xf32> -> vector<32x128xf32>
    %112 = arith.addf %90, %111 : vector<32x128xf32>
    %113 = arith.addf %11, %112 : vector<32x128xf32>
    %c0_63 = arith.constant 0 : index
    %c0_64 = arith.constant 0 : index
    %c0_65 = arith.constant 0 : index
    %114 = vector.load %arg10[%c0_63, %c0_64, %c0_65] : memref<2x1x128xf32, #tpu.memory_space<vmem>>, vector<1x1x128xf32>
    %115 = vector.shape_cast %114 : vector<1x1x128xf32> to vector<1x128xf32>
    %116 = vector.broadcast %115 : vector<1x128xf32> to vector<32x128xf32>
    %117 = arith.addf %113, %116 : vector<32x128xf32>
    %c0_66 = arith.constant 0 : index
    %c0_67 = arith.constant 0 : index
    %c0_68 = arith.constant 0 : index
    %118 = vector.load %arg11[%c0_66, %c0_67, %c0_68] : memref<2x1x128xf32, #tpu.memory_space<vmem>>, vector<1x1x128xf32>
    %119 = vector.shape_cast %118 : vector<1x1x128xf32> to vector<1x128xf32>
    %c0_69 = arith.constant 0 : index
    %c0_70 = arith.constant 0 : index
    %c0_71 = arith.constant 0 : index
    %120 = vector.load %arg12[%c0_69, %c0_70, %c0_71] : memref<2x1x128xf32, #tpu.memory_space<vmem>>, vector<1x1x128xf32>
    %121 = vector.shape_cast %120 : vector<1x1x128xf32> to vector<1x128xf32>
    %cst_72 = arith.constant dense<0.000000e+00> : vector<32xf32>
    %122 = vector.multi_reduction <add>, %117, %cst_72 [1] : vector<32x128xf32> to vector<32xf32>
    %123 = vector.shape_cast %122 : vector<32xf32> to vector<32x1xf32>
    %cst_73 = arith.constant 3.125000e-02 : f32
    %124 = vector.broadcast %cst_73 : f32 to vector<32x1xf32>
    %125 = arith.mulf %123, %124 : vector<32x1xf32>
    %126 = arith.mulf %117, %117 : vector<32x128xf32>
    %cst_74 = arith.constant dense<0.000000e+00> : vector<32xf32>
    %127 = vector.multi_reduction <add>, %126, %cst_74 [1] : vector<32x128xf32> to vector<32xf32>
    %128 = vector.shape_cast %127 : vector<32xf32> to vector<32x1xf32>
    %cst_75 = arith.constant 3.125000e-02 : f32
    %129 = vector.broadcast %cst_75 : f32 to vector<32x1xf32>
    %130 = arith.mulf %128, %129 : vector<32x1xf32>
    %131 = arith.mulf %125, %125 : vector<32x1xf32>
    %132 = arith.subf %130, %131 : vector<32x1xf32>
    %133 = vector.broadcast %125 : vector<32x1xf32> to vector<32x128xf32>
    %134 = arith.subf %117, %133 : vector<32x128xf32>
    %cst_76 = arith.constant 9.99999974E-6 : f32
    %135 = vector.broadcast %cst_76 : f32 to vector<32x1xf32>
    %136 = arith.addf %132, %135 : vector<32x1xf32>
    %137 = math.rsqrt %136 : vector<32x1xf32>
    %138 = vector.broadcast %137 : vector<32x1xf32> to vector<32x128xf32>
    %139 = arith.mulf %134, %138 : vector<32x128xf32>
    %140 = vector.broadcast %119 : vector<1x128xf32> to vector<32x128xf32>
    %141 = arith.mulf %139, %140 : vector<32x128xf32>
    %142 = vector.broadcast %121 : vector<1x128xf32> to vector<32x128xf32>
    %143 = arith.addf %141, %142 : vector<32x128xf32>
    %144 = arith.truncf %143 : vector<32x128xf32> to vector<32x128xbf16>
    %c0_77 = arith.constant 0 : index
    %c0_78 = arith.constant 0 : index
    %c0_79 = arith.constant 0 : index
    %145 = vector.load %arg13[%c0_77, %c0_78, %c0_79] : memref<2x128x128xbf16, #tpu.memory_space<vmem>>, vector<1x128x128xbf16>
    %146 = vector.shape_cast %145 : vector<1x128x128xbf16> to vector<128x128xbf16>
    %cst_80 = arith.constant dense<0.000000e+00> : vector<32x128xf32>
    %147 = tpu.matmul %144, %146, %cst_80 {dimension_numbers = #tpu.dot_dimension_numbers<[1], [0], [0], [1], [0, 0, 1, 1], [], []>} : vector<32x128xbf16>, vector<128x128xbf16>, vector<32x128xf32> -> vector<32x128xf32>
    %c0_81 = arith.constant 0 : index
    %c0_82 = arith.constant 0 : index
    %c0_83 = arith.constant 0 : index
    %148 = vector.load %arg14[%c0_81, %c0_82, %c0_83] : memref<2x1x128xf32, #tpu.memory_space<vmem>>, vector<1x1x128xf32>
    %149 = vector.shape_cast %148 : vector<1x1x128xf32> to vector<1x128xf32>
    %150 = vector.broadcast %149 : vector<1x128xf32> to vector<32x128xf32>
    %151 = arith.addf %147, %150 : vector<32x128xf32>
    %152 = arith.mulf %151, %151 : vector<32x128xf32>
    %153 = arith.mulf %151, %152 : vector<32x128xf32>
    %cst_84 = arith.constant 4.471500e-02 : f32
    %154 = vector.broadcast %cst_84 : f32 to vector<32x128xf32>
    %155 = arith.mulf %154, %153 : vector<32x128xf32>
    %156 = arith.addf %151, %155 : vector<32x128xf32>
    %cst_85 = arith.constant 0.797884583 : f32
    %157 = vector.broadcast %cst_85 : f32 to vector<32x128xf32>
    %158 = arith.mulf %157, %156 : vector<32x128xf32>
    %159 = math.tanh %158 : vector<32x128xf32>
    %cst_86 = arith.constant 1.000000e+00 : f32
    %160 = vector.broadcast %cst_86 : f32 to vector<32x128xf32>
    %161 = arith.addf %160, %159 : vector<32x128xf32>
    %cst_87 = arith.constant 5.000000e-01 : f32
    %162 = vector.broadcast %cst_87 : f32 to vector<32x128xf32>
    %163 = arith.mulf %162, %161 : vector<32x128xf32>
    %164 = arith.mulf %151, %163 : vector<32x128xf32>
    %165 = arith.truncf %164 : vector<32x128xf32> to vector<32x128xbf16>
    %c0_88 = arith.constant 0 : index
    %c0_89 = arith.constant 0 : index
    %c0_90 = arith.constant 0 : index
    %166 = vector.load %arg15[%c0_88, %c0_89, %c0_90] : memref<2x128x128xbf16, #tpu.memory_space<vmem>>, vector<1x128x128xbf16>
    %167 = vector.shape_cast %166 : vector<1x128x128xbf16> to vector<128x128xbf16>
    %cst_91 = arith.constant dense<0.000000e+00> : vector<32x128xf32>
    %168 = tpu.matmul %165, %167, %cst_91 {dimension_numbers = #tpu.dot_dimension_numbers<[1], [0], [0], [1], [0, 0, 1, 1], [], []>} : vector<32x128xbf16>, vector<128x128xbf16>, vector<32x128xf32> -> vector<32x128xf32>
    %c0_92 = arith.constant 0 : index
    %c0_93 = arith.constant 0 : index
    %c0_94 = arith.constant 0 : index
    %169 = vector.load %arg16[%c0_92, %c0_93, %c0_94] : memref<2x1x128xf32, #tpu.memory_space<vmem>>, vector<1x1x128xf32>
    %170 = vector.shape_cast %169 : vector<1x1x128xf32> to vector<1x128xf32>
    %171 = vector.broadcast %170 : vector<1x128xf32> to vector<32x128xf32>
    %172 = arith.addf %168, %171 : vector<32x128xf32>
    %173 = arith.addf %117, %172 : vector<32x128xf32>
    %c1_95 = arith.constant 1 : index
    %c0_96 = arith.constant 0 : index
    %c0_97 = arith.constant 0 : index
    %174 = vector.load %arg5[%c1_95, %c0_96, %c0_97] : memref<2x1x128xf32, #tpu.memory_space<vmem>>, vector<1x1x128xf32>
    %175 = vector.shape_cast %174 : vector<1x1x128xf32> to vector<1x128xf32>
    %c1_98 = arith.constant 1 : index
    %c0_99 = arith.constant 0 : index
    %c0_100 = arith.constant 0 : index
    %176 = vector.load %arg6[%c1_98, %c0_99, %c0_100] : memref<2x1x128xf32, #tpu.memory_space<vmem>>, vector<1x1x128xf32>
    %177 = vector.shape_cast %176 : vector<1x1x128xf32> to vector<1x128xf32>
    %cst_101 = arith.constant dense<0.000000e+00> : vector<32xf32>
    %178 = vector.multi_reduction <add>, %173, %cst_101 [1] : vector<32x128xf32> to vector<32xf32>
    %179 = vector.shape_cast %178 : vector<32xf32> to vector<32x1xf32>
    %cst_102 = arith.constant 3.125000e-02 : f32
    %180 = vector.broadcast %cst_102 : f32 to vector<32x1xf32>
    %181 = arith.mulf %179, %180 : vector<32x1xf32>
    %182 = arith.mulf %173, %173 : vector<32x128xf32>
    %cst_103 = arith.constant dense<0.000000e+00> : vector<32xf32>
    %183 = vector.multi_reduction <add>, %182, %cst_103 [1] : vector<32x128xf32> to vector<32xf32>
    %184 = vector.shape_cast %183 : vector<32xf32> to vector<32x1xf32>
    %cst_104 = arith.constant 3.125000e-02 : f32
    %185 = vector.broadcast %cst_104 : f32 to vector<32x1xf32>
    %186 = arith.mulf %184, %185 : vector<32x1xf32>
    %187 = arith.mulf %181, %181 : vector<32x1xf32>
    %188 = arith.subf %186, %187 : vector<32x1xf32>
    %189 = vector.broadcast %181 : vector<32x1xf32> to vector<32x128xf32>
    %190 = arith.subf %173, %189 : vector<32x128xf32>
    %cst_105 = arith.constant 9.99999974E-6 : f32
    %191 = vector.broadcast %cst_105 : f32 to vector<32x1xf32>
    %192 = arith.addf %188, %191 : vector<32x1xf32>
    %193 = math.rsqrt %192 : vector<32x1xf32>
    %194 = vector.broadcast %193 : vector<32x1xf32> to vector<32x128xf32>
    %195 = arith.mulf %190, %194 : vector<32x128xf32>
    %196 = vector.broadcast %175 : vector<1x128xf32> to vector<32x128xf32>
    %197 = arith.mulf %195, %196 : vector<32x128xf32>
    %198 = vector.broadcast %177 : vector<1x128xf32> to vector<32x128xf32>
    %199 = arith.addf %197, %198 : vector<32x128xf32>
    %200 = arith.truncf %199 : vector<32x128xf32> to vector<32x128xbf16>
    %c1_106 = arith.constant 1 : index
    %c0_107 = arith.constant 0 : index
    %c0_108 = arith.constant 0 : index
    %c0_109 = arith.constant 0 : index
    %201 = vector.load %arg7[%c1_106, %c0_107, %c0_108, %c0_109] : memref<2x3x128x32xbf16, #tpu.memory_space<vmem>>, vector<1x1x128x32xbf16>
    %202 = vector.shape_cast %201 : vector<1x1x128x32xbf16> to vector<128x32xbf16>
    %cst_110 = arith.constant dense<0.000000e+00> : vector<32x32xf32>
    %203 = tpu.matmul %200, %202, %cst_110 {dimension_numbers = #tpu.dot_dimension_numbers<[1], [0], [0], [1], [0, 0, 1, 1], [], []>} : vector<32x128xbf16>, vector<128x32xbf16>, vector<32x32xf32> -> vector<32x32xf32>
    %c1_111 = arith.constant 1 : index
    %c0_112 = arith.constant 0 : index
    %c0_113 = arith.constant 0 : index
    %c0_114 = arith.constant 0 : index
    %204 = vector.load %arg8[%c1_111, %c0_112, %c0_113, %c0_114] : memref<2x3x1x32xf32, #tpu.memory_space<vmem>>, vector<1x1x1x32xf32>
    %205 = vector.shape_cast %204 : vector<1x1x1x32xf32> to vector<1x32xf32>
    %206 = vector.broadcast %205 : vector<1x32xf32> to vector<32x32xf32>
    %207 = arith.addf %203, %206 : vector<32x32xf32>
    %c1_115 = arith.constant 1 : index
    %c1_116 = arith.constant 1 : index
    %c0_117 = arith.constant 0 : index
    %c0_118 = arith.constant 0 : index
    %208 = vector.load %arg7[%c1_115, %c1_116, %c0_117, %c0_118] : memref<2x3x128x32xbf16, #tpu.memory_space<vmem>>, vector<1x1x128x32xbf16>
    %209 = vector.shape_cast %208 : vector<1x1x128x32xbf16> to vector<128x32xbf16>
    %cst_119 = arith.constant dense<0.000000e+00> : vector<32x32xf32>
    %210 = tpu.matmul %200, %209, %cst_119 {dimension_numbers = #tpu.dot_dimension_numbers<[1], [0], [0], [1], [0, 0, 1, 1], [], []>} : vector<32x128xbf16>, vector<128x32xbf16>, vector<32x32xf32> -> vector<32x32xf32>
    %c1_120 = arith.constant 1 : index
    %c1_121 = arith.constant 1 : index
    %c0_122 = arith.constant 0 : index
    %c0_123 = arith.constant 0 : index
    %211 = vector.load %arg8[%c1_120, %c1_121, %c0_122, %c0_123] : memref<2x3x1x32xf32, #tpu.memory_space<vmem>>, vector<1x1x1x32xf32>
    %212 = vector.shape_cast %211 : vector<1x1x1x32xf32> to vector<1x32xf32>
    %213 = vector.broadcast %212 : vector<1x32xf32> to vector<32x32xf32>
    %214 = arith.addf %210, %213 : vector<32x32xf32>
    %c1_124 = arith.constant 1 : index
    %c2_125 = arith.constant 2 : index
    %c0_126 = arith.constant 0 : index
    %c0_127 = arith.constant 0 : index
    %215 = vector.load %arg7[%c1_124, %c2_125, %c0_126, %c0_127] : memref<2x3x128x32xbf16, #tpu.memory_space<vmem>>, vector<1x1x128x32xbf16>
    %216 = vector.shape_cast %215 : vector<1x1x128x32xbf16> to vector<128x32xbf16>
    %cst_128 = arith.constant dense<0.000000e+00> : vector<32x32xf32>
    %217 = tpu.matmul %200, %216, %cst_128 {dimension_numbers = #tpu.dot_dimension_numbers<[1], [0], [0], [1], [0, 0, 1, 1], [], []>} : vector<32x128xbf16>, vector<128x32xbf16>, vector<32x32xf32> -> vector<32x32xf32>
    %c1_129 = arith.constant 1 : index
    %c2_130 = arith.constant 2 : index
    %c0_131 = arith.constant 0 : index
    %c0_132 = arith.constant 0 : index
    %218 = vector.load %arg8[%c1_129, %c2_130, %c0_131, %c0_132] : memref<2x3x1x32xf32, #tpu.memory_space<vmem>>, vector<1x1x1x32xf32>
    %219 = vector.shape_cast %218 : vector<1x1x1x32xf32> to vector<1x32xf32>
    %220 = vector.broadcast %219 : vector<1x32xf32> to vector<32x32xf32>
    %221 = arith.addf %217, %220 : vector<32x32xf32>
    %cst_133 = arith.constant 2.500000e-01 : f32
    %222 = vector.broadcast %cst_133 : f32 to vector<32x32xf32>
    %223 = arith.mulf %207, %222 : vector<32x32xf32>
    %224 = vector.shape_cast %223 : vector<32x32xf32> to vector<2x16x32xf32>
    %225 = arith.truncf %224 : vector<2x16x32xf32> to vector<2x16x32xbf16>
    %226 = vector.shape_cast %214 : vector<32x32xf32> to vector<2x16x32xf32>
    %227 = arith.truncf %226 : vector<2x16x32xf32> to vector<2x16x32xbf16>
    %228 = vector.shape_cast %221 : vector<32x32xf32> to vector<2x16x32xf32>
    %229 = arith.truncf %228 : vector<2x16x32xf32> to vector<2x16x32xbf16>
    %cst_134 = arith.constant 0.000000e+00 : f32
    %230 = vector.broadcast %cst_134 : f32 to vector<32x128xf32>
    %231 = vector.extract_strided_slice %225 {offsets = [0, 0, 0], sizes = [2, 16, 16], strides = [1, 1, 1]} : vector<2x16x32xbf16> to vector<2x16x16xbf16>
    %232 = vector.extract_strided_slice %227 {offsets = [0, 0, 0], sizes = [2, 16, 16], strides = [1, 1, 1]} : vector<2x16x32xbf16> to vector<2x16x16xbf16>
    %233 = vector.extract_strided_slice %229 {offsets = [0, 0, 0], sizes = [2, 16, 16], strides = [1, 1, 1]} : vector<2x16x32xbf16> to vector<2x16x16xbf16>
    "tpu.trace_start"() <{level = 10 : i32, message = "bqd,bkd->bqk"}> : () -> ()
    %cst_135 = arith.constant dense<0.000000e+00> : vector<2x16x16xf32>
    %234 = tpu.matmul %231, %232, %cst_135 {dimension_numbers = #tpu.dot_dimension_numbers<[2], [2], [1], [1], [0, 0, 0, 1, 1, 1], [0], [0]>} : vector<2x16x16xbf16>, vector<2x16x16xbf16>, vector<2x16x16xf32> -> vector<2x16x16xf32>
    "tpu.trace_stop"() : () -> ()
    %cst_136 = arith.constant dense<0xFF800000> : vector<2x16xf32>
    %235 = vector.multi_reduction <maximumf>, %234, %cst_136 [2] : vector<2x16x16xf32> to vector<2x16xf32>
    %236 = vector.shape_cast %235 : vector<2x16xf32> to vector<2x16x1xf32>
    %237 = vector.broadcast %236 : vector<2x16x1xf32> to vector<2x16x16xf32>
    %238 = arith.subf %234, %237 : vector<2x16x16xf32>
    %239 = math.exp %238 : vector<2x16x16xf32>
    %cst_137 = arith.constant dense<0.000000e+00> : vector<2x16xf32>
    %240 = vector.multi_reduction <add>, %239, %cst_137 [2] : vector<2x16x16xf32> to vector<2x16xf32>
    %241 = vector.shape_cast %240 : vector<2x16xf32> to vector<2x16x1xf32>
    %242 = tpu.reciprocal %241 {approx = true} : vector<2x16x1xf32> -> vector<2x16x1xf32>
    %243 = vector.broadcast %242 : vector<2x16x1xf32> to vector<2x16x16xf32>
    %244 = arith.mulf %239, %243 : vector<2x16x16xf32>
    %245 = arith.truncf %244 : vector<2x16x16xf32> to vector<2x16x16xbf16>
    "tpu.trace_start"() <{level = 10 : i32, message = "bqk,bkd->bqd"}> : () -> ()
    %cst_138 = arith.constant dense<0.000000e+00> : vector<2x16x16xf32>
    %246 = tpu.matmul %245, %233, %cst_138 {dimension_numbers = #tpu.dot_dimension_numbers<[2], [1], [1], [2], [0, 0, 0, 1, 1, 2], [0], [0]>} : vector<2x16x16xbf16>, vector<2x16x16xbf16>, vector<2x16x16xf32> -> vector<2x16x16xf32>
    "tpu.trace_stop"() : () -> ()
    %247 = vector.shape_cast %246 : vector<2x16x16xf32> to vector<32x16xf32>
    %248 = arith.truncf %247 : vector<32x16xf32> to vector<32x16xbf16>
    %c1_139 = arith.constant 1 : index
    %c0_140 = arith.constant 0 : index
    %c0_141 = arith.constant 0 : index
    %c0_142 = arith.constant 0 : index
    %249 = vector.load %arg9[%c1_139, %c0_140, %c0_141, %c0_142] : memref<2x2x16x128xbf16, #tpu.memory_space<vmem>>, vector<1x1x16x128xbf16>
    %250 = vector.shape_cast %249 : vector<1x1x16x128xbf16> to vector<16x128xbf16>
    %cst_143 = arith.constant dense<0.000000e+00> : vector<32x128xf32>
    %251 = tpu.matmul %248, %250, %cst_143 {dimension_numbers = #tpu.dot_dimension_numbers<[1], [0], [0], [1], [0, 0, 1, 1], [], []>} : vector<32x16xbf16>, vector<16x128xbf16>, vector<32x128xf32> -> vector<32x128xf32>
    %252 = arith.addf %230, %251 : vector<32x128xf32>
    %253 = vector.extract_strided_slice %225 {offsets = [0, 0, 16], sizes = [2, 16, 16], strides = [1, 1, 1]} : vector<2x16x32xbf16> to vector<2x16x16xbf16>
    %254 = vector.extract_strided_slice %227 {offsets = [0, 0, 16], sizes = [2, 16, 16], strides = [1, 1, 1]} : vector<2x16x32xbf16> to vector<2x16x16xbf16>
    %255 = vector.extract_strided_slice %229 {offsets = [0, 0, 16], sizes = [2, 16, 16], strides = [1, 1, 1]} : vector<2x16x32xbf16> to vector<2x16x16xbf16>
    "tpu.trace_start"() <{level = 10 : i32, message = "bqd,bkd->bqk"}> : () -> ()
    %cst_144 = arith.constant dense<0.000000e+00> : vector<2x16x16xf32>
    %256 = tpu.matmul %253, %254, %cst_144 {dimension_numbers = #tpu.dot_dimension_numbers<[2], [2], [1], [1], [0, 0, 0, 1, 1, 1], [0], [0]>} : vector<2x16x16xbf16>, vector<2x16x16xbf16>, vector<2x16x16xf32> -> vector<2x16x16xf32>
    "tpu.trace_stop"() : () -> ()
    %cst_145 = arith.constant dense<0xFF800000> : vector<2x16xf32>
    %257 = vector.multi_reduction <maximumf>, %256, %cst_145 [2] : vector<2x16x16xf32> to vector<2x16xf32>
    %258 = vector.shape_cast %257 : vector<2x16xf32> to vector<2x16x1xf32>
    %259 = vector.broadcast %258 : vector<2x16x1xf32> to vector<2x16x16xf32>
    %260 = arith.subf %256, %259 : vector<2x16x16xf32>
    %261 = math.exp %260 : vector<2x16x16xf32>
    %cst_146 = arith.constant dense<0.000000e+00> : vector<2x16xf32>
    %262 = vector.multi_reduction <add>, %261, %cst_146 [2] : vector<2x16x16xf32> to vector<2x16xf32>
    %263 = vector.shape_cast %262 : vector<2x16xf32> to vector<2x16x1xf32>
    %264 = tpu.reciprocal %263 {approx = true} : vector<2x16x1xf32> -> vector<2x16x1xf32>
    %265 = vector.broadcast %264 : vector<2x16x1xf32> to vector<2x16x16xf32>
    %266 = arith.mulf %261, %265 : vector<2x16x16xf32>
    %267 = arith.truncf %266 : vector<2x16x16xf32> to vector<2x16x16xbf16>
    "tpu.trace_start"() <{level = 10 : i32, message = "bqk,bkd->bqd"}> : () -> ()
    %cst_147 = arith.constant dense<0.000000e+00> : vector<2x16x16xf32>
    %268 = tpu.matmul %267, %255, %cst_147 {dimension_numbers = #tpu.dot_dimension_numbers<[2], [1], [1], [2], [0, 0, 0, 1, 1, 2], [0], [0]>} : vector<2x16x16xbf16>, vector<2x16x16xbf16>, vector<2x16x16xf32> -> vector<2x16x16xf32>
    "tpu.trace_stop"() : () -> ()
    %269 = vector.shape_cast %268 : vector<2x16x16xf32> to vector<32x16xf32>
    %270 = arith.truncf %269 : vector<32x16xf32> to vector<32x16xbf16>
    %c1_148 = arith.constant 1 : index
    %c1_149 = arith.constant 1 : index
    %c0_150 = arith.constant 0 : index
    %c0_151 = arith.constant 0 : index
    %271 = vector.load %arg9[%c1_148, %c1_149, %c0_150, %c0_151] : memref<2x2x16x128xbf16, #tpu.memory_space<vmem>>, vector<1x1x16x128xbf16>
    %272 = vector.shape_cast %271 : vector<1x1x16x128xbf16> to vector<16x128xbf16>
    %cst_152 = arith.constant dense<0.000000e+00> : vector<32x128xf32>
    %273 = tpu.matmul %270, %272, %cst_152 {dimension_numbers = #tpu.dot_dimension_numbers<[1], [0], [0], [1], [0, 0, 1, 1], [], []>} : vector<32x16xbf16>, vector<16x128xbf16>, vector<32x128xf32> -> vector<32x128xf32>
    %274 = arith.addf %252, %273 : vector<32x128xf32>
    %275 = arith.addf %173, %274 : vector<32x128xf32>
    %c1_153 = arith.constant 1 : index
    %c0_154 = arith.constant 0 : index
    %c0_155 = arith.constant 0 : index
    %276 = vector.load %arg10[%c1_153, %c0_154, %c0_155] : memref<2x1x128xf32, #tpu.memory_space<vmem>>, vector<1x1x128xf32>
    %277 = vector.shape_cast %276 : vector<1x1x128xf32> to vector<1x128xf32>
    %278 = vector.broadcast %277 : vector<1x128xf32> to vector<32x128xf32>
    %279 = arith.addf %275, %278 : vector<32x128xf32>
    %c1_156 = arith.constant 1 : index
    %c0_157 = arith.constant 0 : index
    %c0_158 = arith.constant 0 : index
    %280 = vector.load %arg11[%c1_156, %c0_157, %c0_158] : memref<2x1x128xf32, #tpu.memory_space<vmem>>, vector<1x1x128xf32>
    %281 = vector.shape_cast %280 : vector<1x1x128xf32> to vector<1x128xf32>
    %c1_159 = arith.constant 1 : index
    %c0_160 = arith.constant 0 : index
    %c0_161 = arith.constant 0 : index
    %282 = vector.load %arg12[%c1_159, %c0_160, %c0_161] : memref<2x1x128xf32, #tpu.memory_space<vmem>>, vector<1x1x128xf32>
    %283 = vector.shape_cast %282 : vector<1x1x128xf32> to vector<1x128xf32>
    %cst_162 = arith.constant dense<0.000000e+00> : vector<32xf32>
    %284 = vector.multi_reduction <add>, %279, %cst_162 [1] : vector<32x128xf32> to vector<32xf32>
    %285 = vector.shape_cast %284 : vector<32xf32> to vector<32x1xf32>
    %cst_163 = arith.constant 3.125000e-02 : f32
    %286 = vector.broadcast %cst_163 : f32 to vector<32x1xf32>
    %287 = arith.mulf %285, %286 : vector<32x1xf32>
    %288 = arith.mulf %279, %279 : vector<32x128xf32>
    %cst_164 = arith.constant dense<0.000000e+00> : vector<32xf32>
    %289 = vector.multi_reduction <add>, %288, %cst_164 [1] : vector<32x128xf32> to vector<32xf32>
    %290 = vector.shape_cast %289 : vector<32xf32> to vector<32x1xf32>
    %cst_165 = arith.constant 3.125000e-02 : f32
    %291 = vector.broadcast %cst_165 : f32 to vector<32x1xf32>
    %292 = arith.mulf %290, %291 : vector<32x1xf32>
    %293 = arith.mulf %287, %287 : vector<32x1xf32>
    %294 = arith.subf %292, %293 : vector<32x1xf32>
    %295 = vector.broadcast %287 : vector<32x1xf32> to vector<32x128xf32>
    %296 = arith.subf %279, %295 : vector<32x128xf32>
    %cst_166 = arith.constant 9.99999974E-6 : f32
    %297 = vector.broadcast %cst_166 : f32 to vector<32x1xf32>
    %298 = arith.addf %294, %297 : vector<32x1xf32>
    %299 = math.rsqrt %298 : vector<32x1xf32>
    %300 = vector.broadcast %299 : vector<32x1xf32> to vector<32x128xf32>
    %301 = arith.mulf %296, %300 : vector<32x128xf32>
    %302 = vector.broadcast %281 : vector<1x128xf32> to vector<32x128xf32>
    %303 = arith.mulf %301, %302 : vector<32x128xf32>
    %304 = vector.broadcast %283 : vector<1x128xf32> to vector<32x128xf32>
    %305 = arith.addf %303, %304 : vector<32x128xf32>
    %306 = arith.truncf %305 : vector<32x128xf32> to vector<32x128xbf16>
    %c1_167 = arith.constant 1 : index
    %c0_168 = arith.constant 0 : index
    %c0_169 = arith.constant 0 : index
    %307 = vector.load %arg13[%c1_167, %c0_168, %c0_169] : memref<2x128x128xbf16, #tpu.memory_space<vmem>>, vector<1x128x128xbf16>
    %308 = vector.shape_cast %307 : vector<1x128x128xbf16> to vector<128x128xbf16>
    %cst_170 = arith.constant dense<0.000000e+00> : vector<32x128xf32>
    %309 = tpu.matmul %306, %308, %cst_170 {dimension_numbers = #tpu.dot_dimension_numbers<[1], [0], [0], [1], [0, 0, 1, 1], [], []>} : vector<32x128xbf16>, vector<128x128xbf16>, vector<32x128xf32> -> vector<32x128xf32>
    %c1_171 = arith.constant 1 : index
    %c0_172 = arith.constant 0 : index
    %c0_173 = arith.constant 0 : index
    %310 = vector.load %arg14[%c1_171, %c0_172, %c0_173] : memref<2x1x128xf32, #tpu.memory_space<vmem>>, vector<1x1x128xf32>
    %311 = vector.shape_cast %310 : vector<1x1x128xf32> to vector<1x128xf32>
    %312 = vector.broadcast %311 : vector<1x128xf32> to vector<32x128xf32>
    %313 = arith.addf %309, %312 : vector<32x128xf32>
    %314 = arith.mulf %313, %313 : vector<32x128xf32>
    %315 = arith.mulf %313, %314 : vector<32x128xf32>
    %cst_174 = arith.constant 4.471500e-02 : f32
    %316 = vector.broadcast %cst_174 : f32 to vector<32x128xf32>
    %317 = arith.mulf %316, %315 : vector<32x128xf32>
    %318 = arith.addf %313, %317 : vector<32x128xf32>
    %cst_175 = arith.constant 0.797884583 : f32
    %319 = vector.broadcast %cst_175 : f32 to vector<32x128xf32>
    %320 = arith.mulf %319, %318 : vector<32x128xf32>
    %321 = math.tanh %320 : vector<32x128xf32>
    %cst_176 = arith.constant 1.000000e+00 : f32
    %322 = vector.broadcast %cst_176 : f32 to vector<32x128xf32>
    %323 = arith.addf %322, %321 : vector<32x128xf32>
    %cst_177 = arith.constant 5.000000e-01 : f32
    %324 = vector.broadcast %cst_177 : f32 to vector<32x128xf32>
    %325 = arith.mulf %324, %323 : vector<32x128xf32>
    %326 = arith.mulf %313, %325 : vector<32x128xf32>
    %327 = arith.truncf %326 : vector<32x128xf32> to vector<32x128xbf16>
    %c1_178 = arith.constant 1 : index
    %c0_179 = arith.constant 0 : index
    %c0_180 = arith.constant 0 : index
    %328 = vector.load %arg15[%c1_178, %c0_179, %c0_180] : memref<2x128x128xbf16, #tpu.memory_space<vmem>>, vector<1x128x128xbf16>
    %329 = vector.shape_cast %328 : vector<1x128x128xbf16> to vector<128x128xbf16>
    %cst_181 = arith.constant dense<0.000000e+00> : vector<32x128xf32>
    %330 = tpu.matmul %327, %329, %cst_181 {dimension_numbers = #tpu.dot_dimension_numbers<[1], [0], [0], [1], [0, 0, 1, 1], [], []>} : vector<32x128xbf16>, vector<128x128xbf16>, vector<32x128xf32> -> vector<32x128xf32>
    %c1_182 = arith.constant 1 : index
    %c0_183 = arith.constant 0 : index
    %c0_184 = arith.constant 0 : index
    %331 = vector.load %arg16[%c1_182, %c0_183, %c0_184] : memref<2x1x128xf32, #tpu.memory_space<vmem>>, vector<1x1x128xf32>
    %332 = vector.shape_cast %331 : vector<1x1x128xf32> to vector<1x128xf32>
    %333 = vector.broadcast %332 : vector<1x128xf32> to vector<32x128xf32>
    %334 = arith.addf %330, %333 : vector<32x128xf32>
    %335 = arith.addf %279, %334 : vector<32x128xf32>
    %c0_185 = arith.constant 0 : index
    %c0_186 = arith.constant 0 : index
    %336 = vector.load %arg17[%c0_185, %c0_186] : memref<1x128xf32, #tpu.memory_space<vmem>>, vector<1x128xf32>
    %c0_187 = arith.constant 0 : index
    %c0_188 = arith.constant 0 : index
    %337 = vector.load %arg18[%c0_187, %c0_188] : memref<1x128xf32, #tpu.memory_space<vmem>>, vector<1x128xf32>
    %cst_189 = arith.constant dense<0.000000e+00> : vector<32xf32>
    %338 = vector.multi_reduction <add>, %335, %cst_189 [1] : vector<32x128xf32> to vector<32xf32>
    %339 = vector.shape_cast %338 : vector<32xf32> to vector<32x1xf32>
    %cst_190 = arith.constant 3.125000e-02 : f32
    %340 = vector.broadcast %cst_190 : f32 to vector<32x1xf32>
    %341 = arith.mulf %339, %340 : vector<32x1xf32>
    %342 = arith.mulf %335, %335 : vector<32x128xf32>
    %cst_191 = arith.constant dense<0.000000e+00> : vector<32xf32>
    %343 = vector.multi_reduction <add>, %342, %cst_191 [1] : vector<32x128xf32> to vector<32xf32>
    %344 = vector.shape_cast %343 : vector<32xf32> to vector<32x1xf32>
    %cst_192 = arith.constant 3.125000e-02 : f32
    %345 = vector.broadcast %cst_192 : f32 to vector<32x1xf32>
    %346 = arith.mulf %344, %345 : vector<32x1xf32>
    %347 = arith.mulf %341, %341 : vector<32x1xf32>
    %348 = arith.subf %346, %347 : vector<32x1xf32>
    %349 = vector.broadcast %341 : vector<32x1xf32> to vector<32x128xf32>
    %350 = arith.subf %335, %349 : vector<32x128xf32>
    %cst_193 = arith.constant 9.99999974E-6 : f32
    %351 = vector.broadcast %cst_193 : f32 to vector<32x1xf32>
    %352 = arith.addf %348, %351 : vector<32x1xf32>
    %353 = math.rsqrt %352 : vector<32x1xf32>
    %354 = vector.broadcast %353 : vector<32x1xf32> to vector<32x128xf32>
    %355 = arith.mulf %350, %354 : vector<32x128xf32>
    %356 = vector.broadcast %336 : vector<1x128xf32> to vector<32x128xf32>
    %357 = arith.mulf %355, %356 : vector<32x128xf32>
    %358 = vector.broadcast %337 : vector<1x128xf32> to vector<32x128xf32>
    %359 = arith.addf %357, %358 : vector<32x128xf32>
    %360 = vector.shape_cast %359 : vector<32x128xf32> to vector<2x16x128xf32>
    %cst_194 = arith.constant dense<0.000000e+00> : vector<2x128xf32>
    %361 = vector.multi_reduction <add>, %360, %cst_194 [1] : vector<2x16x128xf32> to vector<2x128xf32>
    %cst_195 = arith.constant 1.600000e+01 : f32
    %362 = vector.broadcast %cst_195 : f32 to vector<2x128xf32>
    %363 = arith.divf %361, %362 : vector<2x128xf32>
    %364 = arith.truncf %363 : vector<2x128xf32> to vector<2x128xbf16>
    %c0_196 = arith.constant 0 : index
    %c0_197 = arith.constant 0 : index
    %365 = vector.load %arg19[%c0_196, %c0_197] : memref<128x128xbf16, #tpu.memory_space<vmem>>, vector<128x128xbf16>
    %cst_198 = arith.constant dense<0.000000e+00> : vector<2x128xf32>
    %366 = tpu.matmul %364, %365, %cst_198 {dimension_numbers = #tpu.dot_dimension_numbers<[1], [0], [0], [1], [0, 0, 1, 1], [], []>} : vector<2x128xbf16>, vector<128x128xbf16>, vector<2x128xf32> -> vector<2x128xf32>
    %367 = vector.shape_cast %366 : vector<2x128xf32> to vector<2x1x128xf32>
    %c0_199 = arith.constant 0 : index
    %c0_200 = arith.constant 0 : index
    %c0_201 = arith.constant 0 : index
    %368 = vector.load %arg20[%c0_199, %c0_200, %c0_201] : memref<2x17x128xf32, #tpu.memory_space<vmem>>, vector<2x1x128xf32>
    tpu.vector_store %arg20[%c0_199, %c0_200, %c0_201], %367 {strides = array<i32>} : memref<2x17x128xf32, #tpu.memory_space<vmem>>, vector<2x1x128xf32>,
    %c0_202 = arith.constant 0 : index
    %c1_203 = arith.constant 1 : index
    %c0_204 = arith.constant 0 : index
    %369 = vector.load %arg20[%c0_202, %c1_203, %c0_204] : memref<2x17x128xf32, #tpu.memory_space<vmem>>, vector<2x16x128xf32>
    tpu.vector_store %arg20[%c0_202, %c1_203, %c0_204], %360 {strides = array<i32>} : memref<2x17x128xf32, #tpu.memory_space<vmem>>, vector<2x16x128xf32>,
    return
  }
  func.func @transform_0(%arg0: i32) -> (i32, i32) {
    %c0_i32 = arith.constant 0 : i32
    %c0_i32_0 = arith.constant 0 : i32
    return %arg0, %c0_i32 : i32, i32
  }
  func.func @transform_1(%arg0: i32) -> (i32, i32) {
    %c0_i32 = arith.constant 0 : i32
    %c0_i32_0 = arith.constant 0 : i32
    %c0_i32_1 = arith.constant 0 : i32
    return %c0_i32, %c0_i32_0 : i32, i32
  }
  func.func @transform_2(%arg0: i32) -> (i32, i32) {
    %c0_i32 = arith.constant 0 : i32
    %c0_i32_0 = arith.constant 0 : i32
    %c0_i32_1 = arith.constant 0 : i32
    return %c0_i32, %c0_i32_0 : i32, i32
  }
  func.func @transform_3(%arg0: i32) -> (i32, i32) {
    %c0_i32 = arith.constant 0 : i32
    %c0_i32_0 = arith.constant 0 : i32
    %c0_i32_1 = arith.constant 0 : i32
    return %c0_i32, %c0_i32_0 : i32, i32
  }
  func.func @transform_4(%arg0: i32) -> (i32, i32, i32) {
    %c0_i32 = arith.constant 0 : i32
    %c0_i32_0 = arith.constant 0 : i32
    %c0_i32_1 = arith.constant 0 : i32
    %c0_i32_2 = arith.constant 0 : i32
    return %c0_i32, %c0_i32_0, %c0_i32_1 : i32, i32, i32
  }
  func.func @transform_5(%arg0: i32) -> (i32, i32, i32) {
    %c0_i32 = arith.constant 0 : i32
    %c0_i32_0 = arith.constant 0 : i32
    %c0_i32_1 = arith.constant 0 : i32
    %c0_i32_2 = arith.constant 0 : i32
    return %c0_i32, %c0_i32_0, %c0_i32_1 : i32, i32, i32
  }
  func.func @transform_6(%arg0: i32) -> (i32, i32, i32, i32) {
    %c0_i32 = arith.constant 0 : i32
    %c0_i32_0 = arith.constant 0 : i32
    %c0_i32_1 = arith.constant 0 : i32
    %c0_i32_2 = arith.constant 0 : i32
    %c0_i32_3 = arith.constant 0 : i32
    return %c0_i32, %c0_i32_0, %c0_i32_1, %c0_i32_2 : i32, i32, i32, i32
  }
  func.func @transform_7(%arg0: i32) -> (i32, i32, i32, i32) {
    %c0_i32 = arith.constant 0 : i32
    %c0_i32_0 = arith.constant 0 : i32
    %c0_i32_1 = arith.constant 0 : i32
    %c0_i32_2 = arith.constant 0 : i32
    %c0_i32_3 = arith.constant 0 : i32
    return %c0_i32, %c0_i32_0, %c0_i32_1, %c0_i32_2 : i32, i32, i32, i32
  }
  func.func @transform_8(%arg0: i32) -> (i32, i32, i32, i32) {
    %c0_i32 = arith.constant 0 : i32
    %c0_i32_0 = arith.constant 0 : i32
    %c0_i32_1 = arith.constant 0 : i32
    %c0_i32_2 = arith.constant 0 : i32
    %c0_i32_3 = arith.constant 0 : i32
    return %c0_i32, %c0_i32_0, %c0_i32_1, %c0_i32_2 : i32, i32, i32, i32
  }
  func.func @transform_9(%arg0: i32) -> (i32, i32, i32) {
    %c0_i32 = arith.constant 0 : i32
    %c0_i32_0 = arith.constant 0 : i32
    %c0_i32_1 = arith.constant 0 : i32
    %c0_i32_2 = arith.constant 0 : i32
    return %c0_i32, %c0_i32_0, %c0_i32_1 : i32, i32, i32
  }
  func.func @transform_10(%arg0: i32) -> (i32, i32, i32) {
    %c0_i32 = arith.constant 0 : i32
    %c0_i32_0 = arith.constant 0 : i32
    %c0_i32_1 = arith.constant 0 : i32
    %c0_i32_2 = arith.constant 0 : i32
    return %c0_i32, %c0_i32_0, %c0_i32_1 : i32, i32, i32
  }
  func.func @transform_11(%arg0: i32) -> (i32, i32, i32) {
    %c0_i32 = arith.constant 0 : i32
    %c0_i32_0 = arith.constant 0 : i32
    %c0_i32_1 = arith.constant 0 : i32
    %c0_i32_2 = arith.constant 0 : i32
    return %c0_i32, %c0_i32_0, %c0_i32_1 : i32, i32, i32
  }
  func.func @transform_12(%arg0: i32) -> (i32, i32, i32) {
    %c0_i32 = arith.constant 0 : i32
    %c0_i32_0 = arith.constant 0 : i32
    %c0_i32_1 = arith.constant 0 : i32
    %c0_i32_2 = arith.constant 0 : i32
    return %c0_i32, %c0_i32_0, %c0_i32_1 : i32, i32, i32
  }
  func.func @transform_13(%arg0: i32) -> (i32, i32, i32) {
    %c0_i32 = arith.constant 0 : i32
    %c0_i32_0 = arith.constant 0 : i32
    %c0_i32_1 = arith.constant 0 : i32
    %c0_i32_2 = arith.constant 0 : i32
    return %c0_i32, %c0_i32_0, %c0_i32_1 : i32, i32, i32
  }
  func.func @transform_14(%arg0: i32) -> (i32, i32, i32) {
    %c0_i32 = arith.constant 0 : i32
    %c0_i32_0 = arith.constant 0 : i32
    %c0_i32_1 = arith.constant 0 : i32
    %c0_i32_2 = arith.constant 0 : i32
    return %c0_i32, %c0_i32_0, %c0_i32_1 : i32, i32, i32
  }
  func.func @transform_15(%arg0: i32) -> (i32, i32, i32) {
    %c0_i32 = arith.constant 0 : i32
    %c0_i32_0 = arith.constant 0 : i32
    %c0_i32_1 = arith.constant 0 : i32
    %c0_i32_2 = arith.constant 0 : i32
    return %c0_i32, %c0_i32_0, %c0_i32_1 : i32, i32, i32
  }
  func.func @transform_16(%arg0: i32) -> (i32, i32) {
    %c0_i32 = arith.constant 0 : i32
    %c0_i32_0 = arith.constant 0 : i32
    %c0_i32_1 = arith.constant 0 : i32
    return %c0_i32, %c0_i32_0 : i32, i32
  }
  func.func @transform_17(%arg0: i32) -> (i32, i32) {
    %c0_i32 = arith.constant 0 : i32
    %c0_i32_0 = arith.constant 0 : i32
    %c0_i32_1 = arith.constant 0 : i32
    return %c0_i32, %c0_i32_0 : i32, i32
  }
  func.func @transform_18(%arg0: i32) -> (i32, i32) {
    %c0_i32 = arith.constant 0 : i32
    %c0_i32_0 = arith.constant 0 : i32
    %c0_i32_1 = arith.constant 0 : i32
    return %c0_i32, %c0_i32_0 : i32, i32
  }
  func.func @transform_19(%arg0: i32) -> (i32, i32, i32) {
    %c0_i32 = arith.constant 0 : i32
    %c0_i32_0 = arith.constant 0 : i32
    %c0_i32_1 = arith.constant 0 : i32
    return %arg0, %c0_i32, %c0_i32_0 : i32, i32, i32
  }
}

</mosaic_0001>

<bundles_post_ra>
// kernel: vision_transformer_forward.1
= control target key start
LH: loop header
LB: loop body
LE: loop exit
PB: predicated region body
PF: predicated region fallthrough
CT: control target
= control target key end

     0   :  { %vm4357_vm0 = vmmov 0   ;;  %vm655_vm1 = vcmask 130048   ;;  %vm3191_vm2 = vcmask 1041409   ;;  %s5221_s1 = inlined_call_operand.vmem [shape: bf16[128,128], index: 1, kind: input, shape index: {}]   ;;  %s5222_s0 = inlined_call_operand.vmem [shape: bf16[32,128], index: 0, kind: input, shape index: {}]   ;;  %s5223_s2 = inlined_call_operand.vmem [shape: f32[1,128], index: 2, kind: input, shape index: {}]   ;;  %s5224_s3 = inlined_call_operand.vmem [shape: f32[16,128], index: 3, kind: input, shape index: {}]   ;;  %s5225_s6 = inlined_call_operand.vmem [shape: bf16[2,3,128,32], index: 6, kind: input, shape index: {}]   ;;  %s5226_s4 = inlined_call_operand.vmem [shape: f32[2,1,128], index: 4, kind: input, shape index: {}]   ;;  %s5227_s5 = inlined_call_operand.vmem [shape: f32[2,1,128], index: 5, kind: input, shape index: {}]   ;;  %s5228_s7 = inlined_call_operand.vmem [shape: f32[2,3,1,32], index: 7, kind: input, shape index: {}]   ;;  %s5229_s8 = inlined_call_operand.vmem [shape: bf16[2,2,16,128], index: 8, kind: input, shape index: {}]   ;;  %s5230_s9 = inlined_call_operand.vmem [shape: f32[2,1,128], index: 9, kind: input, shape index: {}]   ;;  %s5231_s12 = inlined_call_operand.vmem [shape: bf16[2,128,128], index: 12, kind: input, shape index: {}]   ;;  %s5232_s10 = inlined_call_operand.vmem [shape: f32[2,1,128], index: 10, kind: input, shape index: {}]   ;;  %s5233_s11 = inlined_call_operand.vmem [shape: f32[2,1,128], index: 11, kind: input, shape index: {}]   ;;  %s5234_s14 = inlined_call_operand.vmem [shape: bf16[2,128,128], index: 14, kind: input, shape index: {}]   ;;  %s5235_s13 = inlined_call_operand.vmem [shape: f32[2,1,128], index: 13, kind: input, shape index: {}]   ;;  %s5236_s15 = inlined_call_operand.vmem [shape: f32[2,1,128], index: 15, kind: input, shape index: {}]   ;;  %s5237_s18 = inlined_call_operand.vmem [shape: bf16[128,128], index: 18, kind: input, shape index: {}]   ;;  %s5238_s16 = inlined_call_operand.vmem [shape: f32[1,128], index: 16, kind: input, shape index: {}]   ;;  %s5239_s17 = inlined_call_operand.vmem [shape: f32[1,128], index: 17, kind: input, shape index: {}]   ;;  %s5240_s19 = inlined_call_operand.vmem [shape: f32[2,17,128], index: 19, kind: output, shape index: {}]  }
   0x1   :  { %5244 = sst [smem:[#allocation2_spill]] %s5221_s1  ;;  %v4144_v29 = vld [vmem:[%s5225_s6] sm:$0xff]   ;;  %v4146_v31 = vld [vmem:[%s5225_s6 + $0x8] sm:$0xff]   ;;  %v4148_v33 = vld [vmem:[%s5225_s6 + $0x10] sm:$0xff]  }
   0x2   :  { %5245 = sst [smem:[#allocation3_spill]] %s5222_s0  ;;  %s5248_s20 = sld [smem:[#allocation2_spill]]  ;;  %v4145_v30 = vld [vmem:[%s5225_s6 + $0x40] sm:$0xff]   ;;  %3782 = vmatprep.subr.bf16.mxu1 %v4144_v29  ;;  %v4147_v32 = vld [vmem:[%s5225_s6 + $0x48] sm:$0xff]   ;;  %v4149_v34 = vld [vmem:[%s5225_s6 + $0x50] sm:$0xff]  }
   0x3   :  { %5246 = sst [smem:[#allocation4_spill]] %s5223_s2  ;;  %s5249_s26 = sld [smem:[#allocation3_spill]]  ;;  %3783 = vmatpush3.bf16.msra.mxu1 %v4144_v29  ;;  %v4150_v35 = vld [vmem:[%s5225_s6 + $0x18] sm:$0xff]   ;;  %v4152_v37 = vld [vmem:[%s5225_s6 + $0x20] sm:$0xff]   ;;  %v4154_v39 = vld [vmem:[%s5225_s6 + $0x28] sm:$0xff]  }
   0x4   :  { %5247 = sst [smem:[#allocation5_spill]] %s5224_s3  ;;  %s5250_s3 = sld [smem:[#allocation4_spill]]  ;;  %3784 = vmatprep.subr.bf16.mxu1 %v4146_v31  ;;  %v4151_v36 = vld [vmem:[%s5225_s6 + $0x58] sm:$0xff]   ;;  %v4153_v38 = vld [vmem:[%s5225_s6 + $0x60] sm:$0xff]   ;;  %v4155_v40 = vld [vmem:[%s5225_s6 + $0x68] sm:$0xff]  }
   0x5   :  { %s5251_s29 = sld [smem:[#allocation5_spill]]  ;;  %v4156_v41 = vld [vmem:[%s5225_s6 + $0x30] sm:$0xff]   ;;  %v4158_v43 = vld [vmem:[%s5225_s6 + $0x38] sm:$0xff]   ;;  %v4570_v45 = vld [vmem:[%s5225_s6 + $0x80] sm:$0xff]  }
   0x6   :  { %v4157_v42 = vld [vmem:[%s5225_s6 + $0x70] sm:$0xff]   ;;  %v4159_v44 = vld [vmem:[%s5225_s6 + $0x78] sm:$0xff]  }
   0x7   :  { %3785 = vmatpush3.bf16.msra.mxu1 %v4146_v31 }
   0x8   :  { %v4134_v0 = vld [vmem:[%s5248_s20] sm:$0xff]   ;;  %v4135_v1 = vld [vmem:[%s5248_s20 + $0x8] sm:$0xff]   ;;  %v4136_v2 = vld [vmem:[%s5248_s20 + $0x10] sm:$0xff]   ;;  %3786 = vmatprep.subr.bf16.mxu1 %v4148_v33 }
   0x9   :  { %3762 = vmatprep.subr.bf16.mxu0 %v4134_v0  ;;  %v4137_v3 = vld [vmem:[%s5248_s20 + $0x18] sm:$0xff]   ;;  %v4142_v4 = vld [vmem:[%s5249_s26] sm:$0xff]   ;;  %v4139_v6 = vld [vmem:[%s5248_s20 + $0x28] sm:$0xff]  }
   0xa   :  { %3763 = vmatpush3.bf16.msra.mxu0 %v4134_v0  ;;  %3778 = vmatprep.mubr.bf16.mxu0 %v4142_v4  ;;  %v4138_v5 = vld [vmem:[%s5248_s20 + $0x20] sm:$0xff]   ;;  %v4140_v7 = vld [vmem:[%s5248_s20 + $0x30] sm:$0xff]   ;;  %v4141_v8 = vld [vmem:[%s5248_s20 + $0x38] sm:$0xff]   ;;  %s4358_s20 = smov 112  }
   0xb   :  { %3764 = vmatprep.subr.bf16.mxu0 %v4135_v1  ;;  %v4143_v9 = vld [vmem:[%s5249_s26 + $0x8] sm:$0xff]   ;;  %v3318_v10 = vld [vmem:[%s5250_s3] ss:$0 sm:$0xff]  ;;  %3787 = vmatpush3.bf16.msra.mxu1 %v4148_v33 }
   0xc   :  { %v199_v12 = vld [vmem:[%s5251_s29] sm:$0xff]  ;;  %v200_v21 = vld [vmem:[%s5251_s29 + $0x8] sm:$0xff]  ;;  %3788 = vmatprep.subr.bf16.mxu1 %v4150_v35 }
   0xe   :  { %3765 = vmatpush3.bf16.msra.mxu0 %v4135_v1 }
   0xf   :  { %3766 = vmatprep.subr.bf16.mxu0 %v4136_v2  ;;  %3789 = vmatpush3.bf16.msra.mxu1 %v4150_v35 }
  0x10   :  { %3790 = vmatprep.subr.bf16.mxu1 %v4152_v37 }
  0x12   :  { %3767 = vmatpush3.bf16.msra.mxu0 %v4136_v2 }
  0x13   :  { %3768 = vmatprep.subr.bf16.mxu0 %v4137_v3  ;;  %3791 = vmatpush3.bf16.msra.mxu1 %v4152_v37 }
  0x14   :  { %3792 = vmatprep.subr.bf16.mxu1 %v4154_v39 }
  0x16   :  { %3769 = vmatpush3.bf16.msra.mxu0 %v4137_v3 }
  0x17   :  { %3770 = vmatprep.subr.bf16.mxu0 %v4138_v5  ;;  %3793 = vmatpush3.bf16.msra.mxu1 %v4154_v39  ;;  %v4162_v39 = vld [vmem:[%s5225_s6 + $0x90] sm:$0xff]  }
  0x18   :  { %3794 = vmatprep.subr.bf16.mxu1 %v4156_v41 }
  0x1a   :  { %3771 = vmatpush3.bf16.msra.mxu0 %v4138_v5 }
  0x1b   :  { %3772 = vmatprep.subr.bf16.mxu0 %v4139_v6  ;;  %3795 = vmatpush3.bf16.msra.mxu1 %v4156_v41  ;;  %v4164_v41 = vld [vmem:[%s5225_s6 + $0xa0] sm:$0xff]  }
  0x1c   :  { %3796 = vmatprep.subr.bf16.mxu1 %v4158_v43 }
  0x1e   :  { %3773 = vmatpush3.bf16.msra.mxu0 %v4139_v6 }
  0x1f   :  { %3774 = vmatprep.subr.bf16.mxu0 %v4140_v7  ;;  %3797 = vmatpush3.bf16.msra.mxu1 %v4158_v43  ;;  %v4166_v43 = vld [vmem:[%s5225_s6 + $0xb0] sm:$0xff]  }
  0x20   :  { %3822 = vmatprep.subr.bf16.mxu1 %v4570_v45 }
  0x22   :  { %3775 = vmatpush3.bf16.msra.mxu0 %v4140_v7 }
  0x23   :  { %3776 = vmatprep.subr.bf16.mxu0 %v4141_v8 }
  0x26   :  { %3777 = vmatpush3.bf16.msra.mxu0 %v4141_v8 }
  0x27   :  { %3802 = vmatprep.subr.bf16.mxu0 %v4145_v30 }
  0x29   :  { %3779 = vmatmul.mubr.bf16.vlgmr.msra.gmra.mrb[0].mxu0 %v4143_v9 }
  0x2a   :  { %3803 = vmatpush3.bf16.msra.mxu0 %v4145_v30 }
  0x2b   :  { %3804 = vmatprep.subr.bf16.mxu0 %v4147_v32 }
  0x2e   :  { %3805 = vmatpush3.bf16.msra.mxu0 %v4147_v32 }
  0x2f   :  { %3806 = vmatprep.subr.bf16.mxu0 %v4149_v34 }
  0x32   :  { %3807 = vmatpush3.bf16.msra.mxu0 %v4149_v34 }
  0x33   :  { %3808 = vmatprep.subr.bf16.mxu0 %v4151_v36 }
  0x36   :  { %3809 = vmatpush3.bf16.msra.mxu0 %v4151_v36 }
  0x37   :  { %3810 = vmatprep.subr.bf16.mxu0 %v4153_v38 }
  0x3a   :  { %3811 = vmatpush3.bf16.msra.mxu0 %v4153_v38  ;;  %v4161_v38 = vld [vmem:[%s5225_s6 + $0x88] sm:$0xff]  }
  0x3b   :  { %3812 = vmatprep.subr.bf16.mxu0 %v4155_v40 }
  0x3e   :  { %3813 = vmatpush3.bf16.msra.mxu0 %v4155_v40  ;;  %v4163_v40 = vld [vmem:[%s5225_s6 + $0x98] sm:$0xff]  }
  0x3f   :  { %3814 = vmatprep.subr.bf16.mxu0 %v4157_v42 }
  0x42   :  { %3815 = vmatpush3.bf16.msra.mxu0 %v4157_v42  ;;  %v4165_v42 = vld [vmem:[%s5225_s6 + $0xa8] sm:$0xff]  }
  0x43   :  { %3816 = vmatprep.subr.bf16.mxu0 %v4159_v44 }
  0x46   :  { %3817 = vmatpush3.bf16.msra.mxu0 %v4159_v44  ;;  %v4167_v44 = vld [vmem:[%s5225_s6 + $0xb8] sm:$0xff]  }
  0xfc   :  { %v3780_v11 = vpop.f32.mrb[0].mxu0 }
  0xfd   :  { %v193_v13 = vadd.f32 %v3780_v11, %v3318_v10  ;;  %v184_v14 = vpop.f32.mrb[1].mxu0 }
  0xfe   :  { %v185_v15 = vadd.f32 %v3318_v10, %v184_v14  ;;  %v3781_v16 = vpop.f32.mrb[2].mxu0 }
  0xff   :  { %v4496_v17 = vadd.f32 %v199_v12, %v193_v13  ;;  %v196_v18 = vadd.f32 %v3781_v16, %v3318_v10  ;;  %v187_v19 = vpop.f32.mrb[3].mxu0  ;;  %v3329_v13 = vld [vmem:[%s5226_s4] ss:$0 sm:$0xff] }
 0x100   :  { %v4498_v20 = vadd.f32 %v199_v12, %v185_v15  ;;  %v188_v22 = vadd.f32 %v3318_v10, %v187_v19  ;;  %v3330_v16 = vld [vmem:[%s5227_s5] ss:$0 sm:$0xff] }
 0x101   :  { %211 = vadd.xlane.f32.xlu1 %v4496_v17  ;;  %v4505_v23 = vadd.f32 %v200_v21, %v196_v18  ;;  %v221_v28 = vmul.f32 %v4496_v17, %v4496_v17 }
 0x102   :  { %207 = vadd.xlane.f32.xlu0 %v4498_v20  ;;  %v4507_v24 = vadd.f32 %v200_v21, %v188_v22  ;;  %v219_v26 = vmul.f32 %v4498_v20, %v4498_v20 }
 0x103   :  { %v222_v27 = vmul.f32 %v4505_v23, %v4505_v23 }
 0x104   :  { %v220_v25 = vmul.f32 %v4507_v24, %v4507_v24 }
 0x105   :  { %213 = vadd.xlane.f32.xlu1 %v4505_v23 }
 0x106   :  { %209 = vadd.xlane.f32.xlu0 %v4507_v24 }
 0x109   :  { %225 = vadd.xlane.f32.xlu1 %v220_v25 }
 0x10a   :  { %223 = vadd.xlane.f32.xlu0 %v219_v26 }
 0x10d   :  { %229 = vadd.xlane.f32.xlu1 %v222_v27 }
 0x10e   :  { %227 = vadd.xlane.f32.xlu0 %v221_v28 }
 0x18e   :  { %v212_v46 = vpop.xlane.xlu1 %211 }
 0x18f   :  { %v208_v47 = vpop.xlane.xlu0 %207  ;;  %v217_v57 = vmul.f32 0.03125, %v212_v46  ;;  %v3331_v46 = vld [vmem:[%s5228_s7] ss:$0 sm:$0xff] }
 0x190   :  { %v215_v50 = vmul.f32 0.03125, %v208_v47 }
 0x191   :  { %v237_v3 = vmul.f32 %v217_v57, %v217_v57  ;;  %v245_v25 = vsub.f32 %v4496_v17, %v217_v57 }
 0x192   :  { %v214_v48 = vpop.xlane.xlu1 %213  ;;  %v235_v58 = vmul.f32 %v215_v50, %v215_v50  ;;  %v243_v12 = vsub.f32 %v4498_v20, %v215_v50 }
 0x193   :  { %v210_v49 = vpop.xlane.xlu0 %209  ;;  %v218_v54 = vmul.f32 0.03125, %v214_v48 }
 0x194   :  { %v216_v51 = vmul.f32 0.03125, %v210_v49  ;;  %v3357_v49 = vld [vmem:[%s5228_s7 + $0x1] ss:$0 sm:$0xff] }
 0x195   :  { %v238_v63 = vmul.f32 %v218_v54, %v218_v54  ;;  %v246_v19 = vsub.f32 %v4505_v23, %v218_v54 }
 0x196   :  { %v236_v52 = vmul.f32 %v216_v51, %v216_v51  ;;  %v226_v53 = vpop.xlane.xlu1 %225  ;;  %v244_v10 = vsub.f32 %v4507_v24, %v216_v51 }
 0x197   :  { %v232_v55 = vmul.f32 0.03125, %v226_v53  ;;  %v224_v56 = vpop.xlane.xlu0 %223 }
 0x198   :  { %v231_v59 = vmul.f32 0.03125, %v224_v56 }
 0x199   :  { %v240_v60 = vsub.f32 %v232_v55, %v236_v52 }
 0x19a   :  { %v239_v61 = vsub.f32 %v231_v59, %v235_v58  ;;  %v230_v62 = vpop.xlane.xlu1 %229 }
 0x19b   :  { %v248_v0 = vadd.f32 1e-05, %v240_v60  ;;  %v234_v1 = vmul.f32 0.03125, %v230_v62  ;;  %v228_v2 = vpop.xlane.xlu0 %227 }
 0x19c   :  { %v247_v4 = vadd.f32 1e-05, %v239_v61  ;;  %v233_v5 = vmul.f32 0.03125, %v228_v2 }
 0x19d   :  { %4236 = vrsqrt.f32 %v248_v0  ;;  %v242_v6 = vsub.f32 %v234_v1, %v238_v63 }
 0x19e   :  { %4238 = vrsqrt.f32 %v247_v4  ;;  %v241_v7 = vsub.f32 %v233_v5, %v237_v3 }
 0x19f   :  { %v250_v8 = vadd.f32 1e-05, %v242_v6 }
 0x1a0   :  { %v249_v9 = vadd.f32 1e-05, %v241_v7 }
 0x1a1   :  { %4240 = vrsqrt.f32 %v250_v8 }
 0x1a2   :  { %4242 = vrsqrt.f32 %v249_v9 }
 0x1a7   :  { %v4237_v11 = vpop.eup %4236 }
 0x1a8   :  { %v4239_v14 = vpop.eup %4238  ;;  %v256_v15 = vmul.f32 %v4237_v11, %v244_v10  ;;  %v3383_v11 = vld [vmem:[%s5228_s7 + $0x2] ss:$0 sm:$0xff] }
 0x1a9   :  { %v255_v18 = vmul.f32 %v4239_v14, %v243_v12 }
 0x1aa   :  { %v266_v21 = vmul.f32 %v3329_v13, %v256_v15 }
 0x1ab   :  { %v4241_v22 = vpop.eup %4240  ;;  %v265_v26 = vmul.f32 %v3329_v13, %v255_v18 }
 0x1ac   :  { %v4243_v27 = vpop.eup %4242  ;;  %v276_v28 = vadd.f32 %v3330_v16, %v266_v21  ;;  %v258_v29 = vmul.f32 %v4241_v22, %v246_v19 }
 0x1ad   :  { %v275_v30 = vadd.f32 %v3330_v16, %v265_v26  ;;  %v257_v31 = vmul.f32 %v4243_v27, %v245_v25 }
 0x1ae   :  { %v268_v32 = vmul.f32 %v3329_v13, %v258_v29 }
 0x1af   :  { %v279_v33 = vpack.c.bf16 %v276_v28, %v275_v30  ;;  %v267_v34 = vmul.f32 %v3329_v13, %v257_v31 }
 0x1b0   :  { %v278_v35 = vadd.f32 %v3330_v16, %v268_v32 }
 0x1b1   :  { %3798 = vmatprep.mubr.bf16.mxu1 %v279_v33  ;;  %3818 = vmatprep.mubr.bf16.mxu0 %v279_v33  ;;  %v277_v36 = vadd.f32 %v3330_v16, %v267_v34 }
 0x1b3   :  { %v280_v37 = vpack.c.bf16 %v278_v35, %v277_v36 }
 0x1b5   :  { %3799 = vmatmul.mubr.bf16.vlgmr.msra.gmra.mrb[0].mxu1 %v280_v37  ;;  %3819 = vmatmul.mubr.bf16.vlgmr.msra.gmra.mrb[4].mxu0 %v280_v37 }
 0x1b6   :  { %3823 = vmatpush3.bf16.msra.mxu1 %v4570_v45  ;;  %3838 = vmatprep.mubr.bf16.mxu1 %v279_v33  ;;  %v4356_v45 = vmov 0.0  }
 0x1b7   :  { %3824 = vmatprep.subr.bf16.mxu1 %v4161_v38  ;;  %3842 = vmatprep.subr.bf16.mxu0 %v4356_v45 }
 0x1b8   :  { %3844 = vmatprep.mubr.msk.bf16.mxu0 %vm4357_vm0, %v4356_v45 }
 0x1ba   :  { %3825 = vmatpush3.bf16.msra.mxu1 %v4161_v38 }
 0x1bb   :  { %3826 = vmatprep.subr.bf16.mxu1 %v4162_v39 }
 0x1be   :  { %3827 = vmatpush3.bf16.msra.mxu1 %v4162_v39 }
 0x1bf   :  { %3828 = vmatprep.subr.bf16.mxu1 %v4163_v40 }
 0x1c2   :  { %3829 = vmatpush3.bf16.msra.mxu1 %v4163_v40 }
 0x1c3   :  { %3830 = vmatprep.subr.bf16.mxu1 %v4164_v41 }
 0x1c6   :  { %3831 = vmatpush3.bf16.msra.mxu1 %v4164_v41 }
 0x1c7   :  { %3832 = vmatprep.subr.bf16.mxu1 %v4165_v42 }
 0x1ca   :  { %3833 = vmatpush3.bf16.msra.mxu1 %v4165_v42 }
 0x1cb   :  { %3834 = vmatprep.subr.bf16.mxu1 %v4166_v43 }
 0x1ce   :  { %3835 = vmatpush3.bf16.msra.mxu1 %v4166_v43 }
 0x1cf   :  { %3836 = vmatprep.subr.bf16.mxu1 %v4167_v44 }
 0x1d2   :  { %3837 = vmatpush3.bf16.msra.mxu1 %v4167_v44 }
 0x1d3   :  { %3860 = vmatprep.subr.bf16.mxu1 %v4356_v45 }
 0x1d5   :  { %3839 = vmatmul.mubr.bf16.vlgmr.msra.gmra.mrb[4].mxu1 %v280_v37 }
 0x1d6   :  { %3862 = vmatprep.mubr.msk.bf16.mxu1 %vm4357_vm0, %v4356_v45 }
 0x288   :  { %v3800_v47 = vpop.f32.mrb[0].mxu1  ;;  %v3820_v48 = vpop.f32.mrb[4].mxu0 }
 0x289   :  { %v395_v50 = vadd.f32 %v3800_v47, %v3331_v46  ;;  %v386_v51 = vpop.f32.mrb[1].mxu1  ;;  %v508_v52 = vpop.f32.mrb[5].mxu0  ;;  %v517_v56 = vadd.f32 %v3820_v48, %v3357_v49 }
 0x28a   :  { %v387_v53 = vadd.f32 %v3331_v46, %v386_v51  ;;  %v3801_v54 = vpop.f32.mrb[2].mxu1  ;;  %v3821_v55 = vpop.f32.mrb[6].mxu0  ;;  %v509_v61 = vadd.f32 %v3357_v49, %v508_v52 }
 0x28b   :  { %v398_v57 = vadd.f32 %v3801_v54, %v3331_v46  ;;  %v520_v58 = vadd.f32 %v3821_v55, %v3357_v49  ;;  %v389_v59 = vpop.f32.mrb[3].mxu1  ;;  %v511_v60 = vpop.f32.mrb[7].mxu0  ;;  %v647_v0 = vmul.f32 0.25, %v395_v50 }
 0x28c   :  { %v390_v62 = vadd.f32 %v3331_v46, %v389_v59  ;;  %v512_v63 = vadd.f32 %v3357_v49, %v511_v60  ;;  %v645_v3 = vmul.f32 0.25, %v387_v53 }
 0x28d   :  { %v648_v1 = vmul.f32 0.25, %v398_v57  ;;  %v4617_v2 = vpack.c.bf16 %v520_v58, %v517_v56 }
 0x28e   :  { %v646_v4 = vmul.f32 0.25, %v390_v62  ;;  %v4619_v5 = vpack.c.bf16 %v512_v63, %v509_v61 }
 0x28f   :  { %v4621_v6 = vpack.c.bf16 %v648_v1, %v647_v0  ;;  %v707_v9 = vsel %vm655_vm1, %v4617_v2, 0 }
 0x290   :  { %v4623_v7 = vpack.c.bf16 %v646_v4, %v645_v3  ;;  %v660_v8 = vsel %vm655_vm1, %v4619_v5, 0 }
 0x291   :  { %3843 = vmatpush3.bf16.xpose.msra.mxu0 %v660_v8 }
 0x292   :  { %3848 = vmatprep.subr.bf16.mxu0 %v4356_v45 }
 0x298   :  { %3845 = vmatmul.mubr.msk.bf16.vlgmr.msra.gmra.mrb[8].mxu0 %vm655_vm1, %v4623_v7 }
 0x299   :  { %3849 = vmatpush3.bf16.xpose.msra.mxu0 %v707_v9  ;;  %3850 = vmatprep.mubr.msk.bf16.mxu0 %vm4357_vm0, %v4356_v45 }
 0x29a   :  { %3854 = vmatprep.subr.bf16.mxu0 %v4356_v45 }
 0x2a0   :  { %3851 = vmatmul.mubr.msk.bf16.vlgmr.msra.gmra.mrb[12].mxu0 %vm655_vm1, %v4621_v6 }
 0x2a1   :  { %3856 = vmatprep.mubr.msk.bf16.mxu0 %vm4357_vm0, %v4356_v45 }
 0x2a8   :  { %v3840_v10 = vpop.f32.mrb[4].mxu1 }
 0x2a9   :  { %v630_v12 = vpop.f32.mrb[5].mxu1  ;;  %v639_v14 = vadd.f32 %v3840_v10, %v3383_v11 }
 0x2aa   :  { %v3841_v13 = vpop.f32.mrb[6].mxu1  ;;  %v631_v18 = vadd.f32 %v3383_v11, %v630_v12 }
 0x2ab   :  { %v642_v15 = vadd.f32 %v3841_v13, %v3383_v11  ;;  %v633_v16 = vpop.f32.mrb[7].mxu1 }
 0x2ac   :  { %v634_v19 = vadd.f32 %v3383_v11, %v633_v16 }
 0x2ad   :  { %v4642_v21 = vpack.c.bf16 %v642_v15, %v639_v14 }
 0x2ae   :  { %v4644_v22 = vpack.c.bf16 %v634_v19, %v631_v18 }
 0x2af   :  { %3861 = vmatpush3.bf16.msra.mxu1 %v4642_v21 }
 0x2b0   :  { %3855 = vmatpush3.bf16.msra.mxu0 %v4644_v22  ;;  %3872 = vmatprep.subr.bf16.mxu1 %v4356_v45 }
 0x2b1   :  { %3866 = vmatprep.subr.bf16.mxu0 %v4356_v45 }
 0x36b   :  { %v696_v25 = vpop.f32.mrb[8].mxu0 }
 0x36c   :  { %v3846_v26 = vpop.f32.mrb[9].mxu0  ;;  %v750_v27 = vsel %vm655_vm1, %v696_v25, -inf }
 0x36d   :  { %751 = vmax.xlane.f32.xlu0 %v750_v27  ;;  %v699_v28 = vpop.f32.mrb[10].mxu0 }
 0x36e   :  { %v3847_v29 = vpop.f32.mrb[11].mxu0  ;;  %v753_v30 = vsel %vm655_vm1, %v699_v28, -inf }
 0x36f   :  { %754 = vmax.xlane.f32.xlu1 %v753_v30 }
 0x373   :  { %v743_v31 = vpop.f32.mrb[12].mxu0 }
 0x374   :  { %v3852_v32 = vpop.f32.mrb[13].mxu0  ;;  %v756_v33 = vsel %vm655_vm1, %v743_v31, -inf }
 0x375   :  { %757 = vmax.xlane.f32.xlu0 %v756_v33  ;;  %v746_v34 = vpop.f32.mrb[14].mxu0 }
 0x376   :  { %v3853_v35 = vpop.f32.mrb[15].mxu0  ;;  %v759_v36 = vsel %vm655_vm1, %v746_v34, -inf }
 0x377   :  { %760 = vmax.xlane.f32.xlu1 %v759_v36 }
 0x3fa   :  { %v752_v37 = vpop.xlane.xlu0 %751 }
 0x3fb   :  { %v762_v38 = vsub.f32 %v696_v25, %v752_v37 }
 0x3fc   :  { %v755_v39 = vpop.xlane.xlu1 %754 }
 0x3fd   :  { %v766_v40 = vmul.f32 1.442695, %v762_v38  ;;  %v763_v41 = vsub.f32 %v699_v28, %v755_v39 }
 0x3ff   :  { %4244 = vpow2.f32 %v766_v40  ;;  %v768_v42 = vmul.f32 1.442695, %v763_v41 }
 0x401   :  { %4246 = vpow2.f32 %v768_v42 }
 0x402   :  { %v758_v43 = vpop.xlane.xlu0 %757 }
 0x403   :  { %v764_v44 = vsub.f32 %v743_v31, %v758_v43 }
 0x404   :  { %v761_v53 = vpop.xlane.xlu1 %760 }
 0x405   :  { %v770_v46 = vmul.f32 1.442695, %v764_v44  ;;  %v765_v54 = vsub.f32 %v746_v34, %v761_v53 }
 0x407   :  { %4248 = vpow2.f32 %v770_v46  ;;  %v772_v55 = vmul.f32 1.442695, %v765_v54 }
 0x409   :  { %v4245_v47 = vpop.eup %4244  ;;  %4250 = vpow2.f32 %v772_v55 }
 0x40a   :  { %v774_v48 = vsel %vm655_vm1, %v4245_v47, 0.0 }
 0x40b   :  { %v4247_v49 = vpop.eup %4246  ;;  %775 = vadd.xlane.f32.xlu0 %v774_v48 }
 0x40c   :  { %v777_v50 = vsel %vm655_vm1, %v4247_v49, 0.0 }
 0x40d   :  { %778 = vadd.xlane.f32.xlu1 %v777_v50 }
 0x411   :  { %v4249_v51 = vpop.eup %4248 }
 0x412   :  { %v780_v52 = vsel %vm655_vm1, %v4249_v51, 0.0 }
 0x413   :  { %781 = vadd.xlane.f32.xlu0 %v780_v52  ;;  %v4251_v56 = vpop.eup %4250 }
 0x414   :  { %v783_v57 = vsel %vm655_vm1, %v4251_v56, 0.0 }
 0x41e   :  { %945 = vrot.lane.b32.xlu1 %v4617_v2, %s4358_s20 }
 0x429   :  { %892 = vrot.lane.b32.xlu0 %v4619_v5, %s4358_s20 }
 0x442   :  { %784 = vadd.xlane.f32.xlu1 %v783_v57 }
 0x453   :  { %889 = vrot.lane.b32.xlu1 %v4623_v7, %s4358_s20 }
 0x457   :  { %942 = vrot.lane.b32.xlu1 %v4621_v6, %s4358_s20 }
 0x498   :  { %v776_v58 = vpop.xlane.xlu0 %775 }
 0x499   :  { %4252 = vrcp.f32 %v776_v58 }
 0x49a   :  { %v779_v59 = vpop.xlane.xlu1 %778 }
 0x49b   :  { %4254 = vrcp.f32 %v779_v59 }
 0x49e   :  { %v946_v4 = vpop.permute.xlu1 %945 }
 0x49f   :  { %v951_v12 = vsel %vm655_vm1, %v946_v4, 0 }
 0x4a0   :  { %v782_v60 = vpop.xlane.xlu0 %781 }
 0x4a1   :  { %4256 = vrcp.f32 %v782_v60 }
 0x4a3   :  { %v4253_v61 = vpop.eup %4252 }
 0x4a4   :  { %v790_v63 = vmul.f32 %v4253_v61, %v4245_v47  ;;  %v893_v1 = vpop.permute.xlu0 %892 }
 0x4a5   :  { %v4255_v62 = vpop.eup %4254  ;;  %v898_v3 = vsel %vm655_vm1, %v893_v1, 0 }
 0x4a6   :  { %v791_v0 = vmul.f32 %v4255_v62, %v4247_v49 }
 0x4a8   :  { %v794_v2 = vpack.c.bf16 %v791_v0, %v790_v63 }
 0x4aa   :  { %3857 = vmatmul.mubr.msk.bf16.vlgmr.msra.gmra.mrb[16].mxu0 %vm655_vm1, %v794_v2 }
 0x4ab   :  { %3867 = vmatpush3.bf16.xpose.msra.mxu0 %v898_v3  ;;  %3868 = vmatprep.mubr.msk.bf16.mxu0 %vm4357_vm0, %v4356_v45  ;;  %v4257_v7 = vpop.eup %4256 }
 0x4ac   :  { %3878 = vmatprep.subr.bf16.mxu0 %v4356_v45  ;;  %v792_v9 = vmul.f32 %v4257_v7, %v4249_v51 }
 0x4cf   :  { %v785_v5 = vpop.xlane.xlu1 %784 }
 0x4d0   :  { %4258 = vrcp.f32 %v785_v5 }
 0x4d3   :  { %v890_v6 = vpop.permute.xlu1 %889 }
 0x4d4   :  { %3869 = vmatmul.mubr.msk.bf16.vlgmr.msra.gmra.mrb[20].mxu0 %vm655_vm1, %v890_v6 }
 0x4d5   :  { %3880 = vmatprep.mubr.msk.bf16.mxu0 %vm4357_vm0, %v4356_v45 }
 0x4d7   :  { %v943_v13 = vpop.permute.xlu1 %942 }
 0x4da   :  { %v4259_v8 = vpop.eup %4258 }
 0x4db   :  { %v793_v10 = vmul.f32 %v4259_v8, %v4251_v56 }
 0x4dd   :  { %v795_v11 = vpack.c.bf16 %v793_v10, %v792_v9 }
 0x4df   :  { %3863 = vmatmul.mubr.msk.bf16.vlgmr.msra.gmra.mrb[8].mxu1 %vm655_vm1, %v795_v11 }
 0x4e0   :  { %3873 = vmatpush3.bf16.xpose.msra.mxu1 %v951_v12  ;;  %3874 = vmatprep.mubr.msk.bf16.mxu1 %vm4357_vm0, %v4356_v45 }
 0x4e1   :  { %3884 = vmatprep.subr.bf16.mxu1 %v4356_v45 }
 0x4e7   :  { %3875 = vmatmul.mubr.msk.bf16.vlgmr.msra.gmra.mrb[12].mxu1 %vm655_vm1, %v943_v13  ;;  %v4168_v13 = vld [vmem:[%s5229_s8 + $0x8] sm:$0xff]  }
 0x4e8   :  { %3886 = vmatprep.mubr.msk.bf16.mxu1 %vm4357_vm0, %v4356_v45 }
 0x57d   :  { %v4682_v14 = vpop.f32.mrb[16].mxu0 }
 0x57e   :  { %v3858_v15 = vpop.f32.mrb[17].mxu0 }
 0x57f   :  { %v4684_v16 = vpop.f32.mrb[18].mxu0  ;;  %v4169_v15 = vld [vmem:[%s5229_s8] sm:$0xff]  }
 0x580   :  { %v884_v18 = vpack.c.bf16 %v4684_v16, %v4682_v14  ;;  %v3859_v19 = vpop.f32.mrb[19].mxu0 }
 0x5a7   :  { %v934_v25 = vpop.f32.mrb[20].mxu0 }
 0x5a8   :  { %v3870_v26 = vpop.f32.mrb[21].mxu0  ;;  %v994_v27 = vsel %vm655_vm1, %v934_v25, -inf }
 0x5a9   :  { %995 = vmax.xlane.f32.xlu0 %v994_v27  ;;  %v937_v28 = vpop.f32.mrb[22].mxu0 }
 0x5aa   :  { %v3871_v29 = vpop.f32.mrb[23].mxu0  ;;  %v997_v30 = vsel %vm655_vm1, %v937_v28, -inf }
 0x5ab   :  { %998 = vmax.xlane.f32.xlu1 %v997_v30 }
 0x5b2   :  { %v4690_v31 = vpop.f32.mrb[8].mxu1 }
 0x5b3   :  { %v3864_v32 = vpop.f32.mrb[9].mxu1 }
 0x5b4   :  { %v4692_v33 = vpop.f32.mrb[10].mxu1 }
 0x5b5   :  { %v885_v34 = vpack.c.bf16 %v4692_v33, %v4690_v31  ;;  %v3865_v35 = vpop.f32.mrb[11].mxu1 }
 0x5ba   :  { %v987_v36 = vpop.f32.mrb[12].mxu1 }
 0x5bb   :  { %v3876_v37 = vpop.f32.mrb[13].mxu1  ;;  %v1000_v38 = vsel %vm655_vm1, %v987_v36, -inf }
 0x5bc   :  { %v990_v39 = vpop.f32.mrb[14].mxu1  ;;  %1001 = vmax.xlane.f32.xlu0 %v1000_v38  ;;  %v3408_v38 = vld [vmem:[%s5230_s9] ss:$0 sm:$0xff] }
 0x5bd   :  { %v3877_v40 = vpop.f32.mrb[15].mxu1  ;;  %v1003_v41 = vsel %vm655_vm1, %v990_v39, -inf }
 0x5c0   :  { %1004 = vmax.xlane.f32.xlu0 %v1003_v41 }
 0x636   :  { %v996_v42 = vpop.xlane.xlu0 %995 }
 0x637   :  { %v1006_v43 = vsub.f32 %v934_v25, %v996_v42 }
 0x638   :  { %v999_v44 = vpop.xlane.xlu1 %998 }
 0x639   :  { %v1010_v46 = vmul.f32 1.442695, %v1006_v43  ;;  %v1007_v47 = vsub.f32 %v937_v28, %v999_v44  ;;  %v4170_v44 = vld [vmem:[%s5231_s12] sm:$0xff]  }
 0x63b   :  { %4260 = vpow2.f32 %v1010_v46  ;;  %v1012_v48 = vmul.f32 1.442695, %v1007_v47  ;;  %v4171_v46 = vld [vmem:[%s5231_s12 + $0x8] sm:$0xff]   ;;  %v4172_v47 = vld [vmem:[%s5231_s12 + $0x10] sm:$0xff]  }
 0x63d   :  { %4262 = vpow2.f32 %v1012_v48  ;;  %v4173_v48 = vld [vmem:[%s5231_s12 + $0x18] sm:$0xff]  }
 0x645   :  { %v4261_v49 = vpop.eup %4260 }
 0x646   :  { %v1018_v50 = vsel %vm655_vm1, %v4261_v49, 0.0 }
 0x647   :  { %v4263_v51 = vpop.eup %4262  ;;  %1019 = vadd.xlane.f32.xlu0 %v1018_v50  ;;  %v4175_v50 = vld [vmem:[%s5231_s12 + $0x28] sm:$0xff]  }
 0x648   :  { %v1021_v52 = vsel %vm655_vm1, %v4263_v51, 0.0 }
 0x649   :  { %v1002_v53 = vpop.xlane.xlu0 %1001  ;;  %1022 = vadd.xlane.f32.xlu1 %v1021_v52  ;;  %v4177_v52 = vld [vmem:[%s5231_s12 + $0x38] sm:$0xff]  }
 0x64a   :  { %v1008_v54 = vsub.f32 %v987_v36, %v1002_v53 }
 0x64c   :  { %v1014_v55 = vmul.f32 1.442695, %v1008_v54 }
 0x64d   :  { %v1005_v56 = vpop.xlane.xlu0 %1004 }
 0x64e   :  { %4264 = vpow2.f32 %v1014_v55  ;;  %v1009_v57 = vsub.f32 %v990_v39, %v1005_v56 }
 0x650   :  { %v1016_v58 = vmul.f32 1.442695, %v1009_v57 }
 0x652   :  { %4266 = vpow2.f32 %v1016_v58 }
 0x658   :  { %v4265_v59 = vpop.eup %4264 }
 0x659   :  { %v1024_v60 = vsel %vm655_vm1, %v4265_v59, 0.0 }
 0x65a   :  { %1025 = vadd.xlane.f32.xlu0 %v1024_v60 }
 0x65c   :  { %v4267_v61 = vpop.eup %4266 }
 0x65d   :  { %v1027_v62 = vsel %vm655_vm1, %v4267_v61, 0.0 }
 0x65e   :  { %1028 = vadd.xlane.f32.xlu1 %v1027_v62 }
 0x66f   :  { %1089 = vrot.lane.b32.xlu1 %v4642_v21, %s4358_s20 }
 0x670   :  { %1041 = vrot.lane.b32.xlu0 %v4644_v22, %s4358_s20 }
 0x6d4   :  { %v1020_v0 = vpop.xlane.xlu0 %1019 }
 0x6d6   :  { %v1023_v63 = vpop.xlane.xlu1 %1022 }
 0x6d7   :  { %4268 = vrcp.f32 %v1023_v63 }
 0x6d8   :  { %4270 = vrcp.f32 %v1020_v0 }
 0x6e1   :  { %v4269_v1 = vpop.eup %4268 }
 0x6e2   :  { %v4271_v3 = vpop.eup %4270  ;;  %v1035_v4 = vmul.f32 %v4269_v1, %v4263_v51  ;;  %v4176_v51 = vld [vmem:[%s5231_s12 + $0x30] sm:$0xff]  }
 0x6e3   :  { %v1034_v5 = vmul.f32 %v4271_v3, %v4261_v49  ;;  %v4174_v49 = vld [vmem:[%s5231_s12 + $0x20] sm:$0xff]  }
 0x6e5   :  { %v1038_v8 = vpack.c.bf16 %v1035_v4, %v1034_v5 }
 0x6e7   :  { %v1026_v2 = vpop.xlane.xlu0 %1025 }
 0x6e8   :  { %4272 = vrcp.f32 %v1026_v2 }
 0x6eb   :  { %v1042_v6 = vpop.permute.xlu0 %1041  ;;  %v1029_v7 = vpop.xlane.xlu1 %1028 }
 0x6ec   :  { %4274 = vrcp.f32 %v1029_v7  ;;  %3879 = vmatpush3.bf16.msra.mxu0 %v1042_v6 }
 0x6ed   :  { %3890 = vmatprep.subr.bf16.mxu0 %v4168_v13 }
 0x6ef   :  { %3881 = vmatmul.mubr.msk.bf16.vlgmr.msra.gmra.mrb[24].mxu0 %vm655_vm1, %v1038_v8  ;;  %v1090_v21 = vpop.permute.xlu1 %1089 }
 0x6f0   :  { %3885 = vmatpush3.bf16.msra.mxu1 %v1090_v21  ;;  %3891 = vmatpush3.bf16.msra.mxu0 %v4168_v13 }
 0x6f1   :  { %3896 = vmatprep.subr.bf16.mxu0 %v4169_v15  ;;  %3902 = vmatprep.subr.bf16.mxu1 %v4170_v44 }
 0x6f2   :  { %v4273_v22 = vpop.eup %4272 }
 0x6f3   :  { %v1036_v10 = vmul.f32 %v4273_v22, %v4265_v59 }
 0x6f6   :  { %v4275_v9 = vpop.eup %4274 }
 0x6f7   :  { %v1037_v11 = vmul.f32 %v4275_v9, %v4267_v61 }
 0x6f9   :  { %v1039_v12 = vpack.c.bf16 %v1037_v11, %v1036_v10 }
 0x6fb   :  { %3887 = vmatmul.mubr.msk.bf16.vlgmr.msra.gmra.mrb[16].mxu1 %vm655_vm1, %v1039_v12 }
 0x6fc   :  { %3903 = vmatpush3.bf16.msra.mxu1 %v4170_v44 }
 0x6fd   :  { %3904 = vmatprep.subr.bf16.mxu1 %v4171_v46 }
 0x700   :  { %3905 = vmatpush3.bf16.msra.mxu1 %v4171_v46  ;;  %v4178_v46 = vld [vmem:[%s5234_s14] sm:$0xff]  }
 0x701   :  { %3906 = vmatprep.subr.bf16.mxu1 %v4172_v47 }
 0x704   :  { %3907 = vmatpush3.bf16.msra.mxu1 %v4172_v47  ;;  %v4179_v47 = vld [vmem:[%s5234_s14 + $0x8] sm:$0xff]  }
 0x705   :  { %3908 = vmatprep.subr.bf16.mxu1 %v4173_v48 }
 0x708   :  { %3909 = vmatpush3.bf16.msra.mxu1 %v4173_v48  ;;  %v4180_v48 = vld [vmem:[%s5234_s14 + $0x10] sm:$0xff]  }
 0x709   :  { %3910 = vmatprep.subr.bf16.mxu1 %v4174_v49 }
 0x70c   :  { %3911 = vmatpush3.bf16.msra.mxu1 %v4174_v49  ;;  %v4181_v49 = vld [vmem:[%s5234_s14 + $0x18] sm:$0xff]  }
 0x70d   :  { %3912 = vmatprep.subr.bf16.mxu1 %v4175_v50 }
 0x710   :  { %3913 = vmatpush3.bf16.msra.mxu1 %v4175_v50  ;;  %v4182_v50 = vld [vmem:[%s5234_s14 + $0x20] sm:$0xff]  }
 0x711   :  { %3914 = vmatprep.subr.bf16.mxu1 %v4176_v51 }
 0x714   :  { %3915 = vmatpush3.bf16.msra.mxu1 %v4176_v51  ;;  %v4183_v51 = vld [vmem:[%s5234_s14 + $0x28] sm:$0xff]  }
 0x715   :  { %3916 = vmatprep.subr.bf16.mxu1 %v4177_v52 }
 0x718   :  { %3917 = vmatpush3.bf16.msra.mxu1 %v4177_v52  ;;  %v4184_v52 = vld [vmem:[%s5234_s14 + $0x30] sm:$0xff]  }
 0x7c2   :  { %v1081_v19 = vpop.f32.mrb[24].mxu0 }
 0x7c3   :  { %v3882_v25 = vpop.f32.mrb[25].mxu0 }
 0x7c4   :  { %v1084_v26 = vpop.f32.mrb[26].mxu0 }
 0x7c5   :  { %v1136_v27 = vpack.c.bf16 %v1084_v26, %v1081_v19  ;;  %v3883_v28 = vpop.f32.mrb[27].mxu0 }
 0x7c7   :  { %3892 = vmatprep.mubr.msk.bf16.mxu0 %vm655_vm1, %v1136_v27  ;;  %v3409_v27 = vld [vmem:[%s5232_s10] ss:$0 sm:$0xff] }
 0x7ce   :  { %v1129_v29 = vpop.f32.mrb[16].mxu1 }
 0x7cf   :  { %v3888_v30 = vpop.f32.mrb[17].mxu1 }
 0x7d0   :  { %v1132_v32 = vpop.f32.mrb[18].mxu1  ;;  %v3410_v30 = vld [vmem:[%s5233_s11] ss:$0 sm:$0xff] }
 0x7d1   :  { %v1137_v35 = vpack.c.bf16 %v1132_v32, %v1129_v29  ;;  %v3889_v36 = vpop.f32.mrb[19].mxu1 }
 0x7d3   :  { %3893 = vmatmul.mubr.msk.bf16.vlgmr.msra.gmra.mrb[28].mxu0 %vm655_vm1, %v1137_v35 }
 0x7d4   :  { %3897 = vmatpush3.bf16.msra.mxu0 %v4169_v15  ;;  %3898 = vmatprep.mubr.msk.bf16.mxu0 %vm655_vm1, %v884_v18 }
 0x7d5   :  { %3922 = vmatprep.subr.bf16.mxu0 %v4178_v46 }
 0x7df   :  { %3899 = vmatmul.mubr.msk.bf16.vlgmr.msra.gmra.mrb[28].mxu0 %vm655_vm1, %v885_v34 }
 0x7e0   :  { %3923 = vmatpush3.bf16.msra.mxu0 %v4178_v46 }
 0x7e1   :  { %3924 = vmatprep.subr.bf16.mxu0 %v4179_v47 }
 0x7e4   :  { %3925 = vmatpush3.bf16.msra.mxu0 %v4179_v47 }
 0x7e5   :  { %3926 = vmatprep.subr.bf16.mxu0 %v4180_v48 }
 0x7e8   :  { %3927 = vmatpush3.bf16.msra.mxu0 %v4180_v48 }
 0x7e9   :  { %3928 = vmatprep.subr.bf16.mxu0 %v4181_v49 }
 0x7ec   :  { %3929 = vmatpush3.bf16.msra.mxu0 %v4181_v49 }
 0x7ed   :  { %3930 = vmatprep.subr.bf16.mxu0 %v4182_v50 }
 0x7f0   :  { %3931 = vmatpush3.bf16.msra.mxu0 %v4182_v50 }
 0x7f1   :  { %3932 = vmatprep.subr.bf16.mxu0 %v4183_v51 }
 0x7f4   :  { %3933 = vmatpush3.bf16.msra.mxu0 %v4183_v51 }
 0x7f5   :  { %3934 = vmatprep.subr.bf16.mxu0 %v4184_v52 }
 0x7f8   :  { %3935 = vmatpush3.bf16.msra.mxu0 %v4184_v52 }
 0x8b2   :  { %v3900_v37 = vpop.f32.mrb[28].mxu0 }
 0x8b3   :  { %v1265_v39 = vadd.f32 %v3900_v37, %v4496_v17  ;;  %v1248_v40 = vpop.f32.mrb[29].mxu0 }
 0x8b4   :  { %v1263_v41 = vadd.f32 %v1248_v40, %v4498_v20  ;;  %v3901_v42 = vpop.f32.mrb[30].mxu0 }
 0x8b5   :  { %v4729_v43 = vadd.f32 %v3408_v38, %v1265_v39  ;;  %v1251_v14 = vpop.f32.mrb[31].mxu0  ;;  %v1266_v18 = vadd.f32 %v3901_v42, %v4505_v23 }
 0x8b6   :  { %v4731_v16 = vadd.f32 %v3408_v38, %v1263_v41  ;;  %v1264_v31 = vadd.f32 %v1251_v14, %v4507_v24 }
 0x8b7   :  { %1284 = vadd.xlane.f32.xlu0 %v4729_v43  ;;  %v4739_v17 = vadd.f32 %v3408_v38, %v1266_v18  ;;  %v1294_v24 = vmul.f32 %v4729_v43, %v4729_v43 }
 0x8b8   :  { %v4736_v33 = vadd.f32 %v3408_v38, %v1264_v31  ;;  %1280 = vadd.xlane.f32.xlu1 %v4731_v16  ;;  %v1292_v20 = vmul.f32 %v4731_v16, %v4731_v16 }
 0x8b9   :  { %v1295_v34 = vmul.f32 %v4739_v17, %v4739_v17 }
 0x8ba   :  { %v1293_v23 = vmul.f32 %v4736_v33, %v4736_v33 }
 0x8bb   :  { %1282 = vadd.xlane.f32.xlu0 %v4736_v33 }
 0x8bc   :  { %1286 = vadd.xlane.f32.xlu1 %v4739_v17 }
 0x8bf   :  { %1296 = vadd.xlane.f32.xlu0 %v1292_v20 }
 0x8c0   :  { %1298 = vadd.xlane.f32.xlu1 %v1293_v23 }
 0x8c3   :  { %1300 = vadd.xlane.f32.xlu0 %v1294_v24 }
 0x8c4   :  { %1302 = vadd.xlane.f32.xlu1 %v1295_v34 }
 0x944   :  { %v1285_v53 = vpop.xlane.xlu0 %1284 }
 0x945   :  { %v1281_v54 = vpop.xlane.xlu1 %1280  ;;  %v1290_v60 = vmul.f32 0.03125, %v1285_v53  ;;  %v4185_v53 = vld [vmem:[%s5234_s14 + $0x38] sm:$0xff]  }
 0x946   :  { %v1288_v56 = vmul.f32 0.03125, %v1281_v54  ;;  %3936 = vmatprep.subr.bf16.mxu0 %v4185_v53  ;;  %v3411_v54 = vld [vmem:[%s5235_s13] ss:$0 sm:$0xff] }
 0x947   :  { %v1310_v6 = vmul.f32 %v1290_v60, %v1290_v60  ;;  %v1318_v35 = vsub.f32 %v4729_v43, %v1290_v60  ;;  %3937 = vmatpush3.bf16.msra.mxu0 %v4185_v53 }
 0x948   :  { %v1283_v55 = vpop.xlane.xlu0 %1282  ;;  %v1308_v61 = vmul.f32 %v1288_v56, %v1288_v56  ;;  %v1316_v19 = vsub.f32 %v4731_v16, %v1288_v56 }
 0x949   :  { %v1287_v57 = vpop.xlane.xlu1 %1286  ;;  %v1289_v58 = vmul.f32 0.03125, %v1283_v55 }
 0x94a   :  { %v1291_v1 = vmul.f32 0.03125, %v1287_v57 }
 0x94b   :  { %v1309_v0 = vmul.f32 %v1289_v58, %v1289_v58  ;;  %v1317_v26 = vsub.f32 %v4736_v33, %v1289_v58 }
 0x94c   :  { %v1297_v59 = vpop.xlane.xlu0 %1296  ;;  %v1311_v22 = vmul.f32 %v1291_v1, %v1291_v1  ;;  %v1319_v38 = vsub.f32 %v4739_v17, %v1291_v1 }
 0x94d   :  { %v1304_v62 = vmul.f32 0.03125, %v1297_v59  ;;  %v1299_v63 = vpop.xlane.xlu1 %1298 }
 0x94e   :  { %v1305_v2 = vmul.f32 0.03125, %v1299_v63 }
 0x94f   :  { %v1312_v3 = vsub.f32 %v1304_v62, %v1308_v61 }
 0x950   :  { %v1313_v4 = vsub.f32 %v1305_v2, %v1309_v0  ;;  %v1301_v5 = vpop.xlane.xlu0 %1300 }
 0x951   :  { %v1320_v7 = vadd.f32 1e-05, %v1312_v3  ;;  %v1306_v8 = vmul.f32 0.03125, %v1301_v5  ;;  %v1303_v21 = vpop.xlane.xlu1 %1302 }
 0x952   :  { %v1321_v9 = vadd.f32 1e-05, %v1313_v4  ;;  %v1307_v10 = vmul.f32 0.03125, %v1303_v21 }
 0x953   :  { %4276 = vrsqrt.f32 %v1320_v7  ;;  %v1314_v11 = vsub.f32 %v1306_v8, %v1310_v6 }
 0x954   :  { %4278 = vrsqrt.f32 %v1321_v9  ;;  %v1315_v12 = vsub.f32 %v1307_v10, %v1311_v22 }
 0x955   :  { %v1322_v13 = vadd.f32 1e-05, %v1314_v11 }
 0x956   :  { %v1323_v15 = vadd.f32 1e-05, %v1315_v12 }
 0x957   :  { %4280 = vrsqrt.f32 %v1322_v13 }
 0x958   :  { %4282 = vrsqrt.f32 %v1323_v15 }
 0x95d   :  { %v4277_v25 = vpop.eup %4276 }
 0x95e   :  { %v4279_v28 = vpop.eup %4278  ;;  %v1328_v29 = vmul.f32 %v4277_v25, %v1316_v19 }
 0x95f   :  { %v1329_v32 = vmul.f32 %v4279_v28, %v1317_v26 }
 0x960   :  { %v1338_v36 = vmul.f32 %v3409_v27, %v1328_v29 }
 0x961   :  { %v4281_v37 = vpop.eup %4280  ;;  %v1339_v39 = vmul.f32 %v3409_v27, %v1329_v32 }
 0x962   :  { %v4283_v40 = vpop.eup %4282  ;;  %v1348_v41 = vadd.f32 %v3410_v30, %v1338_v36  ;;  %v1330_v42 = vmul.f32 %v4281_v37, %v1318_v35 }
 0x963   :  { %v1349_v14 = vadd.f32 %v3410_v30, %v1339_v39  ;;  %v1331_v18 = vmul.f32 %v4283_v40, %v1319_v38 }
 0x964   :  { %v1340_v31 = vmul.f32 %v3409_v27, %v1330_v42 }
 0x965   :  { %v1352_v20 = vpack.c.bf16 %v1349_v14, %v1348_v41  ;;  %v1341_v23 = vmul.f32 %v3409_v27, %v1331_v18 }
 0x966   :  { %v1350_v24 = vadd.f32 %v3410_v30, %v1340_v31 }
 0x967   :  { %3918 = vmatprep.mubr.bf16.mxu1 %v1352_v20  ;;  %v1351_v34 = vadd.f32 %v3410_v30, %v1341_v23  ;;  %v3420_v23 = vld [vmem:[%s5236_s15] ss:$0 sm:$0xff] }
 0x969   :  { %v1353_v44 = vpack.c.bf16 %v1351_v34, %v1350_v24 }
 0x96b   :  { %3919 = vmatmul.mubr.bf16.vlgmr.msra.gmra.mrb[20].mxu1 %v1353_v44 }
 0xa3e   :  { %v3920_v55 = vpop.f32.mrb[20].mxu1 }
 0xa3f   :  { %v1468_v56 = vadd.f32 %v3920_v55, %v3411_v54  ;;  %v1459_v57 = vpop.f32.mrb[21].mxu1  ;;  %v4186_v55 = vld [vmem:[%s5225_s6 + $0xc0] sm:$0xff]  }
 0xa40   :  { %v1460_v58 = vadd.f32 %v3411_v54, %v1459_v57  ;;  %v3921_v59 = vpop.f32.mrb[22].mxu1  ;;  %3942 = vmatprep.subr.bf16.mxu1 %v4186_v55  ;;  %v4188_v57 = vld [vmem:[%s5225_s6 + $0xc8] sm:$0xff]  }
 0xa41   :  { %v1476_v60 = vmul.f32 %v1468_v56, %v1468_v56  ;;  %v1471_v61 = vadd.f32 %v3921_v59, %v3411_v54  ;;  %v1462_v62 = vpop.f32.mrb[23].mxu1  ;;  %3943 = vmatpush3.bf16.msra.mxu1 %v4186_v55  ;;  %v4190_v59 = vld [vmem:[%s5225_s6 + $0xd0] sm:$0xff]  }
 0xa42   :  { %v1474_v63 = vmul.f32 %v1460_v58, %v1460_v58  ;;  %v1463_v0 = vadd.f32 %v3411_v54, %v1462_v62  ;;  %3944 = vmatprep.subr.bf16.mxu1 %v4188_v57  ;;  %v4193_v62 = vld [vmem:[%s5225_s6 + $0x118] sm:$0xff]  }
 0xa43   :  { %v1480_v1 = vmul.f32 %v1476_v60, %v1468_v56  ;;  %v1477_v2 = vmul.f32 %v1471_v61, %v1471_v61  ;;  %v4191_v60 = vld [vmem:[%s5225_s6 + $0x110] sm:$0xff]  }
 0xa44   :  { %v1478_v3 = vmul.f32 %v1474_v63, %v1460_v58  ;;  %v1475_v4 = vmul.f32 %v1463_v0, %v1463_v0  ;;  %v4194_v63 = vld [vmem:[%s5225_s6 + $0xe0] sm:$0xff]  }
 0xa45   :  { %v1484_v5 = vmul.f32 0.044715, %v1480_v1  ;;  %v1481_v6 = vmul.f32 %v1477_v2, %v1471_v61  ;;  %3945 = vmatpush3.bf16.msra.mxu1 %v4188_v57  ;;  %v4196_v1 = vld [vmem:[%s5225_s6 + $0xe8] sm:$0xff]  }
 0xa46   :  { %v1482_v7 = vmul.f32 0.044715, %v1478_v3  ;;  %v1479_v8 = vmul.f32 %v1475_v4, %v1463_v0  ;;  %3946 = vmatprep.subr.bf16.mxu1 %v4190_v59  ;;  %v4197_v2 = vld [vmem:[%s5225_s6 + $0x128] sm:$0xff]   ;;  %v4198_v3 = vld [vmem:[%s5225_s6 + $0xf0] sm:$0xff]  }
 0xa47   :  { %v1488_v21 = vadd.f32 %v1484_v5, %v1468_v56  ;;  %v1485_v22 = vmul.f32 0.044715, %v1481_v6  ;;  %v4199_v4 = vld [vmem:[%s5225_s6 + $0x130] sm:$0xff]   ;;  %v4200_v5 = vld [vmem:[%s5225_s6 + $0xf8] sm:$0xff]  }
 0xa48   :  { %v1486_v9 = vadd.f32 %v1482_v7, %v1460_v58  ;;  %v1483_v10 = vmul.f32 0.044715, %v1479_v8  ;;  %v4201_v6 = vld [vmem:[%s5225_s6 + $0x138] sm:$0xff]   ;;  %v4890_v7 = vld [vmem:[%s5225_s6 + $0x140] sm:$0xff]  }
 0xa49   :  { %v1492_v11 = vmul.f32 0.7978846, %v1488_v21  ;;  %v1489_v12 = vadd.f32 %v1485_v22, %v1471_v61  ;;  %3947 = vmatpush3.bf16.msra.mxu1 %v4190_v59 }
 0xa4a   :  { %v1490_v13 = vmul.f32 0.7978846, %v1486_v9  ;;  %v1487_v15 = vadd.f32 %v1483_v10, %v1463_v0 }
 0xa4b   :  { %4284 = vtanh.f32 %v1492_v11  ;;  %v1493_v19 = vmul.f32 0.7978846, %v1489_v12 }
 0xa4c   :  { %4286 = vtanh.f32 %v1490_v13  ;;  %v1491_v25 = vmul.f32 0.7978846, %v1487_v15 }
 0xa4d   :  { %4288 = vtanh.f32 %v1493_v19 }
 0xa4e   :  { %4290 = vtanh.f32 %v1491_v25 }
 0xa55   :  { %v4285_v26 = vpop.eup %4284 }
 0xa56   :  { %v4287_v27 = vpop.eup %4286  ;;  %v1500_v28 = vadd.f32 1.0, %v4285_v26 }
 0xa57   :  { %v4289_v29 = vpop.eup %4288  ;;  %v1498_v30 = vadd.f32 1.0, %v4287_v27 }
 0xa58   :  { %v4291_v32 = vpop.eup %4290  ;;  %v1504_v35 = vmul.f32 0.5, %v1500_v28  ;;  %v1501_v36 = vadd.f32 1.0, %v4289_v29 }
 0xa59   :  { %v1499_v37 = vadd.f32 1.0, %v4291_v32  ;;  %v1502_v38 = vmul.f32 0.5, %v1498_v30 }
 0xa5a   :  { %v1505_v39 = vmul.f32 0.5, %v1501_v36  ;;  %v1508_v41 = vmul.f32 %v1504_v35, %v1468_v56  ;;  %v4187_v56 = vld [vmem:[%s5225_s6 + $0x100] sm:$0xff]  }
 0xa5b   :  { %v1503_v40 = vmul.f32 0.5, %v1499_v37  ;;  %v1506_v14 = vmul.f32 %v1502_v38, %v1460_v58  ;;  %3962 = vmatprep.subr.bf16.mxu0 %v4187_v56  ;;  %v4189_v58 = vld [vmem:[%s5225_s6 + $0x108] sm:$0xff]  }
 0xa5c   :  { %v1509_v42 = vmul.f32 %v1505_v39, %v1471_v61  ;;  %v4192_v61 = vld [vmem:[%s5225_s6 + $0xd8] sm:$0xff]  }
 0xa5d   :  { %v1507_v18 = vmul.f32 %v1503_v40, %v1463_v0  ;;  %3948 = vmatprep.subr.bf16.mxu1 %v4192_v61  ;;  %v4195_v0 = vld [vmem:[%s5225_s6 + $0x120] sm:$0xff]  }
 0xa5e   :  { %v1511_v31 = vpack.c.bf16 %v1509_v42, %v1508_v41  ;;  %3949 = vmatpush3.bf16.msra.mxu1 %v4192_v61 }
 0xa5f   :  { %v1510_v20 = vpack.c.bf16 %v1507_v18, %v1506_v14  ;;  %3950 = vmatprep.subr.bf16.mxu1 %v4194_v63 }
 0xa61   :  { %3938 = vmatprep.mubr.bf16.mxu0 %v1510_v20 }
 0xa62   :  { %3939 = vmatmul.mubr.bf16.vlgmr.msra.gmra.mrb[32].mxu0 %v1511_v31  ;;  %3951 = vmatpush3.bf16.msra.mxu1 %v4194_v63 }
 0xa63   :  { %3963 = vmatpush3.bf16.msra.mxu0 %v4187_v56  ;;  %3952 = vmatprep.subr.bf16.mxu1 %v4196_v1 }
 0xa64   :  { %3964 = vmatprep.subr.bf16.mxu0 %v4189_v58 }
 0xa66   :  { %3953 = vmatpush3.bf16.msra.mxu1 %v4196_v1  ;;  %v4203_v1 = vld [vmem:[%s5225_s6 + $0x148] sm:$0xff]  }
 0xa67   :  { %3965 = vmatpush3.bf16.msra.mxu0 %v4189_v58  ;;  %3954 = vmatprep.subr.bf16.mxu1 %v4198_v3 }
 0xa68   :  { %3966 = vmatprep.subr.bf16.mxu0 %v4191_v60 }
 0xa6a   :  { %3955 = vmatpush3.bf16.msra.mxu1 %v4198_v3  ;;  %v4205_v3 = vld [vmem:[%s5225_s6 + $0x158] sm:$0xff]  }
 0xa6b   :  { %3967 = vmatpush3.bf16.msra.mxu0 %v4191_v60  ;;  %3956 = vmatprep.subr.bf16.mxu1 %v4200_v5 }
 0xa6c   :  { %3968 = vmatprep.subr.bf16.mxu0 %v4193_v62 }
 0xa6e   :  { %3957 = vmatpush3.bf16.msra.mxu1 %v4200_v5  ;;  %v4207_v5 = vld [vmem:[%s5225_s6 + $0x168] sm:$0xff]  }
 0xa6f   :  { %3969 = vmatpush3.bf16.msra.mxu0 %v4193_v62  ;;  %3982 = vmatprep.subr.bf16.mxu1 %v4890_v7 }
 0xa70   :  { %3970 = vmatprep.subr.bf16.mxu0 %v4195_v0 }
 0xa73   :  { %3971 = vmatpush3.bf16.msra.mxu0 %v4195_v0 }
 0xa74   :  { %3972 = vmatprep.subr.bf16.mxu0 %v4197_v2 }
 0xa77   :  { %3973 = vmatpush3.bf16.msra.mxu0 %v4197_v2  ;;  %v4204_v2 = vld [vmem:[%s5225_s6 + $0x150] sm:$0xff]  }
 0xa78   :  { %3974 = vmatprep.subr.bf16.mxu0 %v4199_v4 }
 0xa7b   :  { %3975 = vmatpush3.bf16.msra.mxu0 %v4199_v4  ;;  %v4206_v4 = vld [vmem:[%s5225_s6 + $0x160] sm:$0xff]  }
 0xa7c   :  { %3976 = vmatprep.subr.bf16.mxu0 %v4201_v6 }
 0xa7f   :  { %3977 = vmatpush3.bf16.msra.mxu0 %v4201_v6  ;;  %v4208_v6 = vld [vmem:[%s5225_s6 + $0x170] sm:$0xff]  }
 0xa80   :  { %4002 = vmatprep.subr.bf16.mxu0 %v4356_v45 }
 0xb35   :  { %v3940_v24 = vpop.f32.mrb[32].mxu0 }
 0xb36   :  { %v1626_v34 = vadd.f32 %v3940_v24, %v3420_v23  ;;  %v1617_v44 = vpop.f32.mrb[33].mxu0  ;;  %v3431_v24 = vld [vmem:[%s5226_s4 + $0x1] ss:$0 sm:$0xff] }
 0xb37   :  { %v3941_v46 = vpop.f32.mrb[34].mxu0  ;;  %v1618_v48 = vadd.f32 %v3420_v23, %v1617_v44 }
 0xb38   :  { %v4816_v47 = vadd.f32 %v1626_v34, %v4729_v43  ;;  %v1629_v49 = vadd.f32 %v3941_v46, %v3420_v23  ;;  %v1620_v50 = vpop.f32.mrb[35].mxu0 }
 0xb39   :  { %v1621_v52 = vadd.f32 %v3420_v23, %v1620_v50  ;;  %v4823_v53 = vadd.f32 %v1618_v48, %v4731_v16 }
 0xb3a   :  { %v4819_v51 = vadd.f32 %v1629_v49, %v4739_v17  ;;  %1644 = vadd.xlane.f32.xlu0 %v4816_v47  ;;  %v1654_v16 = vmul.f32 %v4816_v47, %v4816_v47 }
 0xb3b   :  { %v4827_v54 = vadd.f32 %v1621_v52, %v4736_v33  ;;  %v1652_v43 = vmul.f32 %v4823_v53, %v4823_v53 }
 0xb3c   :  { %1646 = vadd.xlane.f32.xlu1 %v4819_v51  ;;  %v1655_v33 = vmul.f32 %v4819_v51, %v4819_v51 }
 0xb3d   :  { %v1653_v17 = vmul.f32 %v4827_v54, %v4827_v54 }
 0xb3e   :  { %1640 = vadd.xlane.f32.xlu0 %v4823_v53 }
 0xb40   :  { %1642 = vadd.xlane.f32.xlu1 %v4827_v54 }
 0xb42   :  { %1656 = vadd.xlane.f32.xlu0 %v1652_v43  ;;  %v3432_v43 = vld [vmem:[%s5227_s5 + $0x1] ss:$0 sm:$0xff] }
 0xb44   :  { %1658 = vadd.xlane.f32.xlu1 %v1653_v17 }
 0xb46   :  { %1660 = vadd.xlane.f32.xlu0 %v1654_v16 }
 0xb48   :  { %1662 = vadd.xlane.f32.xlu1 %v1655_v33 }
 0xbc7   :  { %v1645_v8 = vpop.xlane.xlu0 %1644 }
 0xbc8   :  { %v1650_v13 = vmul.f32 0.03125, %v1645_v8  ;;  %v3450_v8 = vld [vmem:[%s5228_s7 + $0x3] ss:$0 sm:$0xff] }
 0xbc9   :  { %v1647_v21 = vpop.xlane.xlu1 %1646 }
 0xbca   :  { %v1651_v25 = vmul.f32 0.03125, %v1647_v21  ;;  %v1670_v32 = vmul.f32 %v1650_v13, %v1650_v13  ;;  %v1678_v48 = vsub.f32 %v4816_v47, %v1650_v13 }
 0xbcb   :  { %v1641_v22 = vpop.xlane.xlu0 %1640 }
 0xbcc   :  { %v1648_v9 = vmul.f32 0.03125, %v1641_v22  ;;  %v1671_v38 = vmul.f32 %v1651_v25, %v1651_v25  ;;  %v1679_v17 = vsub.f32 %v4819_v51, %v1651_v25 }
 0xbcd   :  { %v1643_v10 = vpop.xlane.xlu1 %1642 }
 0xbce   :  { %v1649_v11 = vmul.f32 0.03125, %v1643_v10  ;;  %v1668_v15 = vmul.f32 %v1648_v9, %v1648_v9  ;;  %v1676_v20 = vsub.f32 %v4823_v53, %v1648_v9  ;;  %v3476_v9 = vld [vmem:[%s5228_s7 + $0x4] ss:$0 sm:$0xff] }
 0xbcf   :  { %v1657_v12 = vpop.xlane.xlu0 %1656 }
 0xbd0   :  { %v1664_v19 = vmul.f32 0.03125, %v1657_v12  ;;  %v1669_v27 = vmul.f32 %v1649_v11, %v1649_v11  ;;  %v1677_v34 = vsub.f32 %v4827_v54, %v1649_v11 }
 0xbd1   :  { %v1659_v26 = vpop.xlane.xlu1 %1658 }
 0xbd2   :  { %v1672_v28 = vsub.f32 %v1664_v19, %v1668_v15  ;;  %v1665_v29 = vmul.f32 0.03125, %v1659_v26 }
 0xbd3   :  { %v1661_v30 = vpop.xlane.xlu0 %1660 }
 0xbd4   :  { %v1680_v35 = vadd.f32 1e-05, %v1672_v28  ;;  %v1673_v36 = vsub.f32 %v1665_v29, %v1669_v27  ;;  %v1666_v37 = vmul.f32 0.03125, %v1661_v30 }
 0xbd5   :  { %v1663_v39 = vpop.xlane.xlu1 %1662 }
 0xbd6   :  { %4292 = vrsqrt.f32 %v1680_v35  ;;  %v1681_v40 = vadd.f32 1e-05, %v1673_v36  ;;  %v1674_v41 = vsub.f32 %v1666_v37, %v1670_v32  ;;  %v1667_v42 = vmul.f32 0.03125, %v1663_v39 }
 0xbd8   :  { %4294 = vrsqrt.f32 %v1681_v40  ;;  %v1682_v14 = vadd.f32 1e-05, %v1674_v41  ;;  %v1675_v18 = vsub.f32 %v1667_v42, %v1671_v38 }
 0xbda   :  { %4296 = vrsqrt.f32 %v1682_v14  ;;  %v1683_v31 = vadd.f32 1e-05, %v1675_v18 }
 0xbdc   :  { %4298 = vrsqrt.f32 %v1683_v31 }
 0xbe0   :  { %v4293_v23 = vpop.eup %4292 }
 0xbe1   :  { %v1688_v44 = vmul.f32 %v4293_v23, %v1676_v20  ;;  %v3502_v23 = vld [vmem:[%s5228_s7 + $0x5] ss:$0 sm:$0xff] }
 0xbe2   :  { %v4295_v46 = vpop.eup %4294 }
 0xbe3   :  { %v1689_v49 = vmul.f32 %v4295_v46, %v1677_v34  ;;  %v1698_v50 = vmul.f32 %v3431_v24, %v1688_v44 }
 0xbe4   :  { %v4297_v52 = vpop.eup %4296 }
 0xbe5   :  { %v1699_v16 = vmul.f32 %v3431_v24, %v1689_v49  ;;  %v1690_v33 = vmul.f32 %v4297_v52, %v1678_v48  ;;  %v1708_v56 = vadd.f32 %v3432_v43, %v1698_v50 }
 0xbe6   :  { %v4299_v55 = vpop.eup %4298 }
 0xbe7   :  { %v1709_v57 = vadd.f32 %v3432_v43, %v1699_v16  ;;  %v1691_v58 = vmul.f32 %v4299_v55, %v1679_v17  ;;  %v1700_v59 = vmul.f32 %v3431_v24, %v1690_v33 }
 0xbe9   :  { %v1712_v60 = vpack.c.bf16 %v1709_v57, %v1708_v56  ;;  %v1701_v61 = vmul.f32 %v3431_v24, %v1691_v58  ;;  %v1710_v62 = vadd.f32 %v3432_v43, %v1700_v59 }
 0xbeb   :  { %3958 = vmatprep.mubr.bf16.mxu1 %v1712_v60  ;;  %3978 = vmatprep.mubr.bf16.mxu0 %v1712_v60  ;;  %v1711_v63 = vadd.f32 %v3432_v43, %v1701_v61 }
 0xbed   :  { %v1713_v0 = vpack.c.bf16 %v1711_v63, %v1710_v62 }
 0xbef   :  { %3959 = vmatmul.mubr.bf16.vlgmr.msra.gmra.mrb[24].mxu1 %v1713_v0  ;;  %3979 = vmatmul.mubr.bf16.vlgmr.msra.gmra.mrb[36].mxu0 %v1713_v0 }
 0xbf0   :  { %3983 = vmatpush3.bf16.msra.mxu1 %v4890_v7  ;;  %3998 = vmatprep.mubr.bf16.mxu1 %v1712_v60  ;;  %v4209_v7 = vld [vmem:[%s5225_s6 + $0x178] sm:$0xff]  }
 0xbf1   :  { %3984 = vmatprep.subr.bf16.mxu1 %v4203_v1  ;;  %4004 = vmatprep.mubr.msk.bf16.mxu0 %vm4357_vm0, %v4356_v45 }
 0xbf4   :  { %3985 = vmatpush3.bf16.msra.mxu1 %v4203_v1 }
 0xbf5   :  { %3986 = vmatprep.subr.bf16.mxu1 %v4204_v2 }
 0xbf8   :  { %3987 = vmatpush3.bf16.msra.mxu1 %v4204_v2 }
 0xbf9   :  { %3988 = vmatprep.subr.bf16.mxu1 %v4205_v3 }
 0xbfc   :  { %3989 = vmatpush3.bf16.msra.mxu1 %v4205_v3 }
 0xbfd   :  { %3990 = vmatprep.subr.bf16.mxu1 %v4206_v4 }
 0xc00   :  { %3991 = vmatpush3.bf16.msra.mxu1 %v4206_v4 }
 0xc01   :  { %3992 = vmatprep.subr.bf16.mxu1 %v4207_v5 }
 0xc04   :  { %3993 = vmatpush3.bf16.msra.mxu1 %v4207_v5 }
 0xc05   :  { %3994 = vmatprep.subr.bf16.mxu1 %v4208_v6 }
 0xc08   :  { %3995 = vmatpush3.bf16.msra.mxu1 %v4208_v6 }
 0xc09   :  { %3996 = vmatprep.subr.bf16.mxu1 %v4209_v7 }
 0xc0c   :  { %3997 = vmatpush3.bf16.msra.mxu1 %v4209_v7 }
 0xc0d   :  { %4020 = vmatprep.subr.bf16.mxu1 %v4356_v45 }
 0xc0f   :  { %3999 = vmatmul.mubr.bf16.vlgmr.msra.gmra.mrb[28].mxu1 %v1713_v0 }
 0xc10   :  { %4022 = vmatprep.mubr.msk.bf16.mxu1 %vm4357_vm0, %v4356_v45 }
 0xcc2   :  { %v3960_v21 = vpop.f32.mrb[24].mxu1  ;;  %v3980_v22 = vpop.f32.mrb[36].mxu0 }
 0xcc3   :  { %v1830_v10 = vadd.f32 %v3960_v21, %v3450_v8  ;;  %v1821_v11 = vpop.f32.mrb[25].mxu1  ;;  %v1943_v12 = vpop.f32.mrb[37].mxu0  ;;  %v1952_v25 = vadd.f32 %v3980_v22, %v3476_v9 }
 0xcc4   :  { %v1822_v13 = vadd.f32 %v3450_v8, %v1821_v11  ;;  %v3961_v15 = vpop.f32.mrb[26].mxu1  ;;  %v3981_v19 = vpop.f32.mrb[38].mxu0  ;;  %v1944_v30 = vadd.f32 %v3476_v9, %v1943_v12 }
 0xcc5   :  { %v1833_v26 = vadd.f32 %v3961_v15, %v3450_v8  ;;  %v1955_v27 = vadd.f32 %v3981_v19, %v3476_v9  ;;  %v1824_v28 = vpop.f32.mrb[27].mxu1  ;;  %v1946_v29 = vpop.f32.mrb[39].mxu0  ;;  %v2082_v36 = vmul.f32 0.25, %v1830_v10 }
 0xcc6   :  { %v1825_v32 = vadd.f32 %v3450_v8, %v1824_v28  ;;  %v1947_v35 = vadd.f32 %v3476_v9, %v1946_v29  ;;  %v2080_v39 = vmul.f32 0.25, %v1822_v13 }
 0xcc7   :  { %v2083_v37 = vmul.f32 0.25, %v1833_v26  ;;  %v4937_v38 = vpack.c.bf16 %v1955_v27, %v1952_v25 }
 0xcc8   :  { %v2081_v40 = vmul.f32 0.25, %v1825_v32  ;;  %v4939_v41 = vpack.c.bf16 %v1947_v35, %v1944_v30 }
 0xcc9   :  { %v4941_v42 = vpack.c.bf16 %v2083_v37, %v2082_v36  ;;  %v2141_v31 = vsel %vm655_vm1, %v4937_v38, 0 }
 0xcca   :  { %v4943_v14 = vpack.c.bf16 %v2081_v40, %v2080_v39  ;;  %v2094_v18 = vsel %vm655_vm1, %v4939_v41, 0 }
 0xccb   :  { %4003 = vmatpush3.bf16.xpose.msra.mxu0 %v2094_v18 }
 0xccc   :  { %4008 = vmatprep.subr.bf16.mxu0 %v4356_v45 }
 0xcd2   :  { %4005 = vmatmul.mubr.msk.bf16.vlgmr.msra.gmra.mrb[40].mxu0 %vm655_vm1, %v4943_v14 }
 0xcd3   :  { %4009 = vmatpush3.bf16.xpose.msra.mxu0 %v2141_v31  ;;  %4010 = vmatprep.mubr.msk.bf16.mxu0 %vm4357_vm0, %v4356_v45 }
 0xcd4   :  { %4014 = vmatprep.subr.bf16.mxu0 %v4356_v45 }
 0xcda   :  { %4011 = vmatmul.mubr.msk.bf16.vlgmr.msra.gmra.mrb[44].mxu0 %vm655_vm1, %v4941_v42 }
 0xcdb   :  { %4016 = vmatprep.mubr.msk.bf16.mxu0 %vm4357_vm0, %v4356_v45 }
 0xce2   :  { %v4000_v20 = vpop.f32.mrb[28].mxu1 }
 0xce3   :  { %v2065_v24 = vpop.f32.mrb[29].mxu1  ;;  %v2074_v44 = vadd.f32 %v4000_v20, %v3502_v23 }
 0xce4   :  { %v4001_v34 = vpop.f32.mrb[30].mxu1  ;;  %v2066_v49 = vadd.f32 %v3502_v23, %v2065_v24 }
 0xce5   :  { %v2077_v46 = vadd.f32 %v4001_v34, %v3502_v23  ;;  %v2068_v48 = vpop.f32.mrb[31].mxu1 }
 0xce6   :  { %v2069_v50 = vadd.f32 %v3502_v23, %v2068_v48 }
 0xce7   :  { %v4962_v52 = vpack.c.bf16 %v2077_v46, %v2074_v44 }
 0xce8   :  { %v4964_v43 = vpack.c.bf16 %v2069_v50, %v2066_v49 }
 0xce9   :  { %4021 = vmatpush3.bf16.msra.mxu1 %v4962_v52 }
 0xcea   :  { %4015 = vmatpush3.bf16.msra.mxu0 %v4964_v43  ;;  %4032 = vmatprep.subr.bf16.mxu1 %v4356_v45 }
 0xceb   :  { %4026 = vmatprep.subr.bf16.mxu0 %v4356_v45 }
 0xda5   :  { %v2130_v17 = vpop.f32.mrb[40].mxu0 }
 0xda6   :  { %v4006_v16 = vpop.f32.mrb[41].mxu0  ;;  %v2184_v33 = vsel %vm655_vm1, %v2130_v17, -inf }
 0xda7   :  { %2185 = vmax.xlane.f32.xlu0 %v2184_v33  ;;  %v2133_v55 = vpop.f32.mrb[42].mxu0 }
 0xda8   :  { %v4007_v56 = vpop.f32.mrb[43].mxu0  ;;  %v2187_v57 = vsel %vm655_vm1, %v2133_v55, -inf }
 0xda9   :  { %2188 = vmax.xlane.f32.xlu1 %v2187_v57 }
 0xdad   :  { %v2177_v58 = vpop.f32.mrb[44].mxu0 }
 0xdae   :  { %v4012_v59 = vpop.f32.mrb[45].mxu0  ;;  %v2190_v60 = vsel %vm655_vm1, %v2177_v58, -inf }
 0xdaf   :  { %2191 = vmax.xlane.f32.xlu0 %v2190_v60  ;;  %v2180_v61 = vpop.f32.mrb[46].mxu0 }
 0xdb0   :  { %v4013_v62 = vpop.f32.mrb[47].mxu0  ;;  %v2193_v63 = vsel %vm655_vm1, %v2180_v61, -inf }
 0xdb1   :  { %2194 = vmax.xlane.f32.xlu1 %v2193_v63 }
 0xe34   :  { %v2186_v0 = vpop.xlane.xlu0 %2185 }
 0xe35   :  { %v2196_v1 = vsub.f32 %v2130_v17, %v2186_v0 }
 0xe36   :  { %v2189_v2 = vpop.xlane.xlu1 %2188 }
 0xe37   :  { %v2200_v3 = vmul.f32 1.442695, %v2196_v1  ;;  %v2197_v4 = vsub.f32 %v2133_v55, %v2189_v2 }
 0xe39   :  { %4300 = vpow2.f32 %v2200_v3  ;;  %v2202_v5 = vmul.f32 1.442695, %v2197_v4 }
 0xe3b   :  { %4302 = vpow2.f32 %v2202_v5 }
 0xe3c   :  { %v2192_v6 = vpop.xlane.xlu0 %2191 }
 0xe3d   :  { %v2198_v7 = vsub.f32 %v2177_v58, %v2192_v6 }
 0xe3e   :  { %v2195_v13 = vpop.xlane.xlu1 %2194 }
 0xe3f   :  { %v2204_v8 = vmul.f32 1.442695, %v2198_v7  ;;  %v2199_v15 = vsub.f32 %v2180_v61, %v2195_v13 }
 0xe41   :  { %4304 = vpow2.f32 %v2204_v8  ;;  %v2206_v19 = vmul.f32 1.442695, %v2199_v15 }
 0xe43   :  { %v4301_v21 = vpop.eup %4300  ;;  %4306 = vpow2.f32 %v2206_v19 }
 0xe44   :  { %v2208_v22 = vsel %vm655_vm1, %v4301_v21, 0.0 }
 0xe45   :  { %v4303_v9 = vpop.eup %4302  ;;  %2209 = vadd.xlane.f32.xlu0 %v2208_v22 }
 0xe46   :  { %v2211_v10 = vsel %vm655_vm1, %v4303_v9, 0.0 }
 0xe47   :  { %2212 = vadd.xlane.f32.xlu1 %v2211_v10 }
 0xe4b   :  { %v4305_v11 = vpop.eup %4304 }
 0xe4c   :  { %v2214_v12 = vsel %vm655_vm1, %v4305_v11, 0.0 }
 0xe4d   :  { %2215 = vadd.xlane.f32.xlu0 %v2214_v12  ;;  %v4307_v25 = vpop.eup %4306 }
 0xe4e   :  { %v2217_v26 = vsel %vm655_vm1, %v4307_v25, 0.0 }
 0xe58   :  { %2380 = vrot.lane.b32.xlu1 %v4937_v38, %s4358_s20 }
 0xe63   :  { %2327 = vrot.lane.b32.xlu0 %v4939_v41, %s4358_s20 }
 0xe7c   :  { %2218 = vadd.xlane.f32.xlu1 %v2217_v26 }
 0xe8d   :  { %2324 = vrot.lane.b32.xlu1 %v4943_v14, %s4358_s20 }
 0xe91   :  { %2377 = vrot.lane.b32.xlu1 %v4941_v42, %s4358_s20 }
 0xed2   :  { %v2210_v27 = vpop.xlane.xlu0 %2209 }
 0xed3   :  { %4308 = vrcp.f32 %v2210_v27 }
 0xed4   :  { %v2213_v28 = vpop.xlane.xlu1 %2212 }
 0xed5   :  { %4310 = vrcp.f32 %v2213_v28 }
 0xed8   :  { %v2381_v40 = vpop.permute.xlu1 %2380 }
 0xed9   :  { %v2386_v24 = vsel %vm655_vm1, %v2381_v40, 0 }
 0xeda   :  { %v2216_v29 = vpop.xlane.xlu0 %2215 }
 0xedb   :  { %4312 = vrcp.f32 %v2216_v29 }
 0xedd   :  { %v4309_v30 = vpop.eup %4308 }
 0xede   :  { %v2224_v35 = vmul.f32 %v4309_v30, %v4301_v21  ;;  %v2328_v37 = vpop.permute.xlu0 %2327 }
 0xedf   :  { %v4311_v32 = vpop.eup %4310  ;;  %v2333_v39 = vsel %vm655_vm1, %v2328_v37, 0 }
 0xee0   :  { %v2225_v36 = vmul.f32 %v4311_v32, %v4303_v9 }
 0xee2   :  { %v2228_v38 = vpack.c.bf16 %v2225_v36, %v2224_v35 }
 0xee4   :  { %4017 = vmatmul.mubr.msk.bf16.vlgmr.msra.gmra.mrb[48].mxu0 %vm655_vm1, %v2228_v38 }
 0xee5   :  { %4027 = vmatpush3.bf16.xpose.msra.mxu0 %v2333_v39  ;;  %4028 = vmatprep.mubr.msk.bf16.mxu0 %vm4357_vm0, %v4356_v45  ;;  %v4313_v14 = vpop.eup %4312 }
 0xee6   :  { %4038 = vmatprep.subr.bf16.mxu0 %v4356_v45  ;;  %v2226_v31 = vmul.f32 %v4313_v14, %v4305_v11 }
 0xf09   :  { %v2219_v41 = vpop.xlane.xlu1 %2218 }
 0xf0a   :  { %4314 = vrcp.f32 %v2219_v41 }
 0xf0d   :  { %v2325_v42 = vpop.permute.xlu1 %2324 }
 0xf0e   :  { %4029 = vmatmul.mubr.msk.bf16.vlgmr.msra.gmra.mrb[52].mxu0 %vm655_vm1, %v2325_v42 }
 0xf0f   :  { %4040 = vmatprep.mubr.msk.bf16.mxu0 %vm4357_vm0, %v4356_v45 }
 0xf11   :  { %v2378_v34 = vpop.permute.xlu1 %2377 }
 0xf14   :  { %v4315_v18 = vpop.eup %4314 }
 0xf15   :  { %v2227_v20 = vmul.f32 %v4315_v18, %v4307_v25 }
 0xf17   :  { %v2229_v23 = vpack.c.bf16 %v2227_v20, %v2226_v31 }
 0xf19   :  { %4023 = vmatmul.mubr.msk.bf16.vlgmr.msra.gmra.mrb[32].mxu1 %vm655_vm1, %v2229_v23 }
 0xf1a   :  { %4033 = vmatpush3.bf16.xpose.msra.mxu1 %v2386_v24  ;;  %4034 = vmatprep.mubr.msk.bf16.mxu1 %vm4357_vm0, %v4356_v45 }
 0xf1b   :  { %4044 = vmatprep.subr.bf16.mxu1 %v4356_v45 }
 0xf21   :  { %4035 = vmatmul.mubr.msk.bf16.vlgmr.msra.gmra.mrb[36].mxu1 %vm655_vm1, %v2378_v34  ;;  %v4210_v34 = vld [vmem:[%s5229_s8 + $0x18] sm:$0xff]  }
 0xf22   :  { %4046 = vmatprep.mubr.msk.bf16.mxu1 %vm4357_vm0, %v4356_v45 }
 0xfb7   :  { %v5002_v44 = vpop.f32.mrb[48].mxu0 }
 0xfb8   :  { %v4018_v46 = vpop.f32.mrb[49].mxu0 }
 0xfb9   :  { %v5004_v48 = vpop.f32.mrb[50].mxu0  ;;  %v4211_v46 = vld [vmem:[%s5229_s8 + $0x10] sm:$0xff]  }
 0xfba   :  { %v2318_v49 = vpack.c.bf16 %v5004_v48, %v5002_v44  ;;  %v4019_v50 = vpop.f32.mrb[51].mxu0 }
 0xfe1   :  { %v2369_v17 = vpop.f32.mrb[52].mxu0 }
 0xfe2   :  { %v4030_v16 = vpop.f32.mrb[53].mxu0  ;;  %v2429_v33 = vsel %vm655_vm1, %v2369_v17, -inf }
 0xfe3   :  { %2430 = vmax.xlane.f32.xlu0 %v2429_v33  ;;  %v2372_v55 = vpop.f32.mrb[54].mxu0 }
 0xfe4   :  { %v4031_v56 = vpop.f32.mrb[55].mxu0  ;;  %v2432_v57 = vsel %vm655_vm1, %v2372_v55, -inf }
 0xfe5   :  { %2433 = vmax.xlane.f32.xlu1 %v2432_v57 }
 0xfec   :  { %v5010_v58 = vpop.f32.mrb[32].mxu1 }
 0xfed   :  { %v4024_v59 = vpop.f32.mrb[33].mxu1 }
 0xfee   :  { %v5012_v60 = vpop.f32.mrb[34].mxu1 }
 0xfef   :  { %v2319_v61 = vpack.c.bf16 %v5012_v60, %v5010_v58  ;;  %v4025_v62 = vpop.f32.mrb[35].mxu1 }
 0xff4   :  { %v2422_v63 = vpop.f32.mrb[36].mxu1 }
 0xff5   :  { %v4036_v0 = vpop.f32.mrb[37].mxu1  ;;  %v2435_v1 = vsel %vm655_vm1, %v2422_v63, -inf }
 0xff6   :  { %v2425_v2 = vpop.f32.mrb[38].mxu1  ;;  %2436 = vmax.xlane.f32.xlu0 %v2435_v1  ;;  %v3530_v1 = vld [vmem:[%s5230_s9 + $0x1] ss:$0 sm:$0xff] }
 0xff7   :  { %v4037_v3 = vpop.f32.mrb[39].mxu1  ;;  %v2438_v4 = vsel %vm655_vm1, %v2425_v2, -inf }
 0xffa   :  { %2439 = vmax.xlane.f32.xlu0 %v2438_v4 }
0x1070   :  { %v2431_v5 = vpop.xlane.xlu0 %2430 }
0x1071   :  { %v2441_v6 = vsub.f32 %v2369_v17, %v2431_v5 }
0x1072   :  { %v2434_v7 = vpop.xlane.xlu1 %2433 }
0x1073   :  { %v2445_v8 = vmul.f32 1.442695, %v2441_v6  ;;  %v2442_v21 = vsub.f32 %v2372_v55, %v2434_v7  ;;  %v4212_v7 = vld [vmem:[%s5231_s12 + $0x40] sm:$0xff]  }
0x1075   :  { %4316 = vpow2.f32 %v2445_v8  ;;  %v2447_v22 = vmul.f32 1.442695, %v2442_v21  ;;  %v4213_v8 = vld [vmem:[%s5231_s12 + $0x48] sm:$0xff]   ;;  %v4214_v21 = vld [vmem:[%s5231_s12 + $0x50] sm:$0xff]  }
0x1077   :  { %4318 = vpow2.f32 %v2447_v22  ;;  %v4215_v22 = vld [vmem:[%s5231_s12 + $0x58] sm:$0xff]  }
0x107f   :  { %v4317_v9 = vpop.eup %4316 }
0x1080   :  { %v2453_v10 = vsel %vm655_vm1, %v4317_v9, 0.0 }
0x1081   :  { %v4319_v11 = vpop.eup %4318  ;;  %2454 = vadd.xlane.f32.xlu0 %v2453_v10  ;;  %v4217_v10 = vld [vmem:[%s5231_s12 + $0x68] sm:$0xff]  }
0x1082   :  { %v2456_v12 = vsel %vm655_vm1, %v4319_v11, 0.0 }
0x1083   :  { %v2437_v13 = vpop.xlane.xlu0 %2436  ;;  %2457 = vadd.xlane.f32.xlu1 %v2456_v12  ;;  %v4219_v12 = vld [vmem:[%s5231_s12 + $0x78] sm:$0xff]  }
0x1084   :  { %v2443_v15 = vsub.f32 %v2422_v63, %v2437_v13 }
0x1086   :  { %v2449_v19 = vmul.f32 1.442695, %v2443_v15 }
0x1087   :  { %v2440_v25 = vpop.xlane.xlu0 %2439 }
0x1088   :  { %4320 = vpow2.f32 %v2449_v19  ;;  %v2444_v26 = vsub.f32 %v2425_v2, %v2440_v25 }
0x108a   :  { %v2451_v27 = vmul.f32 1.442695, %v2444_v26 }
0x108c   :  { %4322 = vpow2.f32 %v2451_v27 }
0x1092   :  { %v4321_v28 = vpop.eup %4320 }
0x1093   :  { %v2459_v29 = vsel %vm655_vm1, %v4321_v28, 0.0 }
0x1094   :  { %2460 = vadd.xlane.f32.xlu0 %v2459_v29 }
0x1096   :  { %v4323_v30 = vpop.eup %4322 }
0x1097   :  { %v2462_v32 = vsel %vm655_vm1, %v4323_v30, 0.0 }
0x1098   :  { %2463 = vadd.xlane.f32.xlu1 %v2462_v32 }
0x10a9   :  { %2524 = vrot.lane.b32.xlu1 %v4962_v52, %s4358_s20 }
0x10aa   :  { %2476 = vrot.lane.b32.xlu0 %v4964_v43, %s4358_s20 }
0x110e   :  { %v2455_v36 = vpop.xlane.xlu0 %2454 }
0x1110   :  { %v2458_v35 = vpop.xlane.xlu1 %2457 }
0x1111   :  { %4324 = vrcp.f32 %v2458_v35 }
0x1112   :  { %4326 = vrcp.f32 %v2455_v36 }
0x111b   :  { %v4325_v37 = vpop.eup %4324 }
0x111c   :  { %v4327_v39 = vpop.eup %4326  ;;  %v2470_v40 = vmul.f32 %v4325_v37, %v4319_v11  ;;  %v4218_v11 = vld [vmem:[%s5231_s12 + $0x70] sm:$0xff]  }
0x111d   :  { %v2469_v41 = vmul.f32 %v4327_v39, %v4317_v9  ;;  %v4216_v9 = vld [vmem:[%s5231_s12 + $0x60] sm:$0xff]  }
0x111f   :  { %v2473_v18 = vpack.c.bf16 %v2470_v40, %v2469_v41 }
0x1121   :  { %v2461_v38 = vpop.xlane.xlu0 %2460 }
0x1122   :  { %4328 = vrcp.f32 %v2461_v38 }
0x1125   :  { %v2477_v42 = vpop.permute.xlu0 %2476  ;;  %v2464_v14 = vpop.xlane.xlu1 %2463 }
0x1126   :  { %4330 = vrcp.f32 %v2464_v14  ;;  %4039 = vmatpush3.bf16.msra.mxu0 %v2477_v42 }
0x1127   :  { %4050 = vmatprep.subr.bf16.mxu0 %v4210_v34 }
0x1129   :  { %4041 = vmatmul.mubr.msk.bf16.vlgmr.msra.gmra.mrb[56].mxu0 %vm655_vm1, %v2473_v18  ;;  %v2525_v52 = vpop.permute.xlu1 %2524 }
0x112a   :  { %4045 = vmatpush3.bf16.msra.mxu1 %v2525_v52  ;;  %4051 = vmatpush3.bf16.msra.mxu0 %v4210_v34 }
0x112b   :  { %4056 = vmatprep.subr.bf16.mxu0 %v4211_v46  ;;  %4062 = vmatprep.subr.bf16.mxu1 %v4212_v7 }
0x112c   :  { %v4329_v43 = vpop.eup %4328 }
0x112d   :  { %v2471_v20 = vmul.f32 %v4329_v43, %v4321_v28 }
0x1130   :  { %v4331_v31 = vpop.eup %4330 }
0x1131   :  { %v2472_v23 = vmul.f32 %v4331_v31, %v4323_v30 }
0x1133   :  { %v2474_v24 = vpack.c.bf16 %v2472_v23, %v2471_v20 }
0x1135   :  { %4047 = vmatmul.mubr.msk.bf16.vlgmr.msra.gmra.mrb[40].mxu1 %vm655_vm1, %v2474_v24 }
0x1136   :  { %4063 = vmatpush3.bf16.msra.mxu1 %v4212_v7 }
0x1137   :  { %4064 = vmatprep.subr.bf16.mxu1 %v4213_v8 }
0x113a   :  { %4065 = vmatpush3.bf16.msra.mxu1 %v4213_v8  ;;  %v4220_v8 = vld [vmem:[%s5234_s14 + $0x40] sm:$0xff]  }
0x113b   :  { %4066 = vmatprep.subr.bf16.mxu1 %v4214_v21 }
0x113e   :  { %4067 = vmatpush3.bf16.msra.mxu1 %v4214_v21  ;;  %v4221_v21 = vld [vmem:[%s5234_s14 + $0x48] sm:$0xff]  }
0x113f   :  { %4068 = vmatprep.subr.bf16.mxu1 %v4215_v22 }
0x1142   :  { %4069 = vmatpush3.bf16.msra.mxu1 %v4215_v22  ;;  %v4222_v22 = vld [vmem:[%s5234_s14 + $0x50] sm:$0xff]  }
0x1143   :  { %4070 = vmatprep.subr.bf16.mxu1 %v4216_v9 }
0x1146   :  { %4071 = vmatpush3.bf16.msra.mxu1 %v4216_v9  ;;  %v4223_v9 = vld [vmem:[%s5234_s14 + $0x58] sm:$0xff]  }
0x1147   :  { %4072 = vmatprep.subr.bf16.mxu1 %v4217_v10 }
0x114a   :  { %4073 = vmatpush3.bf16.msra.mxu1 %v4217_v10  ;;  %v4224_v10 = vld [vmem:[%s5234_s14 + $0x60] sm:$0xff]  }
0x114b   :  { %4074 = vmatprep.subr.bf16.mxu1 %v4218_v11 }
0x114e   :  { %4075 = vmatpush3.bf16.msra.mxu1 %v4218_v11  ;;  %v4225_v11 = vld [vmem:[%s5234_s14 + $0x68] sm:$0xff]  }
0x114f   :  { %4076 = vmatprep.subr.bf16.mxu1 %v4219_v12 }
0x1152   :  { %4077 = vmatpush3.bf16.msra.mxu1 %v4219_v12  ;;  %v4226_v12 = vld [vmem:[%s5234_s14 + $0x70] sm:$0xff]  }
0x1153   :  { %4102 = vmatprep.subr.bf16.mxu1 %v4356_v45 }
0x11fc   :  { %v2516_v50 = vpop.f32.mrb[56].mxu0 }
0x11fd   :  { %v4042_v17 = vpop.f32.mrb[57].mxu0 }
0x11fe   :  { %v2519_v16 = vpop.f32.mrb[58].mxu0 }
0x11ff   :  { %v2571_v33 = vpack.c.bf16 %v2519_v16, %v2516_v50  ;;  %v4043_v55 = vpop.f32.mrb[59].mxu0 }
0x1201   :  { %4052 = vmatprep.mubr.msk.bf16.mxu0 %vm655_vm1, %v2571_v33  ;;  %v3533_v33 = vld [vmem:[%s5232_s10 + $0x1] ss:$0 sm:$0xff] }
0x1208   :  { %v2564_v56 = vpop.f32.mrb[40].mxu1 }
0x1209   :  { %v4048_v57 = vpop.f32.mrb[41].mxu1 }
0x120a   :  { %v2567_v59 = vpop.f32.mrb[42].mxu1  ;;  %v3534_v57 = vld [vmem:[%s5233_s11 + $0x1] ss:$0 sm:$0xff] }
0x120b   :  { %v2572_v62 = vpack.c.bf16 %v2567_v59, %v2564_v56  ;;  %v4049_v63 = vpop.f32.mrb[43].mxu1 }
0x120d   :  { %4053 = vmatmul.mubr.msk.bf16.vlgmr.msra.gmra.mrb[60].mxu0 %vm655_vm1, %v2572_v62 }
0x120e   :  { %4057 = vmatpush3.bf16.msra.mxu0 %v4211_v46  ;;  %4058 = vmatprep.mubr.msk.bf16.mxu0 %vm655_vm1, %v2318_v49 }
0x120f   :  { %4082 = vmatprep.subr.bf16.mxu0 %v4220_v8 }
0x1219   :  { %4059 = vmatmul.mubr.msk.bf16.vlgmr.msra.gmra.mrb[60].mxu0 %vm655_vm1, %v2319_v61 }
0x121a   :  { %4083 = vmatpush3.bf16.msra.mxu0 %v4220_v8 }
0x121b   :  { %4084 = vmatprep.subr.bf16.mxu0 %v4221_v21 }
0x121e   :  { %4085 = vmatpush3.bf16.msra.mxu0 %v4221_v21 }
0x121f   :  { %4086 = vmatprep.subr.bf16.mxu0 %v4222_v22 }
0x1222   :  { %4087 = vmatpush3.bf16.msra.mxu0 %v4222_v22 }
0x1223   :  { %4088 = vmatprep.subr.bf16.mxu0 %v4223_v9 }
0x1226   :  { %4089 = vmatpush3.bf16.msra.mxu0 %v4223_v9 }
0x1227   :  { %4090 = vmatprep.subr.bf16.mxu0 %v4224_v10 }
0x122a   :  { %4091 = vmatpush3.bf16.msra.mxu0 %v4224_v10 }
0x122b   :  { %4092 = vmatprep.subr.bf16.mxu0 %v4225_v11 }
0x122e   :  { %4093 = vmatpush3.bf16.msra.mxu0 %v4225_v11 }
0x122f   :  { %4094 = vmatprep.subr.bf16.mxu0 %v4226_v12 }
0x1232   :  { %4095 = vmatpush3.bf16.msra.mxu0 %v4226_v12 }
0x12ec   :  { %v4060_v0 = vpop.f32.mrb[60].mxu0 }
0x12ed   :  { %v2700_v2 = vadd.f32 %v4060_v0, %v4816_v47  ;;  %v2683_v3 = vpop.f32.mrb[61].mxu0 }
0x12ee   :  { %v2698_v4 = vadd.f32 %v2683_v3, %v4823_v53  ;;  %v4061_v5 = vpop.f32.mrb[62].mxu0 }
0x12ef   :  { %v5049_v6 = vadd.f32 %v3530_v1, %v2700_v2  ;;  %v2686_v44 = vpop.f32.mrb[63].mxu0  ;;  %v2701_v49 = vadd.f32 %v4061_v5, %v4819_v51 }
0x12f0   :  { %v5051_v48 = vadd.f32 %v3530_v1, %v2698_v4  ;;  %v2699_v58 = vadd.f32 %v2686_v44, %v4827_v54 }
0x12f1   :  { %2722 = vadd.xlane.f32.xlu0 %v5049_v6  ;;  %v5059_v47 = vadd.f32 %v3530_v1, %v2701_v49  ;;  %v2732_v54 = vmul.f32 %v5049_v6, %v5049_v6 }
0x12f2   :  { %v5056_v60 = vadd.f32 %v3530_v1, %v2699_v58  ;;  %2718 = vadd.xlane.f32.xlu1 %v5051_v48  ;;  %v2730_v53 = vmul.f32 %v5051_v48, %v5051_v48 }
0x12f3   :  { %v2733_v61 = vmul.f32 %v5059_v47, %v5059_v47 }
0x12f4   :  { %v2731_v51 = vmul.f32 %v5056_v60, %v5056_v60 }
0x12f5   :  { %2720 = vadd.xlane.f32.xlu0 %v5056_v60 }
0x12f6   :  { %2724 = vadd.xlane.f32.xlu1 %v5059_v47 }
0x12f9   :  { %2734 = vadd.xlane.f32.xlu0 %v2730_v53 }
0x12fa   :  { %2736 = vadd.xlane.f32.xlu1 %v2731_v51 }
0x12fd   :  { %2738 = vadd.xlane.f32.xlu0 %v2732_v54 }
0x12fe   :  { %2740 = vadd.xlane.f32.xlu1 %v2733_v61 }
0x137e   :  { %v2723_v13 = vpop.xlane.xlu0 %2722 }
0x137f   :  { %v2719_v15 = vpop.xlane.xlu1 %2718  ;;  %v2728_v29 = vmul.f32 0.03125, %v2723_v13  ;;  %v4227_v13 = vld [vmem:[%s5234_s14 + $0x78] sm:$0xff]  }
0x1380   :  { %v2726_v25 = vmul.f32 0.03125, %v2719_v15  ;;  %4096 = vmatprep.subr.bf16.mxu0 %v4227_v13  ;;  %v3552_v15 = vld [vmem:[%s5235_s13 + $0x1] ss:$0 sm:$0xff] }
0x1381   :  { %v2748_v42 = vmul.f32 %v2728_v29, %v2728_v29  ;;  %v2756_v62 = vsub.f32 %v5049_v6, %v2728_v29  ;;  %4097 = vmatpush3.bf16.msra.mxu0 %v4227_v13 }
0x1382   :  { %v2721_v19 = vpop.xlane.xlu0 %2720  ;;  %v2746_v30 = vmul.f32 %v2726_v25, %v2726_v25  ;;  %v2754_v50 = vsub.f32 %v5051_v48, %v2726_v25 }
0x1383   :  { %v2725_v26 = vpop.xlane.xlu1 %2724  ;;  %v2727_v27 = vmul.f32 0.03125, %v2721_v19 }
0x1384   :  { %v2729_v37 = vmul.f32 0.03125, %v2725_v26 }
0x1385   :  { %v2747_v36 = vmul.f32 %v2727_v27, %v2727_v27  ;;  %v2755_v16 = vsub.f32 %v5056_v60, %v2727_v27 }
0x1386   :  { %v2735_v28 = vpop.xlane.xlu0 %2734  ;;  %v2749_v43 = vmul.f32 %v2729_v37, %v2729_v37  ;;  %v2757_v1 = vsub.f32 %v5059_v47, %v2729_v37 }
0x1387   :  { %v2742_v32 = vmul.f32 0.03125, %v2735_v28  ;;  %v2737_v35 = vpop.xlane.xlu1 %2736 }
0x1388   :  { %v2743_v38 = vmul.f32 0.03125, %v2737_v35 }
0x1389   :  { %v2750_v39 = vsub.f32 %v2742_v32, %v2746_v30 }
0x138a   :  { %v2751_v40 = vsub.f32 %v2743_v38, %v2747_v36  ;;  %v2739_v41 = vpop.xlane.xlu0 %2738 }
0x138b   :  { %v2758_v14 = vadd.f32 1e-05, %v2750_v39  ;;  %v2744_v18 = vmul.f32 0.03125, %v2739_v41  ;;  %v2741_v52 = vpop.xlane.xlu1 %2740 }
0x138c   :  { %v2759_v31 = vadd.f32 1e-05, %v2751_v40  ;;  %v2745_v20 = vmul.f32 0.03125, %v2741_v52 }
0x138d   :  { %4332 = vrsqrt.f32 %v2758_v14  ;;  %v2752_v23 = vsub.f32 %v2744_v18, %v2748_v42 }
0x138e   :  { %4334 = vrsqrt.f32 %v2759_v31  ;;  %v2753_v24 = vsub.f32 %v2745_v20, %v2749_v43 }
0x138f   :  { %v2760_v34 = vadd.f32 1e-05, %v2752_v23 }
0x1390   :  { %v2761_v46 = vadd.f32 1e-05, %v2753_v24 }
0x1391   :  { %4336 = vrsqrt.f32 %v2760_v34 }
0x1392   :  { %4338 = vrsqrt.f32 %v2761_v46 }
0x1397   :  { %v4333_v17 = vpop.eup %4332 }
0x1398   :  { %v4335_v55 = vpop.eup %4334  ;;  %v2766_v56 = vmul.f32 %v4333_v17, %v2754_v50 }
0x1399   :  { %v2767_v59 = vmul.f32 %v4335_v55, %v2755_v16 }
0x139a   :  { %v2776_v63 = vmul.f32 %v3533_v33, %v2766_v56 }
0x139b   :  { %v4337_v0 = vpop.eup %4336  ;;  %v2777_v2 = vmul.f32 %v3533_v33, %v2767_v59 }
0x139c   :  { %v4339_v3 = vpop.eup %4338  ;;  %v2786_v4 = vadd.f32 %v3534_v57, %v2776_v63  ;;  %v2768_v5 = vmul.f32 %v4337_v0, %v2756_v62 }
0x139d   :  { %v2787_v44 = vadd.f32 %v3534_v57, %v2777_v2  ;;  %v2769_v49 = vmul.f32 %v4339_v3, %v2757_v1 }
0x139e   :  { %v2778_v58 = vmul.f32 %v3533_v33, %v2768_v5 }
0x139f   :  { %v2790_v53 = vpack.c.bf16 %v2787_v44, %v2786_v4  ;;  %v2779_v51 = vmul.f32 %v3533_v33, %v2769_v49 }
0x13a0   :  { %v2788_v54 = vadd.f32 %v3534_v57, %v2778_v58 }
0x13a1   :  { %4078 = vmatprep.mubr.bf16.mxu1 %v2790_v53  ;;  %v2789_v61 = vadd.f32 %v3534_v57, %v2779_v51  ;;  %v3578_v51 = vld [vmem:[%s5236_s15 + $0x1] ss:$0 sm:$0xff] }
0x13a3   :  { %v2791_v7 = vpack.c.bf16 %v2789_v61, %v2788_v54 }
0x13a5   :  { %4079 = vmatmul.mubr.bf16.vlgmr.msra.gmra.mrb[44].mxu1 %v2791_v7 }
0x13a6   :  { %4118 = vmatprep.mubr.msk.bf16.mxu1 %vm4357_vm0, %v4356_v45 }
0x1478   :  { %v4080_v19 = vpop.f32.mrb[44].mxu1 }
0x1479   :  { %v2908_v25 = vadd.f32 %v4080_v19, %v3552_v15  ;;  %v2899_v26 = vpop.f32.mrb[45].mxu1  ;;  %v4228_v19 = vld [vmem:[%s5237_s18] sm:$0xff]  }
0x147a   :  { %v2900_v27 = vadd.f32 %v3552_v15, %v2899_v26  ;;  %v4081_v28 = vpop.f32.mrb[46].mxu1  ;;  %4103 = vmatpush3.bf16.msra.mxu1 %v4228_v19  ;;  %v4230_v26 = vld [vmem:[%s5237_s18 + $0x10] sm:$0xff]  }
0x147b   :  { %v2916_v29 = vmul.f32 %v2908_v25, %v2908_v25  ;;  %v2911_v30 = vadd.f32 %v4081_v28, %v3552_v15  ;;  %v2902_v32 = vpop.f32.mrb[47].mxu1  ;;  %4104 = vmatprep.subr.bf16.mxu1 %v4356_v45  ;;  %v4232_v28 = vld [vmem:[%s5237_s18 + $0x20] sm:$0xff]  }
0x147c   :  { %v2914_v35 = vmul.f32 %v2900_v27, %v2900_v27  ;;  %v2903_v36 = vadd.f32 %v3552_v15, %v2902_v32  ;;  %v4235_v32 = vld [vmem:[%s5237_s18 + $0x38] sm:$0xff]  }
0x147d   :  { %v2920_v37 = vmul.f32 %v2916_v29, %v2908_v25  ;;  %v2917_v38 = vmul.f32 %v2911_v30, %v2911_v30  ;;  %v4233_v29 = vld [vmem:[%s5237_s18 + $0x28] sm:$0xff]  }
0x147e   :  { %v2918_v39 = vmul.f32 %v2914_v35, %v2900_v27  ;;  %v2915_v40 = vmul.f32 %v2903_v36, %v2903_v36 }
0x147f   :  { %v2924_v41 = vmul.f32 0.044715, %v2920_v37  ;;  %v2921_v42 = vmul.f32 %v2917_v38, %v2911_v30 }
0x1480   :  { %v2922_v14 = vmul.f32 0.044715, %v2918_v39  ;;  %v2919_v18 = vmul.f32 %v2915_v40, %v2903_v36 }
0x1481   :  { %v2928_v52 = vadd.f32 %v2924_v41, %v2908_v25  ;;  %v2925_v43 = vmul.f32 0.044715, %v2921_v42 }
0x1482   :  { %v2926_v31 = vadd.f32 %v2922_v14, %v2900_v27  ;;  %v2923_v20 = vmul.f32 0.044715, %v2919_v18 }
0x1483   :  { %v2932_v23 = vmul.f32 0.7978846, %v2928_v52  ;;  %v2929_v24 = vadd.f32 %v2925_v43, %v2911_v30 }
0x1484   :  { %v2930_v34 = vmul.f32 0.7978846, %v2926_v31  ;;  %v2927_v46 = vadd.f32 %v2923_v20, %v2903_v36 }
0x1485   :  { %4340 = vtanh.f32 %v2932_v23  ;;  %v2933_v50 = vmul.f32 0.7978846, %v2929_v24 }
0x1486   :  { %4342 = vtanh.f32 %v2930_v34  ;;  %v2931_v17 = vmul.f32 0.7978846, %v2927_v46 }
0x1487   :  { %4344 = vtanh.f32 %v2933_v50 }
0x1488   :  { %4346 = vtanh.f32 %v2931_v17 }
0x148f   :  { %v4341_v16 = vpop.eup %4340 }
0x1490   :  { %v4343_v33 = vpop.eup %4342  ;;  %v2940_v55 = vadd.f32 1.0, %v4341_v16 }
0x1491   :  { %v4345_v56 = vpop.eup %4344  ;;  %v2938_v57 = vadd.f32 1.0, %v4343_v33 }
0x1492   :  { %v4347_v59 = vpop.eup %4346  ;;  %v2944_v62 = vmul.f32 0.5, %v2940_v55  ;;  %v2941_v63 = vadd.f32 1.0, %v4345_v56 }
0x1493   :  { %v2939_v0 = vadd.f32 1.0, %v4347_v59  ;;  %v2942_v1 = vmul.f32 0.5, %v2938_v57 }
0x1494   :  { %v2945_v2 = vmul.f32 0.5, %v2941_v63  ;;  %v2948_v4 = vmul.f32 %v2944_v62, %v2908_v25  ;;  %v4229_v25 = vld [vmem:[%s5237_s18 + $0x8] sm:$0xff]  }
0x1495   :  { %v2943_v3 = vmul.f32 0.5, %v2939_v0  ;;  %v2946_v44 = vmul.f32 %v2942_v1, %v2900_v27  ;;  %4105 = vmatpush3.bf16.msra.mxu1 %v4229_v25  ;;  %v4231_v27 = vld [vmem:[%s5237_s18 + $0x18] sm:$0xff]   ;;  %v3587_v1 = vld [vmem:[%s5238_s16] ss:$0 sm:$0xff] }
0x1496   :  { %v2949_v5 = vmul.f32 %v2945_v2, %v2911_v30  ;;  %4106 = vmatprep.subr.bf16.mxu1 %v4356_v45  ;;  %v4234_v30 = vld [vmem:[%s5237_s18 + $0x30] sm:$0xff]  }
0x1497   :  { %v2947_v49 = vmul.f32 %v2943_v3, %v2903_v36 }
0x1498   :  { %v2951_v58 = vpack.c.bf16 %v2949_v5, %v2948_v4  ;;  %v3588_v5 = vld [vmem:[%s5239_s17] ss:$0 sm:$0xff] }
0x1499   :  { %v2950_v53 = vpack.c.bf16 %v2947_v49, %v2946_v44  ;;  %4107 = vmatpush3.bf16.msra.mxu1 %v4230_v26 }
0x149a   :  { %4108 = vmatprep.subr.bf16.mxu1 %v4356_v45 }
0x149b   :  { %4098 = vmatprep.mubr.bf16.mxu0 %v2950_v53 }
0x149c   :  { %4099 = vmatmul.mubr.bf16.vlgmr.msra.gmra.mrb[64].mxu0 %v2951_v58 }
0x149d   :  { %4109 = vmatpush3.bf16.msra.mxu1 %v4231_v27 }
0x149e   :  { %4110 = vmatprep.subr.bf16.mxu1 %v4356_v45 }
0x14a1   :  { %4111 = vmatpush3.bf16.msra.mxu1 %v4232_v28 }
0x14a2   :  { %4112 = vmatprep.subr.bf16.mxu1 %v4356_v45 }
0x14a5   :  { %4113 = vmatpush3.bf16.msra.mxu1 %v4233_v29 }
0x14a6   :  { %4114 = vmatprep.subr.bf16.mxu1 %v4356_v45 }
0x14a9   :  { %4115 = vmatpush3.bf16.msra.mxu1 %v4234_v30 }
0x14aa   :  { %4116 = vmatprep.subr.bf16.mxu1 %v4356_v45 }
0x14ad   :  { %4117 = vmatpush3.bf16.msra.mxu1 %v4235_v32 }
0x156f   :  { %v4100_v54 = vpop.f32.mrb[64].mxu0 }
0x1570   :  { %v3068_v61 = vadd.f32 %v4100_v54, %v3578_v51  ;;  %v3059_v7 = vpop.f32.mrb[65].mxu0 }
0x1571   :  { %v4101_v8 = vpop.f32.mrb[66].mxu0  ;;  %v3060_v22 = vadd.f32 %v3578_v51, %v3059_v7 }
0x1572   :  { %v5139_v21 = vadd.f32 %v3068_v61, %v5049_v6  ;;  %v3071_v9 = vadd.f32 %v4101_v8, %v3578_v51  ;;  %v3062_v10 = vpop.f32.mrb[67].mxu0 }
0x1573   :  { %v3063_v12 = vadd.f32 %v3578_v51, %v3062_v10  ;;  %v5146_v13 = vadd.f32 %v3060_v22, %v5051_v48 }
0x1574   :  { %v5142_v11 = vadd.f32 %v3071_v9, %v5059_v47  ;;  %3084 = vadd.xlane.f32.xlu0 %v5139_v21  ;;  %v3094_v48 = vmul.f32 %v5139_v21, %v5139_v21 }
0x1575   :  { %v5150_v15 = vadd.f32 %v3063_v12, %v5056_v60  ;;  %v3092_v6 = vmul.f32 %v5146_v13, %v5146_v13 }
0x1576   :  { %3086 = vadd.xlane.f32.xlu1 %v5142_v11  ;;  %v3095_v60 = vmul.f32 %v5142_v11, %v5142_v11 }
0x1577   :  { %v3093_v47 = vmul.f32 %v5150_v15, %v5150_v15 }
0x1578   :  { %3080 = vadd.xlane.f32.xlu0 %v5146_v13 }
0x157a   :  { %3082 = vadd.xlane.f32.xlu1 %v5150_v15 }
0x157c   :  { %3096 = vadd.xlane.f32.xlu0 %v3092_v6 }
0x157e   :  { %3098 = vadd.xlane.f32.xlu1 %v3093_v47 }
0x1580   :  { %3100 = vadd.xlane.f32.xlu0 %v3094_v48 }
0x1582   :  { %3102 = vadd.xlane.f32.xlu1 %v3095_v60 }
0x1601   :  { %v3085_v35 = vpop.xlane.xlu0 %3084 }
0x1602   :  { %v3090_v42 = vmul.f32 0.03125, %v3085_v35 }
0x1603   :  { %v3087_v36 = vpop.xlane.xlu1 %3086 }
0x1604   :  { %v3091_v52 = vmul.f32 0.03125, %v3087_v36  ;;  %v3110_v34 = vmul.f32 %v3090_v42, %v3090_v42  ;;  %v3118_v44 = vsub.f32 %v5139_v21, %v3090_v42 }
0x1605   :  { %v3081_v37 = vpop.xlane.xlu0 %3080 }
0x1606   :  { %v3088_v38 = vmul.f32 0.03125, %v3081_v37  ;;  %v3111_v17 = vmul.f32 %v3091_v52, %v3091_v52  ;;  %v3119_v51 = vsub.f32 %v5142_v11, %v3091_v52  ;;  %v3287_v52 = vlaneseq }
0x1607   :  { %v3083_v39 = vpop.xlane.xlu1 %3082 }
0x1608   :  { %v3089_v40 = vmul.f32 0.03125, %v3083_v39  ;;  %v3108_v14 = vmul.f32 %v3088_v38, %v3088_v38  ;;  %v3116_v63 = vsub.f32 %v5146_v13, %v3088_v38 }
0x1609   :  { %v3097_v41 = vpop.xlane.xlu0 %3096 }
0x160a   :  { %v3104_v18 = vmul.f32 0.03125, %v3097_v41  ;;  %v3109_v31 = vmul.f32 %v3089_v40, %v3089_v40  ;;  %v3117_v2 = vsub.f32 %v5150_v15, %v3089_v40 }
0x160b   :  { %v3099_v43 = vpop.xlane.xlu1 %3098 }
0x160c   :  { %v3112_v20 = vsub.f32 %v3104_v18, %v3108_v14  ;;  %v3105_v23 = vmul.f32 0.03125, %v3099_v43  ;;  %v4359_v14 = vmov 1966171168  }
0x160d   :  { %v3101_v24 = vpop.xlane.xlu0 %3100  ;;  %v3285_v18 = vunpack.c.l.s4 %v4359_v14 }
0x160e   :  { %v3120_v46 = vadd.f32 1e-05, %v3112_v20  ;;  %v3113_v45 = vsub.f32 %v3105_v23, %v3109_v31  ;;  %v3106_v50 = vmul.f32 0.03125, %v3101_v24  ;;  %v3288_v31 = vshrl.u32 %v3287_v52, 7 }
0x160f   :  { %v3103_v16 = vpop.xlane.xlu1 %3102  ;;  %v3286_v43 = vunpack.c.0.s8 %v3285_v18 }
0x1610   :  { %4348 = vrsqrt.f32 %v3120_v46  ;;  %v3121_v33 = vadd.f32 1e-05, %v3113_v45  ;;  %v3114_v55 = vsub.f32 %v3106_v50, %v3110_v34  ;;  %v3107_v56 = vmul.f32 0.03125, %v3103_v16 }
0x1611   :  { %v3289_v20 = vsub.s32 %v3286_v43, %v3288_v31 }
0x1612   :  { %4350 = vrsqrt.f32 %v3121_v33  ;;  %v3122_v57 = vadd.f32 1e-05, %v3114_v55  ;;  %v3115_v59 = vsub.f32 %v3107_v56, %v3111_v17 }
0x1614   :  { %4352 = vrsqrt.f32 %v3122_v57  ;;  %v3123_v62 = vadd.f32 1e-05, %v3115_v59 }
0x1616   :  { %4354 = vrsqrt.f32 %v3123_v62 }
0x161a   :  { %v4349_v0 = vpop.eup %4348 }
0x161b   :  { %v3128_v3 = vmul.f32 %v4349_v0, %v3116_v63 }
0x161c   :  { %v4351_v4 = vpop.eup %4350 }
0x161d   :  { %v3138_v49 = vmul.f32 %v3587_v1, %v3128_v3  ;;  %v3129_v58 = vmul.f32 %v4351_v4, %v3117_v2 }
0x161e   :  { %v4353_v53 = vpop.eup %4352 }
0x161f   :  { %v3148_v54 = vadd.f32 %v3588_v5, %v3138_v49  ;;  %v3139_v61 = vmul.f32 %v3587_v1, %v3129_v58  ;;  %v3130_v7 = vmul.f32 %v4353_v53, %v3118_v44 }
0x1620   :  { %v4355_v8 = vpop.eup %4354 }
0x1621   :  { %v3149_v22 = vadd.f32 %v3588_v5, %v3139_v61  ;;  %v3140_v9 = vmul.f32 %v3587_v1, %v3130_v7  ;;  %v3131_v10 = vmul.f32 %v4355_v8, %v3119_v51  ;;  %3310 = vst [vmem:[%s5240_s19 + $0x1] sm:$0xff] %v3148_v54 }
0x1623   :  { %v3150_v12 = vadd.f32 %v3588_v5, %v3140_v9  ;;  %v3141_v13 = vmul.f32 %v3587_v1, %v3131_v10  ;;  %v3152_v15 = vadd.f32 %v3149_v22, %v3148_v54  ;;  %3311 = vst [vmem:[%s5240_s19 + $0x9] sm:$0xff] %v3149_v22 }
0x1625   :  { %v3151_v21 = vadd.f32 %v3588_v5, %v3141_v13  ;;  %v3153_v11 = vrot.slane %v3152_v15, 4  ;;  %3312 = vst [vmem:[%s5240_s19 + $0x19] sm:$0xff] %v3150_v12 }
0x1627   :  { %v3154_v6 = vadd.f32 %v3153_v11, %v3152_v15  ;;  %v3159_v47 = vadd.f32 %v3151_v21, %v3150_v12  ;;  %3313 = vst [vmem:[%s5240_s19 + $0x21] sm:$0xff] %v3151_v21 }
0x1629   :  { %v3155_v48 = vrot.slane %v3154_v6, 2  ;;  %v3160_v60 = vrot.slane %v3159_v47, 4 }
0x162b   :  { %v3156_v19 = vadd.f32 %v3155_v48, %v3154_v6  ;;  %v3161_v25 = vadd.f32 %v3160_v60, %v3159_v47 }
0x162d   :  { %v3157_v26 = vrot.slane %v3156_v19, 1  ;;  %v3162_v27 = vrot.slane %v3161_v25, 2 }
0x162f   :  { %v3158_v28 = vadd.f32 %v3157_v26, %v3156_v19  ;;  %v3163_v29 = vadd.f32 %v3162_v27, %v3161_v25 }
0x1631   :  { %v3164_v30 = vrot.slane %v3163_v29, 1  ;;  %v3167_v32 = vmul.f32 0.0625, %v3158_v28 }
0x1633   :  { %v3165_v35 = vadd.f32 %v3164_v30, %v3163_v29  ;;  %v3169_v37 = vpack.c.bf16 %v3167_v32, %v3167_v32 }
0x1635   :  { %v3168_v36 = vmul.f32 0.0625, %v3165_v35  ;;  %v3189_v39 = vunpack.c.l.b16 %v3169_v37 }
0x1637   :  { %v3170_v38 = vpack.c.bf16 %v3168_v36, %v3168_v36 }
0x1639   :  { %v3190_v40 = vunpack.c.l.b16 %v3170_v38 }
0x163b   :  { %v3192_v41 = vsel %vm3191_vm2, %v3190_v40, %v3189_v39 }
0x163c   :  { %v3193_v42 = vpack.c.b16 %v3192_v41, %v3192_v41 }
0x163e   :  { %4119 = vmatmul.mubr.bf16.vlgmr.msra.gmra.mrb[48].mxu1 %v3193_v42 }
0x1711   :  { %v3277_v23 = vpop.f32.mrb[48].mxu1 }
0x1712   :  { %v3290_v24 = vrot.slane %v3277_v23, %v3289_v20  ;;  %v4120_v34 = vpop.f32.mrb[49].mxu1 }
0x1713   :  { %v3280_v46 = vpop.f32.mrb[50].mxu1 }
0x1714   :  { %v3291_v45 = vcombine.high %v3290_v24, %v3290_v24  ;;  %3597 = vst.sshfl [vmem:[%s5240_s19] sm:$0x1 pattern:$0x73625140] %v3290_v24  ;;  %v4121_v50 = vpop.f32.mrb[51].mxu1 }
0x1716   :  { %3598 = vst.sshfl [vmem:[%s5240_s19 + $0x18] sm:$0x1 pattern:$0x73625140] %v3291_v45 }

</bundles_post_ra>
